<compile_context>
chip_gen: v7x
topology: tpu7x:2x2x1
jax: 0.10.0
libtpu: 0.0.40
codegen_flags: <defaults>
</compile_context>

<pallas_src>
import jax
import jax.numpy as jnp
from jax import lax
from jax.experimental import pallas as pl
from jax.experimental.pallas import tpu as pltpu

INPUT_SIZE = 29
HIDDEN = 256


def lstm_last_linear_kernel(x_ref, wih_ref, whh_ref, b_ref, wout_ref, bout_ref,
                            out_ref, pg_ref):
    T, B, I = x_ref.shape
    H = HIDDEN

    # ---- Phase 1: hoisted input projection (one batched matmul, off the
    # serial h-dependence chain) + fused bias. -------------------------------
    x_flat = x_ref[...].reshape(T * B, I)                       # (T*B, I)
    pg = jnp.dot(x_flat, wih_ref[...],
                 preferred_element_type=jnp.float32) + b_ref[...]
    pg_ref[...] = pg.reshape(T, B, 4 * H)                       # (T, B, 4H)

    # Per-gate recurrent weights, PyTorch gate order: i, f, g, o.
    whh_i = whh_ref[0]                                          # (H, H)
    whh_f = whh_ref[1]
    whh_g = whh_ref[2]
    whh_o = whh_ref[3]

    # ---- Phase 2: serial recurrence. i/f/g gate dots + their EUP/VPU math
    # come first; the o-gate dot is issued last so its MXU tiles stream while
    # the EUP (sigmoid/tanh) and VPU (c_new) work for i/f/g is in flight. ----
    def step(t, carry):
        h, c = carry
        pg_t = pg_ref[t]                                        # (B, 4H)
        i_g = jax.nn.sigmoid(pg_t[:, 0:H] +
                             jnp.dot(h, whh_i,
                                     preferred_element_type=jnp.float32))
        f_g = jax.nn.sigmoid(pg_t[:, H:2 * H] +
                             jnp.dot(h, whh_f,
                                     preferred_element_type=jnp.float32))
        g_g = jnp.tanh(pg_t[:, 2 * H:3 * H] +
                       jnp.dot(h, whh_g,
                               preferred_element_type=jnp.float32))
        c_new = f_g * c + i_g * g_g
        o_g = jax.nn.sigmoid(pg_t[:, 3 * H:4 * H] +
                             jnp.dot(h, whh_o,
                                     preferred_element_type=jnp.float32))
        h_new = o_g * jnp.tanh(c_new)
        return (h_new, c_new)

    h0 = jnp.zeros((B, H), jnp.float32)
    c0 = jnp.zeros((B, H), jnp.float32)
    unroll = True if T <= 32 else 8
    h_last, _ = lax.fori_loop(0, T, step, (h0, c0), unroll=unroll)

    # ---- Phase 3: final Linear as a lane (XLU) reduction, not an N=1 MXU op.
    out_ref[...] = (jnp.sum(h_last * wout_ref[...], axis=-1, keepdims=True)
                    + bout_ref[...])


def _vmem_budget_bytes(T, B_pad):
    H = HIDDEN
    x_bytes = T * B_pad * 128 * 4            # x lane-padded 29 -> 128
    wih_bytes = 32 * 4 * H * 4               # 29 -> 32 sublane pad
    whh_bytes = 4 * H * H * 4
    pg_bytes = T * B_pad * 4 * H * 4
    misc = 2 << 20
    total = x_bytes + wih_bytes + whh_bytes + pg_bytes + misc
    return int(min(64 << 20, max(16 << 20, 2 * total)))


def net1_forward(x, W_ih, W_hh, b_ih, b_hh, W_out, b_out):
    """x: (B, T, INPUT_SIZE) float32. Returns (B, 1) float32."""
    B, T, I = x.shape
    H = HIDDEN
    assert I == INPUT_SIZE

    # Pad batch to a multiple of the sublane width (8) for full-width vregs.
    B_pad = max(8, ((B + 7) // 8) * 8)

    x_tbi = jnp.transpose(x, (1, 0, 2))                 # (T, B, I)
    if B_pad != B:
        x_tbi = jnp.pad(x_tbi, ((0, 0), (0, B_pad - B), (0, 0)))

    wih_t = jnp.transpose(W_ih)                         # (I, 4H)
    # Pre-split W_hh (4H, H) into per-gate (H, H) blocks, transposed for h @ W.
    whh_gates = jnp.transpose(W_hh.reshape(4, H, H), (0, 2, 1))   # (4, H, H)
    bias = (b_ih + b_hh).reshape(1, 4 * H)              # (1, 4H)
    wout_row = W_out.reshape(1, H)                      # (1, H), lane-dense
    bout = b_out.reshape(1, 1)                          # (1, 1)

    vmem = pl.BlockSpec(memory_space=pltpu.MemorySpace.VMEM)

    flops = (2 * T * B_pad * I * 4 * H          # input projection
             + 2 * T * B_pad * H * 4 * H        # recurrence
             + 2 * B_pad * H)                   # final linear
    transcendentals = 5 * T * B_pad * H         # 3 sigmoid + 2 tanh per step
    bytes_accessed = (x_tbi.size + wih_t.size + whh_gates.size + bias.size
                      + wout_row.size + bout.size + B_pad) * 4

    out_pad = pl.pallas_call(
        lstm_last_linear_kernel,
        out_shape=jax.ShapeDtypeStruct((B_pad, 1), jnp.float32),
        in_specs=[vmem] * 6,
        out_specs=vmem,
        scratch_shapes=[
            pltpu.VMEM((T, B_pad, 4 * H), jnp.float32),   # hoisted pre-gates
        ],
        compiler_params=pltpu.CompilerParams(
            vmem_limit_bytes=_vmem_budget_bytes(T, B_pad)),
        cost_estimate=pl.CostEstimate(
            flops=flops,
            transcendentals=transcendentals,
            bytes_accessed=bytes_accessed),
    )(x_tbi, wih_t, whh_gates, bias, wout_row, bout)

    return out_pad[:B]


def ref_forward(x, W_ih, W_hh, b_ih, b_hh, W_out, b_out):
    """Pure-JAX reference matching nn.LSTM + nn.Linear on last timestep."""
    B, T, I = x.shape
    H = HIDDEN
    h = jnp.zeros((B, H), jnp.float32)
    c = jnp.zeros((B, H), jnp.float32)

    def step(carry, x_t):
        h, c = carry
        g = x_t @ W_ih.T + b_ih + h @ W_hh.T + b_hh
        i = jax.nn.sigmoid(g[:, :H])
        f = jax.nn.sigmoid(g[:, H:2 * H])
        gg = jnp.tanh(g[:, 2 * H:3 * H])
        o = jax.nn.sigmoid(g[:, 3 * H:])
        c = f * c + i * gg
        h = o * jnp.tanh(c)
        return (h, c), None

    (h, c), _ = jax.lax.scan(step, (h, c), jnp.transpose(x, (1, 0, 2)))
    return h @ W_out.T + b_out


if __name__ == "__main__":
    key = jax.random.PRNGKey(0)
    B, T, I, H = 2, 8, INPUT_SIZE, HIDDEN

    k = jax.random.split(key, 8)
    bound = 1.0 / jnp.sqrt(H)  # PyTorch-style uniform init range
    W_ih = jax.random.uniform(k[0], (4 * H, I), jnp.float32, -bound, bound)
    W_hh = jax.random.uniform(k[1], (4 * H, H), jnp.float32, -bound, bound)
    b_ih = jax.random.uniform(k[2], (4 * H,), jnp.float32, -bound, bound)
    b_hh = jax.random.uniform(k[3], (4 * H,), jnp.float32, -bound, bound)
    W_out = jax.random.uniform(k[4], (1, H), jnp.float32, -bound, bound)
    b_out = jax.random.uniform(k[5], (1,), jnp.float32, -bound, bound)

    x = jax.random.normal(k[6], (B, T, I), jnp.float32)

    y = net1_forward(x, W_ih, W_hh, b_ih, b_hh, W_out, b_out)
    y = jax.block_until_ready(y)

    y_ref = ref_forward(x, W_ih, W_hh, b_ih, b_hh, W_out, b_out)
    assert y.shape == (B, 1)
    assert jnp.allclose(y, y_ref, rtol=1e-4, atol=1e-4), (y, y_ref)

    print("KERNEL_OK")
</pallas_src>

<mosaic_0001>
module attributes {stable_mosaic.version = 11 : i64} {
  func.func @lstm_last_linear_kernel(%arg0: memref<8x8x29xf32, #tpu.memory_space<vmem>>, %arg1: memref<29x1024xf32, #tpu.memory_space<vmem>>, %arg2: memref<4x256x256xf32, #tpu.memory_space<vmem>>, %arg3: memref<1x1024xf32, #tpu.memory_space<vmem>>, %arg4: memref<1x256xf32, #tpu.memory_space<vmem>>, %arg5: memref<1x1xf32, #tpu.memory_space<vmem>>, %arg6: memref<8x1xf32, #tpu.memory_space<vmem>>, %arg7: memref<8x8x1024xf32, #tpu.memory_space<vmem>>) attributes {dimension_semantics = [], scalar_prefetch = 0 : i64, scratch_operands = 1 : i64, tpu.core_type = #tpu.core_type<tc>} {
    %c0 = arith.constant 0 : index
    %c0_0 = arith.constant 0 : index
    %c0_1 = arith.constant 0 : index
    %0 = vector.load %arg0[%c0, %c0_0, %c0_1] : memref<8x8x29xf32, #tpu.memory_space<vmem>>, vector<8x8x29xf32>
    %1 = vector.shape_cast %0 : vector<8x8x29xf32> to vector<64x29xf32>
    %c0_2 = arith.constant 0 : index
    %c0_3 = arith.constant 0 : index
    %2 = vector.load %arg1[%c0_2, %c0_3] : memref<29x1024xf32, #tpu.memory_space<vmem>>, vector<29x1024xf32>
    %cst = arith.constant dense<0.000000e+00> : vector<64x1024xf32>
    %3 = tpu.matmul %1, %2, %cst {dimension_numbers = #tpu.dot_dimension_numbers<[1], [0], [0], [1], [0, 0, 1, 1], [], []>} : vector<64x29xf32>, vector<29x1024xf32>, vector<64x1024xf32> -> vector<64x1024xf32>
    %c0_4 = arith.constant 0 : index
    %c0_5 = arith.constant 0 : index
    %4 = vector.load %arg3[%c0_4, %c0_5] : memref<1x1024xf32, #tpu.memory_space<vmem>>, vector<1x1024xf32>
    %5 = vector.broadcast %4 : vector<1x1024xf32> to vector<64x1024xf32>
    %6 = arith.addf %3, %5 : vector<64x1024xf32>
    %7 = vector.shape_cast %6 : vector<64x1024xf32> to vector<8x8x1024xf32>
    %c0_6 = arith.constant 0 : index
    %c0_7 = arith.constant 0 : index
    %c0_8 = arith.constant 0 : index
    %8 = vector.load %arg7[%c0_6, %c0_7, %c0_8] : memref<8x8x1024xf32, #tpu.memory_space<vmem>>, vector<8x8x1024xf32>
    tpu.vector_store %arg7[%c0_6, %c0_7, %c0_8], %7 {strides = array<i32>} : memref<8x8x1024xf32, #tpu.memory_space<vmem>>, vector<8x8x1024xf32>,
    %c0_9 = arith.constant 0 : index
    %c0_10 = arith.constant 0 : index
    %c0_11 = arith.constant 0 : index
    %9 = vector.load %arg2[%c0_9, %c0_10, %c0_11] : memref<4x256x256xf32, #tpu.memory_space<vmem>>, vector<1x256x256xf32>
    %10 = vector.shape_cast %9 : vector<1x256x256xf32> to vector<256x256xf32>
    %c1 = arith.constant 1 : index
    %c0_12 = arith.constant 0 : index
    %c0_13 = arith.constant 0 : index
    %11 = vector.load %arg2[%c1, %c0_12, %c0_13] : memref<4x256x256xf32, #tpu.memory_space<vmem>>, vector<1x256x256xf32>
    %12 = vector.shape_cast %11 : vector<1x256x256xf32> to vector<256x256xf32>
    %c2 = arith.constant 2 : index
    %c0_14 = arith.constant 0 : index
    %c0_15 = arith.constant 0 : index
    %13 = vector.load %arg2[%c2, %c0_14, %c0_15] : memref<4x256x256xf32, #tpu.memory_space<vmem>>, vector<1x256x256xf32>
    %14 = vector.shape_cast %13 : vector<1x256x256xf32> to vector<256x256xf32>
    %c3 = arith.constant 3 : index
    %c0_16 = arith.constant 0 : index
    %c0_17 = arith.constant 0 : index
    %15 = vector.load %arg2[%c3, %c0_16, %c0_17] : memref<4x256x256xf32, #tpu.memory_space<vmem>>, vector<1x256x256xf32>
    %16 = vector.shape_cast %15 : vector<1x256x256xf32> to vector<256x256xf32>
    %cst_18 = arith.constant 0.000000e+00 : f32
    %17 = vector.broadcast %cst_18 : f32 to vector<8x256xf32>
    %cst_19 = arith.constant 0.000000e+00 : f32
    %18 = vector.broadcast %cst_19 : f32 to vector<8x256xf32>
    %c0_i32 = arith.constant 0 : i32
    %19 = arith.index_cast %c0_i32 : i32 to index
    %c0_20 = arith.constant 0 : index
    %c0_21 = arith.constant 0 : index
    %20 = vector.load %arg7[%19, %c0_20, %c0_21] : memref<8x8x1024xf32, #tpu.memory_space<vmem>>, vector<1x8x1024xf32>
    %21 = vector.shape_cast %20 : vector<1x8x1024xf32> to vector<8x1024xf32>
    %22 = vector.extract_strided_slice %21 {offsets = [0, 0], sizes = [8, 256], strides = [1, 1]} : vector<8x1024xf32> to vector<8x256xf32>
    %cst_22 = arith.constant dense<0.000000e+00> : vector<8x256xf32>
    %23 = tpu.matmul %17, %10, %cst_22 {dimension_numbers = #tpu.dot_dimension_numbers<[1], [0], [0], [1], [0, 0, 1, 1], [], []>} : vector<8x256xf32>, vector<256x256xf32>, vector<8x256xf32> -> vector<8x256xf32>
    %24 = arith.addf %22, %23 : vector<8x256xf32>
    %25 = arith.negf %24 : vector<8x256xf32>
    %26 = math.exp %25 : vector<8x256xf32>
    %cst_23 = arith.constant 1.000000e+00 : f32
    %27 = vector.broadcast %cst_23 : f32 to vector<8x256xf32>
    %28 = arith.addf %27, %26 : vector<8x256xf32>
    %29 = arith.divf %27, %28 : vector<8x256xf32>
    %30 = vector.extract_strided_slice %21 {offsets = [0, 256], sizes = [8, 256], strides = [1, 1]} : vector<8x1024xf32> to vector<8x256xf32>
    %cst_24 = arith.constant dense<0.000000e+00> : vector<8x256xf32>
    %31 = tpu.matmul %17, %12, %cst_24 {dimension_numbers = #tpu.dot_dimension_numbers<[1], [0], [0], [1], [0, 0, 1, 1], [], []>} : vector<8x256xf32>, vector<256x256xf32>, vector<8x256xf32> -> vector<8x256xf32>
    %32 = arith.addf %30, %31 : vector<8x256xf32>
    %33 = arith.negf %32 : vector<8x256xf32>
    %34 = math.exp %33 : vector<8x256xf32>
    %cst_25 = arith.constant 1.000000e+00 : f32
    %35 = vector.broadcast %cst_25 : f32 to vector<8x256xf32>
    %36 = arith.addf %35, %34 : vector<8x256xf32>
    %37 = arith.divf %35, %36 : vector<8x256xf32>
    %38 = vector.extract_strided_slice %21 {offsets = [0, 512], sizes = [8, 256], strides = [1, 1]} : vector<8x1024xf32> to vector<8x256xf32>
    %cst_26 = arith.constant dense<0.000000e+00> : vector<8x256xf32>
    %39 = tpu.matmul %17, %14, %cst_26 {dimension_numbers = #tpu.dot_dimension_numbers<[1], [0], [0], [1], [0, 0, 1, 1], [], []>} : vector<8x256xf32>, vector<256x256xf32>, vector<8x256xf32> -> vector<8x256xf32>
    %40 = arith.addf %38, %39 : vector<8x256xf32>
    %41 = math.tanh %40 : vector<8x256xf32>
    %42 = arith.mulf %37, %18 : vector<8x256xf32>
    %43 = arith.mulf %29, %41 : vector<8x256xf32>
    %44 = arith.addf %42, %43 : vector<8x256xf32>
    %45 = vector.extract_strided_slice %21 {offsets = [0, 768], sizes = [8, 256], strides = [1, 1]} : vector<8x1024xf32> to vector<8x256xf32>
    %cst_27 = arith.constant dense<0.000000e+00> : vector<8x256xf32>
    %46 = tpu.matmul %17, %16, %cst_27 {dimension_numbers = #tpu.dot_dimension_numbers<[1], [0], [0], [1], [0, 0, 1, 1], [], []>} : vector<8x256xf32>, vector<256x256xf32>, vector<8x256xf32> -> vector<8x256xf32>
    %47 = arith.addf %45, %46 : vector<8x256xf32>
    %48 = arith.negf %47 : vector<8x256xf32>
    %49 = math.exp %48 : vector<8x256xf32>
    %cst_28 = arith.constant 1.000000e+00 : f32
    %50 = vector.broadcast %cst_28 : f32 to vector<8x256xf32>
    %51 = arith.addf %50, %49 : vector<8x256xf32>
    %52 = arith.divf %50, %51 : vector<8x256xf32>
    %53 = math.tanh %44 : vector<8x256xf32>
    %54 = arith.mulf %52, %53 : vector<8x256xf32>
    %c1_i32 = arith.constant 1 : i32
    %55 = arith.index_cast %c1_i32 : i32 to index
    %c0_29 = arith.constant 0 : index
    %c0_30 = arith.constant 0 : index
    %56 = vector.load %arg7[%55, %c0_29, %c0_30] : memref<8x8x1024xf32, #tpu.memory_space<vmem>>, vector<1x8x1024xf32>
    %57 = vector.shape_cast %56 : vector<1x8x1024xf32> to vector<8x1024xf32>
    %58 = vector.extract_strided_slice %57 {offsets = [0, 0], sizes = [8, 256], strides = [1, 1]} : vector<8x1024xf32> to vector<8x256xf32>
    %cst_31 = arith.constant dense<0.000000e+00> : vector<8x256xf32>
    %59 = tpu.matmul %54, %10, %cst_31 {dimension_numbers = #tpu.dot_dimension_numbers<[1], [0], [0], [1], [0, 0, 1, 1], [], []>} : vector<8x256xf32>, vector<256x256xf32>, vector<8x256xf32> -> vector<8x256xf32>
    %60 = arith.addf %58, %59 : vector<8x256xf32>
    %61 = arith.negf %60 : vector<8x256xf32>
    %62 = math.exp %61 : vector<8x256xf32>
    %cst_32 = arith.constant 1.000000e+00 : f32
    %63 = vector.broadcast %cst_32 : f32 to vector<8x256xf32>
    %64 = arith.addf %63, %62 : vector<8x256xf32>
    %65 = arith.divf %63, %64 : vector<8x256xf32>
    %66 = vector.extract_strided_slice %57 {offsets = [0, 256], sizes = [8, 256], strides = [1, 1]} : vector<8x1024xf32> to vector<8x256xf32>
    %cst_33 = arith.constant dense<0.000000e+00> : vector<8x256xf32>
    %67 = tpu.matmul %54, %12, %cst_33 {dimension_numbers = #tpu.dot_dimension_numbers<[1], [0], [0], [1], [0, 0, 1, 1], [], []>} : vector<8x256xf32>, vector<256x256xf32>, vector<8x256xf32> -> vector<8x256xf32>
    %68 = arith.addf %66, %67 : vector<8x256xf32>
    %69 = arith.negf %68 : vector<8x256xf32>
    %70 = math.exp %69 : vector<8x256xf32>
    %cst_34 = arith.constant 1.000000e+00 : f32
    %71 = vector.broadcast %cst_34 : f32 to vector<8x256xf32>
    %72 = arith.addf %71, %70 : vector<8x256xf32>
    %73 = arith.divf %71, %72 : vector<8x256xf32>
    %74 = vector.extract_strided_slice %57 {offsets = [0, 512], sizes = [8, 256], strides = [1, 1]} : vector<8x1024xf32> to vector<8x256xf32>
    %cst_35 = arith.constant dense<0.000000e+00> : vector<8x256xf32>
    %75 = tpu.matmul %54, %14, %cst_35 {dimension_numbers = #tpu.dot_dimension_numbers<[1], [0], [0], [1], [0, 0, 1, 1], [], []>} : vector<8x256xf32>, vector<256x256xf32>, vector<8x256xf32> -> vector<8x256xf32>
    %76 = arith.addf %74, %75 : vector<8x256xf32>
    %77 = math.tanh %76 : vector<8x256xf32>
    %78 = arith.mulf %73, %44 : vector<8x256xf32>
    %79 = arith.mulf %65, %77 : vector<8x256xf32>
    %80 = arith.addf %78, %79 : vector<8x256xf32>
    %81 = vector.extract_strided_slice %57 {offsets = [0, 768], sizes = [8, 256], strides = [1, 1]} : vector<8x1024xf32> to vector<8x256xf32>
    %cst_36 = arith.constant dense<0.000000e+00> : vector<8x256xf32>
    %82 = tpu.matmul %54, %16, %cst_36 {dimension_numbers = #tpu.dot_dimension_numbers<[1], [0], [0], [1], [0, 0, 1, 1], [], []>} : vector<8x256xf32>, vector<256x256xf32>, vector<8x256xf32> -> vector<8x256xf32>
    %83 = arith.addf %81, %82 : vector<8x256xf32>
    %84 = arith.negf %83 : vector<8x256xf32>
    %85 = math.exp %84 : vector<8x256xf32>
    %cst_37 = arith.constant 1.000000e+00 : f32
    %86 = vector.broadcast %cst_37 : f32 to vector<8x256xf32>
    %87 = arith.addf %86, %85 : vector<8x256xf32>
    %88 = arith.divf %86, %87 : vector<8x256xf32>
    %89 = math.tanh %80 : vector<8x256xf32>
    %90 = arith.mulf %88, %89 : vector<8x256xf32>
    %c2_i32 = arith.constant 2 : i32
    %91 = arith.index_cast %c2_i32 : i32 to index
    %c0_38 = arith.constant 0 : index
    %c0_39 = arith.constant 0 : index
    %92 = vector.load %arg7[%91, %c0_38, %c0_39] : memref<8x8x1024xf32, #tpu.memory_space<vmem>>, vector<1x8x1024xf32>
    %93 = vector.shape_cast %92 : vector<1x8x1024xf32> to vector<8x1024xf32>
    %94 = vector.extract_strided_slice %93 {offsets = [0, 0], sizes = [8, 256], strides = [1, 1]} : vector<8x1024xf32> to vector<8x256xf32>
    %cst_40 = arith.constant dense<0.000000e+00> : vector<8x256xf32>
    %95 = tpu.matmul %90, %10, %cst_40 {dimension_numbers = #tpu.dot_dimension_numbers<[1], [0], [0], [1], [0, 0, 1, 1], [], []>} : vector<8x256xf32>, vector<256x256xf32>, vector<8x256xf32> -> vector<8x256xf32>
    %96 = arith.addf %94, %95 : vector<8x256xf32>
    %97 = arith.negf %96 : vector<8x256xf32>
    %98 = math.exp %97 : vector<8x256xf32>
    %cst_41 = arith.constant 1.000000e+00 : f32
    %99 = vector.broadcast %cst_41 : f32 to vector<8x256xf32>
    %100 = arith.addf %99, %98 : vector<8x256xf32>
    %101 = arith.divf %99, %100 : vector<8x256xf32>
    %102 = vector.extract_strided_slice %93 {offsets = [0, 256], sizes = [8, 256], strides = [1, 1]} : vector<8x1024xf32> to vector<8x256xf32>
    %cst_42 = arith.constant dense<0.000000e+00> : vector<8x256xf32>
    %103 = tpu.matmul %90, %12, %cst_42 {dimension_numbers = #tpu.dot_dimension_numbers<[1], [0], [0], [1], [0, 0, 1, 1], [], []>} : vector<8x256xf32>, vector<256x256xf32>, vector<8x256xf32> -> vector<8x256xf32>
    %104 = arith.addf %102, %103 : vector<8x256xf32>
    %105 = arith.negf %104 : vector<8x256xf32>
    %106 = math.exp %105 : vector<8x256xf32>
    %cst_43 = arith.constant 1.000000e+00 : f32
    %107 = vector.broadcast %cst_43 : f32 to vector<8x256xf32>
    %108 = arith.addf %107, %106 : vector<8x256xf32>
    %109 = arith.divf %107, %108 : vector<8x256xf32>
    %110 = vector.extract_strided_slice %93 {offsets = [0, 512], sizes = [8, 256], strides = [1, 1]} : vector<8x1024xf32> to vector<8x256xf32>
    %cst_44 = arith.constant dense<0.000000e+00> : vector<8x256xf32>
    %111 = tpu.matmul %90, %14, %cst_44 {dimension_numbers = #tpu.dot_dimension_numbers<[1], [0], [0], [1], [0, 0, 1, 1], [], []>} : vector<8x256xf32>, vector<256x256xf32>, vector<8x256xf32> -> vector<8x256xf32>
    %112 = arith.addf %110, %111 : vector<8x256xf32>
    %113 = math.tanh %112 : vector<8x256xf32>
    %114 = arith.mulf %109, %80 : vector<8x256xf32>
    %115 = arith.mulf %101, %113 : vector<8x256xf32>
    %116 = arith.addf %114, %115 : vector<8x256xf32>
    %117 = vector.extract_strided_slice %93 {offsets = [0, 768], sizes = [8, 256], strides = [1, 1]} : vector<8x1024xf32> to vector<8x256xf32>
    %cst_45 = arith.constant dense<0.000000e+00> : vector<8x256xf32>
    %118 = tpu.matmul %90, %16, %cst_45 {dimension_numbers = #tpu.dot_dimension_numbers<[1], [0], [0], [1], [0, 0, 1, 1], [], []>} : vector<8x256xf32>, vector<256x256xf32>, vector<8x256xf32> -> vector<8x256xf32>
    %119 = arith.addf %117, %118 : vector<8x256xf32>
    %120 = arith.negf %119 : vector<8x256xf32>
    %121 = math.exp %120 : vector<8x256xf32>
    %cst_46 = arith.constant 1.000000e+00 : f32
    %122 = vector.broadcast %cst_46 : f32 to vector<8x256xf32>
    %123 = arith.addf %122, %121 : vector<8x256xf32>
    %124 = arith.divf %122, %123 : vector<8x256xf32>
    %125 = math.tanh %116 : vector<8x256xf32>
    %126 = arith.mulf %124, %125 : vector<8x256xf32>
    %c3_i32 = arith.constant 3 : i32
    %127 = arith.index_cast %c3_i32 : i32 to index
    %c0_47 = arith.constant 0 : index
    %c0_48 = arith.constant 0 : index
    %128 = vector.load %arg7[%127, %c0_47, %c0_48] : memref<8x8x1024xf32, #tpu.memory_space<vmem>>, vector<1x8x1024xf32>
    %129 = vector.shape_cast %128 : vector<1x8x1024xf32> to vector<8x1024xf32>
    %130 = vector.extract_strided_slice %129 {offsets = [0, 0], sizes = [8, 256], strides = [1, 1]} : vector<8x1024xf32> to vector<8x256xf32>
    %cst_49 = arith.constant dense<0.000000e+00> : vector<8x256xf32>
    %131 = tpu.matmul %126, %10, %cst_49 {dimension_numbers = #tpu.dot_dimension_numbers<[1], [0], [0], [1], [0, 0, 1, 1], [], []>} : vector<8x256xf32>, vector<256x256xf32>, vector<8x256xf32> -> vector<8x256xf32>
    %132 = arith.addf %130, %131 : vector<8x256xf32>
    %133 = arith.negf %132 : vector<8x256xf32>
    %134 = math.exp %133 : vector<8x256xf32>
    %cst_50 = arith.constant 1.000000e+00 : f32
    %135 = vector.broadcast %cst_50 : f32 to vector<8x256xf32>
    %136 = arith.addf %135, %134 : vector<8x256xf32>
    %137 = arith.divf %135, %136 : vector<8x256xf32>
    %138 = vector.extract_strided_slice %129 {offsets = [0, 256], sizes = [8, 256], strides = [1, 1]} : vector<8x1024xf32> to vector<8x256xf32>
    %cst_51 = arith.constant dense<0.000000e+00> : vector<8x256xf32>
    %139 = tpu.matmul %126, %12, %cst_51 {dimension_numbers = #tpu.dot_dimension_numbers<[1], [0], [0], [1], [0, 0, 1, 1], [], []>} : vector<8x256xf32>, vector<256x256xf32>, vector<8x256xf32> -> vector<8x256xf32>
    %140 = arith.addf %138, %139 : vector<8x256xf32>
    %141 = arith.negf %140 : vector<8x256xf32>
    %142 = math.exp %141 : vector<8x256xf32>
    %cst_52 = arith.constant 1.000000e+00 : f32
    %143 = vector.broadcast %cst_52 : f32 to vector<8x256xf32>
    %144 = arith.addf %143, %142 : vector<8x256xf32>
    %145 = arith.divf %143, %144 : vector<8x256xf32>
    %146 = vector.extract_strided_slice %129 {offsets = [0, 512], sizes = [8, 256], strides = [1, 1]} : vector<8x1024xf32> to vector<8x256xf32>
    %cst_53 = arith.constant dense<0.000000e+00> : vector<8x256xf32>
    %147 = tpu.matmul %126, %14, %cst_53 {dimension_numbers = #tpu.dot_dimension_numbers<[1], [0], [0], [1], [0, 0, 1, 1], [], []>} : vector<8x256xf32>, vector<256x256xf32>, vector<8x256xf32> -> vector<8x256xf32>
    %148 = arith.addf %146, %147 : vector<8x256xf32>
    %149 = math.tanh %148 : vector<8x256xf32>
    %150 = arith.mulf %145, %116 : vector<8x256xf32>
    %151 = arith.mulf %137, %149 : vector<8x256xf32>
    %152 = arith.addf %150, %151 : vector<8x256xf32>
    %153 = vector.extract_strided_slice %129 {offsets = [0, 768], sizes = [8, 256], strides = [1, 1]} : vector<8x1024xf32> to vector<8x256xf32>
    %cst_54 = arith.constant dense<0.000000e+00> : vector<8x256xf32>
    %154 = tpu.matmul %126, %16, %cst_54 {dimension_numbers = #tpu.dot_dimension_numbers<[1], [0], [0], [1], [0, 0, 1, 1], [], []>} : vector<8x256xf32>, vector<256x256xf32>, vector<8x256xf32> -> vector<8x256xf32>
    %155 = arith.addf %153, %154 : vector<8x256xf32>
    %156 = arith.negf %155 : vector<8x256xf32>
    %157 = math.exp %156 : vector<8x256xf32>
    %cst_55 = arith.constant 1.000000e+00 : f32
    %158 = vector.broadcast %cst_55 : f32 to vector<8x256xf32>
    %159 = arith.addf %158, %157 : vector<8x256xf32>
    %160 = arith.divf %158, %159 : vector<8x256xf32>
    %161 = math.tanh %152 : vector<8x256xf32>
    %162 = arith.mulf %160, %161 : vector<8x256xf32>
    %c4_i32 = arith.constant 4 : i32
    %163 = arith.index_cast %c4_i32 : i32 to index
    %c0_56 = arith.constant 0 : index
    %c0_57 = arith.constant 0 : index
    %164 = vector.load %arg7[%163, %c0_56, %c0_57] : memref<8x8x1024xf32, #tpu.memory_space<vmem>>, vector<1x8x1024xf32>
    %165 = vector.shape_cast %164 : vector<1x8x1024xf32> to vector<8x1024xf32>
    %166 = vector.extract_strided_slice %165 {offsets = [0, 0], sizes = [8, 256], strides = [1, 1]} : vector<8x1024xf32> to vector<8x256xf32>
    %cst_58 = arith.constant dense<0.000000e+00> : vector<8x256xf32>
    %167 = tpu.matmul %162, %10, %cst_58 {dimension_numbers = #tpu.dot_dimension_numbers<[1], [0], [0], [1], [0, 0, 1, 1], [], []>} : vector<8x256xf32>, vector<256x256xf32>, vector<8x256xf32> -> vector<8x256xf32>
    %168 = arith.addf %166, %167 : vector<8x256xf32>
    %169 = arith.negf %168 : vector<8x256xf32>
    %170 = math.exp %169 : vector<8x256xf32>
    %cst_59 = arith.constant 1.000000e+00 : f32
    %171 = vector.broadcast %cst_59 : f32 to vector<8x256xf32>
    %172 = arith.addf %171, %170 : vector<8x256xf32>
    %173 = arith.divf %171, %172 : vector<8x256xf32>
    %174 = vector.extract_strided_slice %165 {offsets = [0, 256], sizes = [8, 256], strides = [1, 1]} : vector<8x1024xf32> to vector<8x256xf32>
    %cst_60 = arith.constant dense<0.000000e+00> : vector<8x256xf32>
    %175 = tpu.matmul %162, %12, %cst_60 {dimension_numbers = #tpu.dot_dimension_numbers<[1], [0], [0], [1], [0, 0, 1, 1], [], []>} : vector<8x256xf32>, vector<256x256xf32>, vector<8x256xf32> -> vector<8x256xf32>
    %176 = arith.addf %174, %175 : vector<8x256xf32>
    %177 = arith.negf %176 : vector<8x256xf32>
    %178 = math.exp %177 : vector<8x256xf32>
    %cst_61 = arith.constant 1.000000e+00 : f32
    %179 = vector.broadcast %cst_61 : f32 to vector<8x256xf32>
    %180 = arith.addf %179, %178 : vector<8x256xf32>
    %181 = arith.divf %179, %180 : vector<8x256xf32>
    %182 = vector.extract_strided_slice %165 {offsets = [0, 512], sizes = [8, 256], strides = [1, 1]} : vector<8x1024xf32> to vector<8x256xf32>
    %cst_62 = arith.constant dense<0.000000e+00> : vector<8x256xf32>
    %183 = tpu.matmul %162, %14, %cst_62 {dimension_numbers = #tpu.dot_dimension_numbers<[1], [0], [0], [1], [0, 0, 1, 1], [], []>} : vector<8x256xf32>, vector<256x256xf32>, vector<8x256xf32> -> vector<8x256xf32>
    %184 = arith.addf %182, %183 : vector<8x256xf32>
    %185 = math.tanh %184 : vector<8x256xf32>
    %186 = arith.mulf %181, %152 : vector<8x256xf32>
    %187 = arith.mulf %173, %185 : vector<8x256xf32>
    %188 = arith.addf %186, %187 : vector<8x256xf32>
    %189 = vector.extract_strided_slice %165 {offsets = [0, 768], sizes = [8, 256], strides = [1, 1]} : vector<8x1024xf32> to vector<8x256xf32>
    %cst_63 = arith.constant dense<0.000000e+00> : vector<8x256xf32>
    %190 = tpu.matmul %162, %16, %cst_63 {dimension_numbers = #tpu.dot_dimension_numbers<[1], [0], [0], [1], [0, 0, 1, 1], [], []>} : vector<8x256xf32>, vector<256x256xf32>, vector<8x256xf32> -> vector<8x256xf32>
    %191 = arith.addf %189, %190 : vector<8x256xf32>
    %192 = arith.negf %191 : vector<8x256xf32>
    %193 = math.exp %192 : vector<8x256xf32>
    %cst_64 = arith.constant 1.000000e+00 : f32
    %194 = vector.broadcast %cst_64 : f32 to vector<8x256xf32>
    %195 = arith.addf %194, %193 : vector<8x256xf32>
    %196 = arith.divf %194, %195 : vector<8x256xf32>
    %197 = math.tanh %188 : vector<8x256xf32>
    %198 = arith.mulf %196, %197 : vector<8x256xf32>
    %c5_i32 = arith.constant 5 : i32
    %199 = arith.index_cast %c5_i32 : i32 to index
    %c0_65 = arith.constant 0 : index
    %c0_66 = arith.constant 0 : index
    %200 = vector.load %arg7[%199, %c0_65, %c0_66] : memref<8x8x1024xf32, #tpu.memory_space<vmem>>, vector<1x8x1024xf32>
    %201 = vector.shape_cast %200 : vector<1x8x1024xf32> to vector<8x1024xf32>
    %202 = vector.extract_strided_slice %201 {offsets = [0, 0], sizes = [8, 256], strides = [1, 1]} : vector<8x1024xf32> to vector<8x256xf32>
    %cst_67 = arith.constant dense<0.000000e+00> : vector<8x256xf32>
    %203 = tpu.matmul %198, %10, %cst_67 {dimension_numbers = #tpu.dot_dimension_numbers<[1], [0], [0], [1], [0, 0, 1, 1], [], []>} : vector<8x256xf32>, vector<256x256xf32>, vector<8x256xf32> -> vector<8x256xf32>
    %204 = arith.addf %202, %203 : vector<8x256xf32>
    %205 = arith.negf %204 : vector<8x256xf32>
    %206 = math.exp %205 : vector<8x256xf32>
    %cst_68 = arith.constant 1.000000e+00 : f32
    %207 = vector.broadcast %cst_68 : f32 to vector<8x256xf32>
    %208 = arith.addf %207, %206 : vector<8x256xf32>
    %209 = arith.divf %207, %208 : vector<8x256xf32>
    %210 = vector.extract_strided_slice %201 {offsets = [0, 256], sizes = [8, 256], strides = [1, 1]} : vector<8x1024xf32> to vector<8x256xf32>
    %cst_69 = arith.constant dense<0.000000e+00> : vector<8x256xf32>
    %211 = tpu.matmul %198, %12, %cst_69 {dimension_numbers = #tpu.dot_dimension_numbers<[1], [0], [0], [1], [0, 0, 1, 1], [], []>} : vector<8x256xf32>, vector<256x256xf32>, vector<8x256xf32> -> vector<8x256xf32>
    %212 = arith.addf %210, %211 : vector<8x256xf32>
    %213 = arith.negf %212 : vector<8x256xf32>
    %214 = math.exp %213 : vector<8x256xf32>
    %cst_70 = arith.constant 1.000000e+00 : f32
    %215 = vector.broadcast %cst_70 : f32 to vector<8x256xf32>
    %216 = arith.addf %215, %214 : vector<8x256xf32>
    %217 = arith.divf %215, %216 : vector<8x256xf32>
    %218 = vector.extract_strided_slice %201 {offsets = [0, 512], sizes = [8, 256], strides = [1, 1]} : vector<8x1024xf32> to vector<8x256xf32>
    %cst_71 = arith.constant dense<0.000000e+00> : vector<8x256xf32>
    %219 = tpu.matmul %198, %14, %cst_71 {dimension_numbers = #tpu.dot_dimension_numbers<[1], [0], [0], [1], [0, 0, 1, 1], [], []>} : vector<8x256xf32>, vector<256x256xf32>, vector<8x256xf32> -> vector<8x256xf32>
    %220 = arith.addf %218, %219 : vector<8x256xf32>
    %221 = math.tanh %220 : vector<8x256xf32>
    %222 = arith.mulf %217, %188 : vector<8x256xf32>
    %223 = arith.mulf %209, %221 : vector<8x256xf32>
    %224 = arith.addf %222, %223 : vector<8x256xf32>
    %225 = vector.extract_strided_slice %201 {offsets = [0, 768], sizes = [8, 256], strides = [1, 1]} : vector<8x1024xf32> to vector<8x256xf32>
    %cst_72 = arith.constant dense<0.000000e+00> : vector<8x256xf32>
    %226 = tpu.matmul %198, %16, %cst_72 {dimension_numbers = #tpu.dot_dimension_numbers<[1], [0], [0], [1], [0, 0, 1, 1], [], []>} : vector<8x256xf32>, vector<256x256xf32>, vector<8x256xf32> -> vector<8x256xf32>
    %227 = arith.addf %225, %226 : vector<8x256xf32>
    %228 = arith.negf %227 : vector<8x256xf32>
    %229 = math.exp %228 : vector<8x256xf32>
    %cst_73 = arith.constant 1.000000e+00 : f32
    %230 = vector.broadcast %cst_73 : f32 to vector<8x256xf32>
    %231 = arith.addf %230, %229 : vector<8x256xf32>
    %232 = arith.divf %230, %231 : vector<8x256xf32>
    %233 = math.tanh %224 : vector<8x256xf32>
    %234 = arith.mulf %232, %233 : vector<8x256xf32>
    %c6_i32 = arith.constant 6 : i32
    %235 = arith.index_cast %c6_i32 : i32 to index
    %c0_74 = arith.constant 0 : index
    %c0_75 = arith.constant 0 : index
    %236 = vector.load %arg7[%235, %c0_74, %c0_75] : memref<8x8x1024xf32, #tpu.memory_space<vmem>>, vector<1x8x1024xf32>
    %237 = vector.shape_cast %236 : vector<1x8x1024xf32> to vector<8x1024xf32>
    %238 = vector.extract_strided_slice %237 {offsets = [0, 0], sizes = [8, 256], strides = [1, 1]} : vector<8x1024xf32> to vector<8x256xf32>
    %cst_76 = arith.constant dense<0.000000e+00> : vector<8x256xf32>
    %239 = tpu.matmul %234, %10, %cst_76 {dimension_numbers = #tpu.dot_dimension_numbers<[1], [0], [0], [1], [0, 0, 1, 1], [], []>} : vector<8x256xf32>, vector<256x256xf32>, vector<8x256xf32> -> vector<8x256xf32>
    %240 = arith.addf %238, %239 : vector<8x256xf32>
    %241 = arith.negf %240 : vector<8x256xf32>
    %242 = math.exp %241 : vector<8x256xf32>
    %cst_77 = arith.constant 1.000000e+00 : f32
    %243 = vector.broadcast %cst_77 : f32 to vector<8x256xf32>
    %244 = arith.addf %243, %242 : vector<8x256xf32>
    %245 = arith.divf %243, %244 : vector<8x256xf32>
    %246 = vector.extract_strided_slice %237 {offsets = [0, 256], sizes = [8, 256], strides = [1, 1]} : vector<8x1024xf32> to vector<8x256xf32>
    %cst_78 = arith.constant dense<0.000000e+00> : vector<8x256xf32>
    %247 = tpu.matmul %234, %12, %cst_78 {dimension_numbers = #tpu.dot_dimension_numbers<[1], [0], [0], [1], [0, 0, 1, 1], [], []>} : vector<8x256xf32>, vector<256x256xf32>, vector<8x256xf32> -> vector<8x256xf32>
    %248 = arith.addf %246, %247 : vector<8x256xf32>
    %249 = arith.negf %248 : vector<8x256xf32>
    %250 = math.exp %249 : vector<8x256xf32>
    %cst_79 = arith.constant 1.000000e+00 : f32
    %251 = vector.broadcast %cst_79 : f32 to vector<8x256xf32>
    %252 = arith.addf %251, %250 : vector<8x256xf32>
    %253 = arith.divf %251, %252 : vector<8x256xf32>
    %254 = vector.extract_strided_slice %237 {offsets = [0, 512], sizes = [8, 256], strides = [1, 1]} : vector<8x1024xf32> to vector<8x256xf32>
    %cst_80 = arith.constant dense<0.000000e+00> : vector<8x256xf32>
    %255 = tpu.matmul %234, %14, %cst_80 {dimension_numbers = #tpu.dot_dimension_numbers<[1], [0], [0], [1], [0, 0, 1, 1], [], []>} : vector<8x256xf32>, vector<256x256xf32>, vector<8x256xf32> -> vector<8x256xf32>
    %256 = arith.addf %254, %255 : vector<8x256xf32>
    %257 = math.tanh %256 : vector<8x256xf32>
    %258 = arith.mulf %253, %224 : vector<8x256xf32>
    %259 = arith.mulf %245, %257 : vector<8x256xf32>
    %260 = arith.addf %258, %259 : vector<8x256xf32>
    %261 = vector.extract_strided_slice %237 {offsets = [0, 768], sizes = [8, 256], strides = [1, 1]} : vector<8x1024xf32> to vector<8x256xf32>
    %cst_81 = arith.constant dense<0.000000e+00> : vector<8x256xf32>
    %262 = tpu.matmul %234, %16, %cst_81 {dimension_numbers = #tpu.dot_dimension_numbers<[1], [0], [0], [1], [0, 0, 1, 1], [], []>} : vector<8x256xf32>, vector<256x256xf32>, vector<8x256xf32> -> vector<8x256xf32>
    %263 = arith.addf %261, %262 : vector<8x256xf32>
    %264 = arith.negf %263 : vector<8x256xf32>
    %265 = math.exp %264 : vector<8x256xf32>
    %cst_82 = arith.constant 1.000000e+00 : f32
    %266 = vector.broadcast %cst_82 : f32 to vector<8x256xf32>
    %267 = arith.addf %266, %265 : vector<8x256xf32>
    %268 = arith.divf %266, %267 : vector<8x256xf32>
    %269 = math.tanh %260 : vector<8x256xf32>
    %270 = arith.mulf %268, %269 : vector<8x256xf32>
    %c7_i32 = arith.constant 7 : i32
    %271 = arith.index_cast %c7_i32 : i32 to index
    %c0_83 = arith.constant 0 : index
    %c0_84 = arith.constant 0 : index
    %272 = vector.load %arg7[%271, %c0_83, %c0_84] : memref<8x8x1024xf32, #tpu.memory_space<vmem>>, vector<1x8x1024xf32>
    %273 = vector.shape_cast %272 : vector<1x8x1024xf32> to vector<8x1024xf32>
    %274 = vector.extract_strided_slice %273 {offsets = [0, 0], sizes = [8, 256], strides = [1, 1]} : vector<8x1024xf32> to vector<8x256xf32>
    %cst_85 = arith.constant dense<0.000000e+00> : vector<8x256xf32>
    %275 = tpu.matmul %270, %10, %cst_85 {dimension_numbers = #tpu.dot_dimension_numbers<[1], [0], [0], [1], [0, 0, 1, 1], [], []>} : vector<8x256xf32>, vector<256x256xf32>, vector<8x256xf32> -> vector<8x256xf32>
    %276 = arith.addf %274, %275 : vector<8x256xf32>
    %277 = arith.negf %276 : vector<8x256xf32>
    %278 = math.exp %277 : vector<8x256xf32>
    %cst_86 = arith.constant 1.000000e+00 : f32
    %279 = vector.broadcast %cst_86 : f32 to vector<8x256xf32>
    %280 = arith.addf %279, %278 : vector<8x256xf32>
    %281 = arith.divf %279, %280 : vector<8x256xf32>
    %282 = vector.extract_strided_slice %273 {offsets = [0, 256], sizes = [8, 256], strides = [1, 1]} : vector<8x1024xf32> to vector<8x256xf32>
    %cst_87 = arith.constant dense<0.000000e+00> : vector<8x256xf32>
    %283 = tpu.matmul %270, %12, %cst_87 {dimension_numbers = #tpu.dot_dimension_numbers<[1], [0], [0], [1], [0, 0, 1, 1], [], []>} : vector<8x256xf32>, vector<256x256xf32>, vector<8x256xf32> -> vector<8x256xf32>
    %284 = arith.addf %282, %283 : vector<8x256xf32>
    %285 = arith.negf %284 : vector<8x256xf32>
    %286 = math.exp %285 : vector<8x256xf32>
    %cst_88 = arith.constant 1.000000e+00 : f32
    %287 = vector.broadcast %cst_88 : f32 to vector<8x256xf32>
    %288 = arith.addf %287, %286 : vector<8x256xf32>
    %289 = arith.divf %287, %288 : vector<8x256xf32>
    %290 = vector.extract_strided_slice %273 {offsets = [0, 512], sizes = [8, 256], strides = [1, 1]} : vector<8x1024xf32> to vector<8x256xf32>
    %cst_89 = arith.constant dense<0.000000e+00> : vector<8x256xf32>
    %291 = tpu.matmul %270, %14, %cst_89 {dimension_numbers = #tpu.dot_dimension_numbers<[1], [0], [0], [1], [0, 0, 1, 1], [], []>} : vector<8x256xf32>, vector<256x256xf32>, vector<8x256xf32> -> vector<8x256xf32>
    %292 = arith.addf %290, %291 : vector<8x256xf32>
    %293 = math.tanh %292 : vector<8x256xf32>
    %294 = arith.mulf %289, %260 : vector<8x256xf32>
    %295 = arith.mulf %281, %293 : vector<8x256xf32>
    %296 = arith.addf %294, %295 : vector<8x256xf32>
    %297 = vector.extract_strided_slice %273 {offsets = [0, 768], sizes = [8, 256], strides = [1, 1]} : vector<8x1024xf32> to vector<8x256xf32>
    %cst_90 = arith.constant dense<0.000000e+00> : vector<8x256xf32>
    %298 = tpu.matmul %270, %16, %cst_90 {dimension_numbers = #tpu.dot_dimension_numbers<[1], [0], [0], [1], [0, 0, 1, 1], [], []>} : vector<8x256xf32>, vector<256x256xf32>, vector<8x256xf32> -> vector<8x256xf32>
    %299 = arith.addf %297, %298 : vector<8x256xf32>
    %300 = arith.negf %299 : vector<8x256xf32>
    %301 = math.exp %300 : vector<8x256xf32>
    %cst_91 = arith.constant 1.000000e+00 : f32
    %302 = vector.broadcast %cst_91 : f32 to vector<8x256xf32>
    %303 = arith.addf %302, %301 : vector<8x256xf32>
    %304 = arith.divf %302, %303 : vector<8x256xf32>
    %305 = math.tanh %296 : vector<8x256xf32>
    %306 = arith.mulf %304, %305 : vector<8x256xf32>
    %c8_i32 = arith.constant 8 : i32
    %c0_92 = arith.constant 0 : index
    %c0_93 = arith.constant 0 : index
    %307 = vector.load %arg4[%c0_92, %c0_93] : memref<1x256xf32, #tpu.memory_space<vmem>>, vector<1x256xf32>
    %308 = vector.broadcast %307 : vector<1x256xf32> to vector<8x256xf32>
    %309 = arith.mulf %306, %308 : vector<8x256xf32>
    %cst_94 = arith.constant dense<0.000000e+00> : vector<8xf32>
    %310 = vector.multi_reduction <add>, %309, %cst_94 [1] : vector<8x256xf32> to vector<8xf32>
    %311 = vector.shape_cast %310 : vector<8xf32> to vector<8x1xf32>
    %c0_95 = arith.constant 0 : index
    %c0_96 = arith.constant 0 : index
    %312 = vector.load %arg5[%c0_95, %c0_96] : memref<1x1xf32, #tpu.memory_space<vmem>>, vector<1x1xf32>
    %313 = vector.broadcast %312 : vector<1x1xf32> to vector<8x1xf32>
    %314 = arith.addf %311, %313 : vector<8x1xf32>
    %c0_97 = arith.constant 0 : index
    %c0_98 = arith.constant 0 : index
    %315 = vector.load %arg6[%c0_97, %c0_98] : memref<8x1xf32, #tpu.memory_space<vmem>>, vector<8x1xf32>
    tpu.vector_store %arg6[%c0_97, %c0_98], %314 {strides = array<i32>} : memref<8x1xf32, #tpu.memory_space<vmem>>, vector<8x1xf32>,
    return
  }
}

</mosaic_0001>

<bundles_post_ra>
// kernel: tpu_custom_call.1
= control target key start
LH: loop header
LB: loop body
LE: loop exit
PB: predicated region body
PF: predicated region fallthrough
CT: control target
= control target key end

     0   :  { %s8149_s0 = inlined_call_operand.hbm [shape: f32[8,8,29], index: 0, kind: input, shape index: {}]   ;;  %s8150_s1 = inlined_call_operand.hbm [shape: f32[29,1024], index: 1, kind: input, shape index: {}]   ;;  %s8151_s2 = inlined_call_operand.hbm [shape: f32[4,256,256], index: 2, kind: input, shape index: {}]   ;;  %s8152_s3 = inlined_call_operand.vmem [shape: f32[1,1024], index: 3, kind: input, shape index: {}]   ;;  %s8153_s4 = inlined_call_operand.vmem [shape: f32[1,256], index: 4, kind: input, shape index: {}]   ;;  %s8154_s5 = inlined_call_operand.<no memory space> [shape: f32[1,1], index: 5, kind: input, shape index: {}]   ;;  %s8155_s6 = inlined_call_operand.vmem [shape: f32[8,1], index: 6, kind: output, shape index: {}]  }
   0x1   :  { %v11_v0 = vstv %s8154_s5 }
   0x2   :  { %12 = vst [vmem:[#allocation3] sm:$0x1] %v11_v0 }
   0x3   :  { %13 = vsyncpa [#allocation5], 0 }
   0x4   :  { %14 = vsyncpa [#allocation7], 0  ;;  %s6439_s23 = smov [#allocation6]   ;;  %s6369_s27 = scalar_lea.hbm %s8150_s1, 4096 }
   0x5   :  { %s32_s24 = sshll.u32 %s6439_s23, 4  ;;  %p6370_p0 = scmp.ne.s32.totalorder %s8150_s1, %s6369_s27  ;;  %s33_s24 = int_to_ptr.vmem [resolvable:$true] %s32_s24 }
   0x6   :  { %p6373_p1 = scmp.lt.u32.totalorder %s6369_s27, %s8150_s1 }
   0x8   :  { %p6375_p2 = pnand %p6373_p1, %p6370_p0 }
   0xa   :  { %6378 = shalt.err (!%p6375_p2)
}
   0xb   :  { %s6379_s5 = scalar_lea.vmem %s33_s24, 4096  ;;  %p6384_p4 = scmp.lt.s32.totalorder %s33_s24, %s33_s24 }
   0xc   :  { %p6380_p3 = scmp.ne.s32.totalorder %s33_s24, %s6379_s5  ;;  %p6385_p5 = scmp.lt.s32.totalorder %s6379_s5, %s6379_s5 }
   0xe   :  { %p6386_p6 = por %p6385_p5, %p6384_p4 }
  0x10   :  { %p6387_p7 = pnand %p6386_p6, %p6380_p3 }
  0x12   :  { %6390 = shalt.err (!%p6387_p7)
}
  0x13   :  { %s6440_s8 = smov 1024   ;;  %s6441_s9 = smov 64  }
  0x14   :  { %38 = dma.hbm_to_vmem [thread:$0]  %s8150_s1, 4096, %s33_s24, [#allocation7], %s6440_s8, %s6440_s8, %s6441_s9  }
  0x15   :  { %s6442_s12 = smov [#allocation4]   ;;  %s6391_s16 = scalar_lea.hbm %s8149_s0, 1024 }
  0x16   :  { %s20_s13 = sshll.u32 %s6442_s12, 4  ;;  %p6392_p8 = scmp.ne.s32.totalorder %s8149_s0, %s6391_s16  ;;  %s21_s13 = int_to_ptr.vmem [resolvable:$true] %s20_s13 }
  0x17   :  { %p6395_p9 = scmp.lt.u32.totalorder %s6391_s16, %s8149_s0 }
  0x19   :  { %p6397_p10 = pnand %p6395_p9, %p6392_p8 }
  0x1b   :  { %6400 = shalt.err (!%p6397_p10)
}
  0x1c   :  { %s6401_s21 = scalar_lea.vmem %s21_s13, 1024  ;;  %p6406_p12 = scmp.lt.s32.totalorder %s21_s13, %s21_s13 }
  0x1d   :  { %p6402_p11 = scmp.ne.s32.totalorder %s21_s13, %s6401_s21  ;;  %p6407_p13 = scmp.lt.s32.totalorder %s6401_s21, %s6401_s21 }
  0x1f   :  { %p6408_p0 = por %p6407_p13, %p6406_p12 }
  0x21   :  { %p6409_p1 = pnand %p6408_p0, %p6402_p11 }
  0x23   :  { %6412 = shalt.err (!%p6409_p1)
}
  0x24   :  { %s6443_s1 = smov 128   ;;  %s6444_s22 = smov 8  }
  0x25   :  { %26 = dma.hbm_to_vmem [thread:$0]  %s8149_s0, 1024, %s21_s13, [#allocation5], %s6443_s1, %s6443_s1, %s6444_s22  }
  0x26   :  { %s6445_s25 = smov [#allocation8]   ;;  %s6413_s29 = scalar_lea.hbm %s8151_s2, 32768 }
  0x27   :  { %s44_s26 = sshll.u32 %s6445_s25, 4  ;;  %p6414_p2 = scmp.ne.s32.totalorder %s8151_s2, %s6413_s29  ;;  %s45_s26 = int_to_ptr.vmem [resolvable:$true] %s44_s26 }
  0x28   :  { %p6417_p3 = scmp.lt.u32.totalorder %s6413_s29, %s8151_s2 }
  0x2a   :  { %p6419_p4 = pnand %p6417_p3, %p6414_p2 }
  0x2c   :  { %6422 = shalt.err (!%p6419_p4)
}
  0x2d   :  { %s6423_s9 = scalar_lea.vmem %s45_s26, 32768  ;;  %p6428_p6 = scmp.lt.s32.totalorder %s45_s26, %s45_s26 }
  0x2e   :  { %p6424_p5 = scmp.ne.s32.totalorder %s45_s26, %s6423_s9  ;;  %p6429_p7 = scmp.lt.s32.totalorder %s6423_s9, %s6423_s9 }
  0x30   :  { %p6430_p8 = por %p6429_p7, %p6428_p6 }
  0x32   :  { %p6431_p9 = pnand %p6430_p8, %p6424_p5 }
  0x34   :  { %6434 = shalt.err (!%p6431_p9)
}
  0x35   :  { %s6446_s0 = smov 256   ;;  %s6447_s10 = smov 16  }
  0x36   :  { %50 = dma.hbm_to_vmem [thread:$0]  %s8151_s2, 32768, %s45_s26, [#allocation7], %s6446_s0, %s6446_s0, %s6447_s10  }
  0x37   :  { %6435 = dma.done.wait [#allocation5], 1024  }
  0x38   :  { %6436 = vsyncadd [#allocation5], 4294966272 }
  0x39   :  { %6437 = dma.done.wait [#allocation7], 36864  }
  0x3a   :  { %6438 = vsyncadd [#allocation7], 4294930432  ;;  %v8156_v1 = vmov 0.0   ;;  %vm173_vm0 = vcmask 1044480   ;;  %vm6449_vm1 = vmmov 1   ;;  %v75_v3 = vld [vmem:[#allocation6 + $0x8] sm:$0xff] }
  0x3b   :  { %262 = vmatprep.mubr.f32.mxu0 %v8156_v1  ;;  %375 = vmatprep.mubr.f32.mxu1 %v8156_v1  ;;  %vm6526_vm2 = vmpackc.low %vm173_vm0, %vm6449_vm1  ;;  %v83_v4 = vld [vmem:[#allocation6 + $0x48] sm:$0xff]  ;;  %v77_v5 = vld [vmem:[#allocation6 + $0x18] sm:$0xff]  ;;  %vm148_vm3 = vcmask 236544   ;;  %vm3789_vm4 = vcmask 7168  }
  0x3c   :  { %v3886_v6 = vpack.c.bf16 %v83_v4, %v75_v3  ;;  %v85_v7 = vld [vmem:[#allocation6 + $0x58] sm:$0xff]  ;;  %v74_v8 = vld [vmem:[#allocation6] sm:$0xff]  ;;  %v76_v12 = vld [vmem:[#allocation6 + $0x10] sm:$0xff] }
  0x3d   :  { %v82_v9 = vld [vmem:[#allocation6 + $0x40] sm:$0xff]  ;;  %v3896_v10 = vpack.c.bf16 %v85_v7, %v77_v5  ;;  %v84_v13 = vld [vmem:[#allocation6 + $0x50] sm:$0xff]  ;;  %v91_v14 = vld [vmem:[#allocation6 + $0x88] sm:$0xff] }
  0x3e   :  { %v3888_v11 = vpack.c.bf16 %v82_v9, %v74_v8  ;;  %3887 = vmatprep.subr.bf16.mxu0 %v3886_v6  ;;  %v3898_v15 = vpack.c.bf16 %v84_v13, %v76_v12  ;;  %v99_v16 = vld [vmem:[#allocation6 + $0xc8] sm:$0x1f]  ;;  %v93_v17 = vld [vmem:[#allocation6 + $0x98] sm:$0xff]  ;;  %v90_v21 = vld [vmem:[#allocation6 + $0x80] sm:$0xff] }
  0x3f   :  { %v101_v18 = vld [vmem:[#allocation6 + $0xd8] sm:$0x1f]  ;;  %3897 = vmatprep.subr.bf16.mxu1 %v3896_v10  ;;  %v3890_v19 = vpack.c.bf16 %v99_v16, %v91_v14  ;;  %v98_v22 = vld [vmem:[#allocation6 + $0xc0] sm:$0x1f]  ;;  %v92_v23 = vld [vmem:[#allocation6 + $0x90] sm:$0xff] }
  0x40   :  { %3889 = vmatpush1.bf16.msra.mxu0 %v3888_v11  ;;  %v3900_v20 = vpack.c.bf16 %v101_v18, %v93_v17  ;;  %3899 = vmatpush1.bf16.msra.mxu1 %v3898_v15  ;;  %v3893_v24 = vpack.c.bf16 %v98_v22, %v90_v21  ;;  %v100_v25 = vld [vmem:[#allocation6 + $0xd0] sm:$0x1f]  ;;  %v79_v26 = vld [vmem:[#allocation6 + $0x28] sm:$0xff]  ;;  %v81_v29 = vld [vmem:[#allocation6 + $0x38] sm:$0xff] }
  0x41   :  { %3892 = vmatprep.subr.msk.bf16.mxu0 %vm6526_vm2, %v3890_v19  ;;  %v3903_v27 = vpack.c.bf16 %v100_v25, %v92_v23  ;;  %v87_v28 = vld [vmem:[#allocation6 + $0x68] sm:$0xff]  ;;  %v89_v30 = vld [vmem:[#allocation6 + $0x78] sm:$0xff]  ;;  %v78_v33 = vld [vmem:[#allocation6 + $0x20] sm:$0xff] }
  0x42   :  { %3902 = vmatprep.subr.msk.bf16.mxu1 %vm6526_vm2, %v3900_v20  ;;  %v3906_v31 = vpack.c.bf16 %v87_v28, %v79_v26  ;;  %v3916_v32 = vpack.c.bf16 %v89_v30, %v81_v29  ;;  %v86_v34 = vld [vmem:[#allocation6 + $0x60] sm:$0xff]  ;;  %v80_v35 = vld [vmem:[#allocation6 + $0x30] sm:$0xff]  ;;  %v95_v40 = vld [vmem:[#allocation6 + $0xa8] sm:$0xff] }
  0x43   :  { %v6536_v36 = vld [vmem:[#allocation4] sm:$0xff]  ;;  %v3908_v37 = vpack.c.bf16 %v86_v34, %v78_v33  ;;  %v88_v38 = vld [vmem:[#allocation6 + $0x70] sm:$0xff]  ;;  %v103_v41 = vld [vmem:[#allocation6 + $0xe8] sm:$0x1f] }
  0x44   :  { %3895 = vmatpush1.bf16.msk.msra.mxu0 %vm6526_vm2, %v3893_v24  ;;  %3905 = vmatpush1.bf16.msk.msra.mxu1 %vm6526_vm2, %v3903_v27  ;;  %v3918_v39 = vpack.c.bf16 %v88_v38, %v80_v35  ;;  %v97_v42 = vld [vmem:[#allocation6 + $0xb8] sm:$0xff]  ;;  %v3910_v44 = vpack.c.bf16 %v103_v41, %v95_v40  ;;  %v94_v46 = vld [vmem:[#allocation6 + $0xa0] sm:$0xff]  ;;  %v96_v48 = vld [vmem:[#allocation6 + $0xb0] sm:$0xff] }
  0x45   :  { %3907 = vmatprep.subr.bf16.mxu0 %v3906_v31  ;;  %3917 = vmatprep.subr.bf16.mxu1 %v3916_v32  ;;  %v105_v43 = vld [vmem:[#allocation6 + $0xf8] sm:$0x1f]  ;;  %v102_v47 = vld [vmem:[#allocation6 + $0xe0] sm:$0x1f]  ;;  %v6544_v49 = vld [vmem:[#allocation4 + $0x8] sm:$0xff] }
  0x46   :  { %v3920_v45 = vpack.c.bf16 %v105_v43, %v97_v42  ;;  %v104_v50 = vld [vmem:[#allocation6 + $0xf0] sm:$0x1f]  ;;  %v3913_v51 = vpack.c.bf16 %v102_v47, %v94_v46  ;;  %v715_v52 = vld [vmem:[#allocation8 + $0x8] sm:$0xff]  ;;  %v717_v53 = vld [vmem:[#allocation8 + $0x18] sm:$0xff] }
  0x47   :  { %3799 = vmatmul.mubr.msk.f32.vlgmr.msra.gmra.mrb[0].mxu0 %vm148_vm3, %v6536_v36  ;;  %3809 = vmatmul.mubr.msk.f32.vlgmr.msra.gmra.mrb[0].mxu1 %vm148_vm3, %v6536_v36  ;;  %v3923_v54 = vpack.c.bf16 %v104_v50, %v96_v48  ;;  %v6550_v55 = vpack.c.bf16 %v717_v53, %v715_v52  ;;  %v780_v56 = vld [vmem:[#allocation8 + $0x208] sm:$0xff]  ;;  %v782_v57 = vld [vmem:[#allocation8 + $0x218] sm:$0xff]  ;;  %v6561_v59 = vld [vmem:[#allocation4 + $0x10] sm:$0xff] }
  0x48   :  { %3909 = vmatpush1.bf16.msra.mxu0 %v3908_v37  ;;  %3919 = vmatpush1.bf16.msra.mxu1 %v3918_v39  ;;  %v6556_v58 = vpack.c.bf16 %v782_v57, %v780_v56  ;;  %v6575_v60 = vld [vmem:[#allocation4 + $0x18] sm:$0xff]  ;;  %v6583_v61 = vld [vmem:[#allocation4 + $0x20] sm:$0xff]  ;;  %v6591_v62 = vld [vmem:[#allocation4 + $0x28] sm:$0xff] }
  0x49   :  { %268 = vmatprep.mubr.f32.mxu0 %v8156_v1  ;;  %381 = vmatprep.mubr.f32.mxu1 %v8156_v1  ;;  %8444 = vst [vmem:[#allocation11_spill] sm:$0xff] %v6550_v55  ;;  %v6599_v63 = vld [vmem:[#allocation4 + $0x30] sm:$0xff]  ;;  %v6607_v0 = vld [vmem:[#allocation4 + $0x38] sm:$0xff]  ;;  %v714_v2 = vld [vmem:[#allocation8] sm:$0xff] }
  0x4a   :  { %3912 = vmatprep.subr.msk.bf16.mxu0 %vm6526_vm2, %v3910_v44  ;;  %3922 = vmatprep.subr.msk.bf16.mxu1 %vm6526_vm2, %v3920_v45  ;;  %8445 = vst [vmem:[#allocation12_spill] sm:$0xff] %v6556_v58  ;;  %v716_v3 = vld [vmem:[#allocation8 + $0x10] sm:$0xff]  ;;  %v779_v4 = vld [vmem:[#allocation8 + $0x200] sm:$0xff]  ;;  %v719_v6 = vld [vmem:[#allocation8 + $0x28] sm:$0xff] }
  0x4b   :  { %3800 = vmatmul.mubr.msk.f32.gmra.mrb[2].mxu0 %vm148_vm3, %v6544_v49  ;;  %3810 = vmatmul.mubr.msk.f32.gmra.mrb[2].mxu1 %vm148_vm3, %v6544_v49  ;;  %v781_v5 = vld [vmem:[#allocation8 + $0x210] sm:$0xff]  ;;  %v721_v7 = vld [vmem:[#allocation8 + $0x38] sm:$0xff]  ;;  %v784_v8 = vld [vmem:[#allocation8 + $0x228] sm:$0xff]  ;;  %v6615_v10 = vpack.c.bf16 %v716_v3, %v714_v2 }
  0x4c   :  { %274 = vmatprep.mubr.f32.mxu0 %v8156_v1  ;;  %387 = vmatprep.mubr.f32.mxu1 %v8156_v1  ;;  %v786_v9 = vld [vmem:[#allocation8 + $0x238] sm:$0xff]  ;;  %v6618_v11 = vpack.c.bf16 %v781_v5, %v779_v4  ;;  %v6620_v12 = vpack.c.bf16 %v721_v7, %v719_v6  ;;  %v718_v13 = vld [vmem:[#allocation8 + $0x20] sm:$0xff]  ;;  %v720_v14 = vld [vmem:[#allocation8 + $0x30] sm:$0xff] }
  0x4d   :  { %3915 = vmatpush1.bf16.msk.msra.mxu0 %vm6526_vm2, %v3913_v51  ;;  %3925 = vmatpush1.bf16.msk.msra.mxu1 %vm6526_vm2, %v3923_v54  ;;  %8446 = vst [vmem:[#allocation13_spill] sm:$0xff] %v6615_v10  ;;  %v783_v15 = vld [vmem:[#allocation8 + $0x220] sm:$0xff]  ;;  %v6622_v16 = vpack.c.bf16 %v786_v9, %v784_v8  ;;  %v785_v17 = vld [vmem:[#allocation8 + $0x230] sm:$0xff]  ;;  %v723_v18 = vld [vmem:[#allocation8 + $0x48] sm:$0xff]  ;;  %v6629_v22 = vpack.c.bf16 %v720_v14, %v718_v13 }
  0x4e   :  { %3927 = vmatprep.subr.bf16.mxu0 %v6550_v55  ;;  %3991 = vmatprep.subr.bf16.mxu1 %v6556_v58  ;;  %8447 = vst [vmem:[#allocation14_spill] sm:$0xff] %v6618_v11  ;;  %8448 = vst [vmem:[#allocation15_spill] sm:$0xff] %v6620_v12  ;;  %v725_v19 = vld [vmem:[#allocation8 + $0x58] sm:$0xff]  ;;  %v788_v20 = vld [vmem:[#allocation8 + $0x248] sm:$0xff]  ;;  %v6633_v23 = vpack.c.bf16 %v785_v17, %v783_v15 }
  0x4f   :  { %3801 = vmatmul.mubr.msk.f32.gmra.mrb[4].mxu0 %vm148_vm3, %v6561_v59  ;;  %3811 = vmatmul.mubr.msk.f32.gmra.mrb[4].mxu1 %vm148_vm3, %v6561_v59  ;;  %8449 = vst [vmem:[#allocation16_spill] sm:$0xff] %v6622_v16  ;;  %v790_v21 = vld [vmem:[#allocation8 + $0x258] sm:$0xff]  ;;  %8450 = vst [vmem:[#allocation17_spill] sm:$0xff] %v6629_v22  ;;  %v6635_v24 = vpack.c.bf16 %v725_v19, %v723_v18  ;;  %v722_v25 = vld [vmem:[#allocation8 + $0x40] sm:$0xff] }
  0x50   :  { %280 = vmatprep.mubr.f32.mxu0 %v8156_v1  ;;  %393 = vmatprep.mubr.f32.mxu1 %v8156_v1  ;;  %8451 = vst [vmem:[#allocation18_spill] sm:$0xff] %v6633_v23  ;;  %v724_v26 = vld [vmem:[#allocation8 + $0x50] sm:$0xff]  ;;  %v787_v27 = vld [vmem:[#allocation8 + $0x240] sm:$0xff]  ;;  %v6638_v28 = vpack.c.bf16 %v790_v21, %v788_v20  ;;  %v727_v30 = vld [vmem:[#allocation8 + $0x68] sm:$0xff] }
  0x51   :  { %8452 = vst [vmem:[#allocation19_spill] sm:$0xff] %v6635_v24  ;;  %v789_v29 = vld [vmem:[#allocation8 + $0x250] sm:$0xff]  ;;  %v729_v31 = vld [vmem:[#allocation8 + $0x78] sm:$0xff]  ;;  %v792_v32 = vld [vmem:[#allocation8 + $0x268] sm:$0xff]  ;;  %v6645_v34 = vpack.c.bf16 %v724_v26, %v722_v25 }
  0x52   :  { %8453 = vst [vmem:[#allocation20_spill] sm:$0xff] %v6638_v28  ;;  %v794_v33 = vld [vmem:[#allocation8 + $0x278] sm:$0xff]  ;;  %v6651_v35 = vpack.c.bf16 %v789_v29, %v787_v27  ;;  %v726_v37 = vld [vmem:[#allocation8 + $0x60] sm:$0xff]  ;;  %v728_v38 = vld [vmem:[#allocation8 + $0x70] sm:$0xff] }
  0x53   :  { %3802 = vmatmul.mubr.msk.f32.gmra.mrb[6].mxu0 %vm148_vm3, %v6575_v60  ;;  %3812 = vmatmul.mubr.msk.f32.gmra.mrb[6].mxu1 %vm148_vm3, %v6575_v60  ;;  %8454 = vst [vmem:[#allocation21_spill] sm:$0xff] %v6645_v34  ;;  %v791_v39 = vld [vmem:[#allocation8 + $0x260] sm:$0xff]  ;;  %v6656_v40 = vpack.c.bf16 %v794_v33, %v792_v32  ;;  %v793_v41 = vld [vmem:[#allocation8 + $0x270] sm:$0xff]  ;;  %v731_v42 = vld [vmem:[#allocation8 + $0x88] sm:$0xff]  ;;  %v6663_v46 = vpack.c.bf16 %v728_v38, %v726_v37 }
  0x54   :  { %286 = vmatprep.mubr.f32.mxu0 %v8156_v1  ;;  %399 = vmatprep.mubr.f32.mxu1 %v8156_v1  ;;  %8455 = vst [vmem:[#allocation22_spill] sm:$0xff] %v6651_v35  ;;  %v733_v43 = vld [vmem:[#allocation8 + $0x98] sm:$0xff]  ;;  %v796_v44 = vld [vmem:[#allocation8 + $0x288] sm:$0xff]  ;;  %v6669_v47 = vpack.c.bf16 %v793_v41, %v791_v39  ;;  %v732_v50 = vld [vmem:[#allocation8 + $0x90] sm:$0xff] }
  0x55   :  { %8457 = vst [vmem:[#allocation24_spill] sm:$0xff] %v6656_v40  ;;  %v798_v45 = vld [vmem:[#allocation8 + $0x298] sm:$0xff]  ;;  %8458 = vst [vmem:[#allocation25_spill] sm:$0xff] %v6663_v46  ;;  %v6671_v48 = vpack.c.bf16 %v733_v43, %v731_v42  ;;  %v795_v51 = vld [vmem:[#allocation8 + $0x280] sm:$0xff] }
  0x56   :  { %8459 = vst [vmem:[#allocation26_spill] sm:$0xff] %v6669_v47  ;;  %v6674_v52 = vpack.c.bf16 %v798_v45, %v796_v44  ;;  %v797_v53 = vld [vmem:[#allocation8 + $0x290] sm:$0xff]  ;;  %v735_v54 = vld [vmem:[#allocation8 + $0xa8] sm:$0xff]  ;;  %v737_v56 = vld [vmem:[#allocation8 + $0xb8] sm:$0xff] }
  0x57   :  { %3803 = vmatmul.mubr.msk.f32.gmra.mrb[8].mxu0 %vm148_vm3, %v6583_v61  ;;  %3813 = vmatmul.mubr.msk.f32.gmra.mrb[8].mxu1 %vm148_vm3, %v6583_v61  ;;  %8460 = vst [vmem:[#allocation27_spill] sm:$0xff] %v6671_v48  ;;  %v800_v57 = vld [vmem:[#allocation8 + $0x2a8] sm:$0xff]  ;;  %v6687_v3 = vpack.c.bf16 %v797_v53, %v795_v51  ;;  %v6689_v4 = vpack.c.bf16 %v737_v56, %v735_v54  ;;  %v734_v5 = vld [vmem:[#allocation8 + $0xa0] sm:$0xff]  ;;  %v736_v6 = vld [vmem:[#allocation8 + $0xb0] sm:$0xff] }
  0x58   :  { %292 = vmatprep.mubr.f32.mxu0 %v8156_v1  ;;  %405 = vmatprep.mubr.f32.mxu1 %v8156_v1  ;;  %8461 = vst [vmem:[#allocation28_spill] sm:$0xff] %v6674_v52  ;;  %v799_v7 = vld [vmem:[#allocation8 + $0x2a0] sm:$0xff]  ;;  %v801_v9 = vld [vmem:[#allocation8 + $0x2b0] sm:$0xff]  ;;  %v739_v13 = vld [vmem:[#allocation8 + $0xc8] sm:$0xff]  ;;  %v6699_v17 = vpack.c.bf16 %v736_v6, %v734_v5 }
  0x59   :  { %8463 = vst [vmem:[#allocation30_spill] sm:$0xff] %v6687_v3  ;;  %8464 = vst [vmem:[#allocation31_spill] sm:$0xff] %v6689_v4  ;;  %v741_v14 = vld [vmem:[#allocation8 + $0xd8] sm:$0xff]  ;;  %v6705_v18 = vpack.c.bf16 %v801_v9, %v799_v7  ;;  %v738_v20 = vld [vmem:[#allocation8 + $0xc0] sm:$0xff] }
  0x5a   :  { %v806_v15 = vld [vmem:[#allocation8 + $0x2d8] sm:$0xff]  ;;  %8466 = vst [vmem:[#allocation33_spill] sm:$0xff] %v6699_v17  ;;  %v6707_v19 = vpack.c.bf16 %v741_v14, %v739_v13  ;;  %v740_v21 = vld [vmem:[#allocation8 + $0xd0] sm:$0xff]  ;;  %v803_v25 = vld [vmem:[#allocation8 + $0x2c0] sm:$0xff] }
  0x5b   :  { %3804 = vmatmul.mubr.msk.f32.gmra.mrb[10].mxu0 %vm148_vm3, %v6591_v62  ;;  %3814 = vmatmul.mubr.msk.f32.gmra.mrb[10].mxu1 %vm148_vm3, %v6591_v62  ;;  %8467 = vst [vmem:[#allocation34_spill] sm:$0xff] %v6705_v18  ;;  %v805_v27 = vld [vmem:[#allocation8 + $0x2d0] sm:$0xff]  ;;  %v743_v29 = vld [vmem:[#allocation8 + $0xe8] sm:$0xff]  ;;  %v6717_v32 = vpack.c.bf16 %v740_v21, %v738_v20  ;;  %v742_v38 = vld [vmem:[#allocation8 + $0xe0] sm:$0xff] }
  0x5c   :  { %298 = vmatprep.mubr.f32.mxu0 %v8156_v1  ;;  %411 = vmatprep.mubr.f32.mxu1 %v8156_v1  ;;  %8468 = vst [vmem:[#allocation35_spill] sm:$0xff] %v6707_v19  ;;  %v6723_v33 = vpack.c.bf16 %v805_v27, %v803_v25  ;;  %v744_v39 = vld [vmem:[#allocation8 + $0xf0] sm:$0xff]  ;;  %v807_v41 = vld [vmem:[#allocation8 + $0x2e0] sm:$0xff]  ;;  %v747_v44 = vld [vmem:[#allocation8 + $0x108] sm:$0xff] }
  0x5d   :  { %8470 = vst [vmem:[#allocation37_spill] sm:$0xff] %v6717_v32  ;;  %v809_v43 = vld [vmem:[#allocation8 + $0x2f0] sm:$0xff]  ;;  %v749_v45 = vld [vmem:[#allocation8 + $0x118] sm:$0xff]  ;;  %v746_v54 = vld [vmem:[#allocation8 + $0x100] sm:$0xff] }
  0x5e   :  { %8471 = vst [vmem:[#allocation38_spill] sm:$0xff] %v6723_v33  ;;  %v6741_v51 = vpack.c.bf16 %v809_v43, %v807_v41  ;;  %v6743_v53 = vpack.c.bf16 %v749_v45, %v747_v44  ;;  %v748_v56 = vld [vmem:[#allocation8 + $0x110] sm:$0xff]  ;;  %v751_v6 = vld [vmem:[#allocation8 + $0x128] sm:$0xff]  ;;  %v753_v7 = vld [vmem:[#allocation8 + $0x138] sm:$0xff] }
  0x5f   :  { %3805 = vmatmul.mubr.msk.f32.gmra.mrb[12].mxu0 %vm148_vm3, %v6599_v63  ;;  %3815 = vmatmul.mubr.msk.f32.gmra.mrb[12].mxu1 %vm148_vm3, %v6599_v63  ;;  %v813_v5 = vld [vmem:[#allocation8 + $0x310] sm:$0xff]  ;;  %v818_v9 = vld [vmem:[#allocation8 + $0x338] sm:$0xff]  ;;  %v6753_v13 = vpack.c.bf16 %v748_v56, %v746_v54  ;;  %v815_v21 = vld [vmem:[#allocation8 + $0x320] sm:$0xff] }
  0x60   :  { %304 = vmatprep.mubr.f32.mxu0 %v8156_v1  ;;  %417 = vmatprep.mubr.f32.mxu1 %v8156_v1  ;;  %8475 = vst [vmem:[#allocation42_spill] sm:$0xff] %v6741_v51  ;;  %8476 = vst [vmem:[#allocation43_spill] sm:$0xff] %v6743_v53  ;;  %v752_v20 = vld [vmem:[#allocation8 + $0x130] sm:$0xff]  ;;  %v754_v41 = vld [vmem:[#allocation8 + $0x140] sm:$0xff] }
  0x61   :  { %8478 = vst [vmem:[#allocation45_spill] sm:$0xff] %v6753_v13  ;;  %v817_v27 = vld [vmem:[#allocation8 + $0x330] sm:$0xff]  ;;  %v819_v44 = vld [vmem:[#allocation8 + $0x340] sm:$0xff]  ;;  %v761_v54 = vld [vmem:[#allocation8 + $0x178] sm:$0xff] }
  0x62   :  { %v756_v43 = vld [vmem:[#allocation8 + $0x150] sm:$0xff]  ;;  %v824_v56 = vld [vmem:[#allocation8 + $0x368] sm:$0xff] }
  0x63   :  { %3806 = vmatmul.mubr.msk.f32.gmra.mrb[14].mxu0 %vm148_vm3, %v6607_v0  ;;  %3816 = vmatmul.mubr.msk.f32.gmra.mrb[14].mxu1 %vm148_vm3, %v6607_v0 }
  0x64   :  { %488 = vmatprep.mubr.f32.mxu0 %v8156_v1  ;;  %601 = vmatprep.mubr.f32.mxu1 %v8156_v1 }
  0x67   :  { %3819 = vmatmul.mubr.msk.f32.vlgmr.msra.gmra.mrb[16].mxu0 %vm148_vm3, %v6536_v36  ;;  %3829 = vmatmul.mubr.msk.f32.vlgmr.msra.gmra.mrb[16].mxu1 %vm148_vm3, %v6536_v36  ;;  %v6653_v36 = vpack.c.bf16 %v729_v31, %v727_v30  ;;  %v745_v30 = vld [vmem:[#allocation8 + $0xf8] sm:$0xff] }
  0x68   :  { %3929 = vmatpush1.bf16.msra.mxu0 %v6615_v10  ;;  %3993 = vmatpush1.bf16.msra.mxu1 %v6618_v11  ;;  %v810_v31 = vld [vmem:[#allocation8 + $0x2f8] sm:$0xff]  ;;  %v6725_v37 = vpack.c.bf16 %v745_v30, %v743_v29  ;;  %v755_v29 = vld [vmem:[#allocation8 + $0x148] sm:$0xff] }
  0x69   :  { %3931 = vmatprep.subr.bf16.mxu0 %v6620_v12  ;;  %3995 = vmatprep.subr.bf16.mxu1 %v6622_v16  ;;  %8456 = vst [vmem:[#allocation23_spill] sm:$0xff] %v6653_v36  ;;  %v757_v30 = vld [vmem:[#allocation8 + $0x158] sm:$0xff] }
  0x6a   :  { %494 = vmatprep.mubr.f32.mxu0 %v8156_v1  ;;  %607 = vmatprep.mubr.f32.mxu1 %v8156_v1  ;;  %8472 = vst [vmem:[#allocation39_spill] sm:$0xff] %v6725_v37 }
  0x6b   :  { %3820 = vmatmul.mubr.msk.f32.gmra.mrb[18].mxu0 %vm148_vm3, %v6544_v49  ;;  %3830 = vmatmul.mubr.msk.f32.gmra.mrb[18].mxu1 %vm148_vm3, %v6544_v49  ;;  %v730_v49 = vld [vmem:[#allocation8 + $0x80] sm:$0xff] }
  0x6c   :  { %3933 = vmatpush1.bf16.msra.mxu0 %v6629_v22  ;;  %3997 = vmatpush1.bf16.msra.mxu1 %v6633_v23  ;;  %v6681_v2 = vpack.c.bf16 %v732_v50, %v730_v49  ;;  %v814_v49 = vld [vmem:[#allocation8 + $0x318] sm:$0xff]  ;;  %v6735_v50 = vpack.c.bf16 %v744_v39, %v742_v38  ;;  %v6773_v38 = vpack.c.bf16 %v817_v27, %v815_v21  ;;  %v825_v21 = vld [vmem:[#allocation8 + $0x370] sm:$0xff]  ;;  %v763_v27 = vld [vmem:[#allocation8 + $0x188] sm:$0xff] }
  0x6d   :  { %3935 = vmatprep.subr.bf16.mxu0 %v6635_v24  ;;  %3999 = vmatprep.subr.bf16.mxu1 %v6638_v28  ;;  %v6775_v39 = vpack.c.bf16 %v757_v30, %v755_v29  ;;  %v765_v29 = vld [vmem:[#allocation8 + $0x198] sm:$0xff]  ;;  %v828_v30 = vld [vmem:[#allocation8 + $0x388] sm:$0xff] }
  0x6e   :  { %500 = vmatprep.mubr.f32.mxu0 %v8156_v1  ;;  %613 = vmatprep.mubr.f32.mxu1 %v8156_v1  ;;  %8462 = vst [vmem:[#allocation29_spill] sm:$0xff] %v6681_v2  ;;  %8474 = vst [vmem:[#allocation41_spill] sm:$0xff] %v6735_v50 }
  0x6f   :  { %3821 = vmatmul.mubr.msk.f32.gmra.mrb[20].mxu0 %vm148_vm3, %v6561_v59  ;;  %3831 = vmatmul.mubr.msk.f32.gmra.mrb[20].mxu1 %vm148_vm3, %v6561_v59  ;;  %v802_v59 = vld [vmem:[#allocation8 + $0x2b8] sm:$0xff]  ;;  %8483 = vst [vmem:[#allocation50_spill] sm:$0xff] %v6773_v38  ;;  %8484 = vst [vmem:[#allocation51_spill] sm:$0xff] %v6775_v39 }
  0x70   :  { %3937 = vmatpush1.bf16.msra.mxu0 %v6645_v34  ;;  %4001 = vmatpush1.bf16.msra.mxu1 %v6651_v35  ;;  %v6692_v8 = vpack.c.bf16 %v802_v59, %v800_v57  ;;  %v811_v57 = vld [vmem:[#allocation8 + $0x300] sm:$0xff] }
  0x71   :  { %3939 = vmatprep.subr.bf16.mxu0 %v6653_v36  ;;  %4003 = vmatprep.subr.bf16.mxu1 %v6656_v40  ;;  %v6759_v14 = vpack.c.bf16 %v813_v5, %v811_v57  ;;  %v826_v57 = vld [vmem:[#allocation8 + $0x378] sm:$0xff]  ;;  %v6781_v5 = vpack.c.bf16 %v756_v43, %v754_v41  ;;  %v6799_v43 = vpack.c.bf16 %v765_v29, %v763_v27  ;;  %v766_v27 = vld [vmem:[#allocation8 + $0x1a0] sm:$0xff]  ;;  %v768_v29 = vld [vmem:[#allocation8 + $0x1b0] sm:$0xff] }
  0x72   :  { %506 = vmatprep.mubr.f32.mxu0 %v8156_v1  ;;  %619 = vmatprep.mubr.f32.mxu1 %v8156_v1  ;;  %8465 = vst [vmem:[#allocation32_spill] sm:$0xff] %v6692_v8 }
  0x73   :  { %3822 = vmatmul.mubr.msk.f32.gmra.mrb[22].mxu0 %vm148_vm3, %v6575_v60  ;;  %3832 = vmatmul.mubr.msk.f32.gmra.mrb[22].mxu1 %vm148_vm3, %v6575_v60  ;;  %v804_v60 = vld [vmem:[#allocation8 + $0x2c8] sm:$0xff]  ;;  %8479 = vst [vmem:[#allocation46_spill] sm:$0xff] %v6759_v14  ;;  %8486 = vst [vmem:[#allocation53_spill] sm:$0xff] %v6781_v5 }
  0x74   :  { %3941 = vmatpush1.bf16.msra.mxu0 %v6663_v46  ;;  %4005 = vmatpush1.bf16.msra.mxu1 %v6669_v47  ;;  %v6710_v26 = vpack.c.bf16 %v806_v15, %v804_v60  ;;  %v6761_v60 = vpack.c.bf16 %v753_v7, %v751_v6  ;;  %v750_v15 = vld [vmem:[#allocation8 + $0x120] sm:$0xff]  ;;  %8492 = vst [vmem:[#allocation59_spill] sm:$0xff] %v6799_v43 }
  0x75   :  { %3943 = vmatprep.subr.bf16.mxu0 %v6671_v48  ;;  %4007 = vmatprep.subr.bf16.mxu1 %v6674_v52 }
  0x76   :  { %512 = vmatprep.mubr.f32.mxu0 %v8156_v1  ;;  %625 = vmatprep.mubr.f32.mxu1 %v8156_v1  ;;  %8469 = vst [vmem:[#allocation36_spill] sm:$0xff] %v6710_v26  ;;  %8480 = vst [vmem:[#allocation47_spill] sm:$0xff] %v6761_v60 }
  0x77   :  { %3823 = vmatmul.mubr.msk.f32.gmra.mrb[24].mxu0 %vm148_vm3, %v6583_v61  ;;  %3833 = vmatmul.mubr.msk.f32.gmra.mrb[24].mxu1 %vm148_vm3, %v6583_v61  ;;  %v808_v61 = vld [vmem:[#allocation8 + $0x2e8] sm:$0xff] }
  0x78   :  { %3945 = vmatpush1.bf16.msra.mxu0 %v6681_v2  ;;  %4009 = vmatpush1.bf16.msra.mxu1 %v6687_v3  ;;  %v6728_v42 = vpack.c.bf16 %v810_v31, %v808_v61  ;;  %v822_v61 = vld [vmem:[#allocation8 + $0x358] sm:$0xff]  ;;  %v6769_v31 = vpack.c.bf16 %v752_v20, %v750_v15  ;;  %v823_v15 = vld [vmem:[#allocation8 + $0x360] sm:$0xff]  ;;  %v6790_v20 = vpack.c.bf16 %v826_v57, %v824_v56  ;;  %v829_v56 = vld [vmem:[#allocation8 + $0x390] sm:$0xff] }
  0x79   :  { %3947 = vmatprep.subr.bf16.mxu0 %v6689_v4  ;;  %4011 = vmatprep.subr.bf16.mxu1 %v6692_v8  ;;  %v6797_v41 = vpack.c.bf16 %v825_v21, %v823_v15  ;;  %v767_v57 = vld [vmem:[#allocation8 + $0x1a8] sm:$0xff] }
  0x7a   :  { %518 = vmatprep.mubr.f32.mxu0 %v8156_v1  ;;  %631 = vmatprep.mubr.f32.mxu1 %v8156_v1  ;;  %8473 = vst [vmem:[#allocation40_spill] sm:$0xff] %v6728_v42  ;;  %8482 = vst [vmem:[#allocation49_spill] sm:$0xff] %v6769_v31 }
  0x7b   :  { %3824 = vmatmul.mubr.msk.f32.gmra.mrb[26].mxu0 %vm148_vm3, %v6591_v62  ;;  %3834 = vmatmul.mubr.msk.f32.gmra.mrb[26].mxu1 %vm148_vm3, %v6591_v62  ;;  %v812_v62 = vld [vmem:[#allocation8 + $0x308] sm:$0xff]  ;;  %8489 = vst [vmem:[#allocation56_spill] sm:$0xff] %v6790_v20  ;;  %8491 = vst [vmem:[#allocation58_spill] sm:$0xff] %v6797_v41 }
  0x7c   :  { %3949 = vmatpush1.bf16.msra.mxu0 %v6699_v17  ;;  %4013 = vmatpush1.bf16.msra.mxu1 %v6705_v18  ;;  %v6746_v59 = vpack.c.bf16 %v814_v49, %v812_v62  ;;  %v821_v62 = vld [vmem:[#allocation8 + $0x350] sm:$0xff]  ;;  %v759_v49 = vld [vmem:[#allocation8 + $0x168] sm:$0xff] }
  0x7d   :  { %3951 = vmatprep.subr.bf16.mxu0 %v6707_v19  ;;  %4015 = vmatprep.subr.bf16.mxu1 %v6710_v26  ;;  %v6785_v6 = vpack.c.bf16 %v821_v62, %v819_v44  ;;  %v6787_v7 = vpack.c.bf16 %v761_v54, %v759_v49  ;;  %v762_v44 = vld [vmem:[#allocation8 + $0x180] sm:$0xff]  ;;  %v764_v62 = vld [vmem:[#allocation8 + $0x190] sm:$0xff] }
  0x7e   :  { %524 = vmatprep.mubr.f32.mxu0 %v8156_v1  ;;  %637 = vmatprep.mubr.f32.mxu1 %v8156_v1  ;;  %8477 = vst [vmem:[#allocation44_spill] sm:$0xff] %v6746_v59  ;;  %v827_v49 = vld [vmem:[#allocation8 + $0x380] sm:$0xff] }
  0x7f   :  { %3825 = vmatmul.mubr.msk.f32.gmra.mrb[28].mxu0 %vm148_vm3, %v6599_v63  ;;  %3835 = vmatmul.mubr.msk.f32.gmra.mrb[28].mxu1 %vm148_vm3, %v6599_v63  ;;  %v816_v63 = vld [vmem:[#allocation8 + $0x328] sm:$0xff]  ;;  %8487 = vst [vmem:[#allocation54_spill] sm:$0xff] %v6785_v6  ;;  %8488 = vst [vmem:[#allocation55_spill] sm:$0xff] %v6787_v7  ;;  %v6809_v15 = vpack.c.bf16 %v829_v56, %v827_v49  ;;  %v770_v56 = vld [vmem:[#allocation8 + $0x1c0] sm:$0xff] }
  0x80   :  { %3953 = vmatpush1.bf16.msra.mxu0 %v6717_v32  ;;  %4017 = vmatpush1.bf16.msra.mxu1 %v6723_v33  ;;  %v6764_v25 = vpack.c.bf16 %v818_v9, %v816_v63  ;;  %v758_v63 = vld [vmem:[#allocation8 + $0x160] sm:$0xff]  ;;  %v760_v9 = vld [vmem:[#allocation8 + $0x170] sm:$0xff] }
  0x81   :  { %3955 = vmatprep.subr.bf16.mxu0 %v6725_v37  ;;  %4019 = vmatprep.subr.bf16.mxu1 %v6728_v42  ;;  %8495 = vst [vmem:[#allocation62_spill] sm:$0xff] %v6809_v15 }
  0x82   :  { %530 = vmatprep.mubr.f32.mxu0 %v8156_v1  ;;  %643 = vmatprep.mubr.f32.mxu1 %v8156_v1  ;;  %8481 = vst [vmem:[#allocation48_spill] sm:$0xff] %v6764_v25 }
  0x83   :  { %3826 = vmatmul.mubr.msk.f32.gmra.mrb[30].mxu0 %vm148_vm3, %v6607_v0  ;;  %3836 = vmatmul.mubr.msk.f32.gmra.mrb[30].mxu1 %vm148_vm3, %v6607_v0  ;;  %v820_v0 = vld [vmem:[#allocation8 + $0x348] sm:$0xff] }
  0x84   :  { %3957 = vmatpush1.bf16.msra.mxu0 %v6735_v50  ;;  %4021 = vmatpush1.bf16.msra.mxu1 %v6741_v51  ;;  %v6778_v45 = vpack.c.bf16 %v822_v61, %v820_v0  ;;  %v830_v0 = vld [vmem:[#allocation8 + $0x398] sm:$0xff]  ;;  %v6793_v61 = vpack.c.bf16 %v760_v9, %v758_v63  ;;  %v832_v63 = vld [vmem:[#allocation8 + $0x3a8] sm:$0xff] }
  0x85   :  { %3959 = vmatprep.subr.bf16.mxu0 %v6743_v53  ;;  %4023 = vmatprep.subr.bf16.mxu1 %v6746_v59  ;;  %v6802_v54 = vpack.c.bf16 %v830_v0, %v828_v30  ;;  %v834_v9 = vld [vmem:[#allocation8 + $0x3b8] sm:$0xff]  ;;  %v831_v30 = vld [vmem:[#allocation8 + $0x3a0] sm:$0xff] }
  0x86   :  { %1045 = vmatprep.mubr.f32.mxu0 %v8156_v1  ;;  %1130 = vmatprep.mubr.f32.mxu1 %v8156_v1  ;;  %8485 = vst [vmem:[#allocation52_spill] sm:$0xff] %v6778_v45  ;;  %8490 = vst [vmem:[#allocation57_spill] sm:$0xff] %v6793_v61  ;;  %v769_v1 = vld [vmem:[#allocation8 + $0x1b8] sm:$0xff]  ;;  %v6814_v0 = vpack.c.bf16 %v834_v9, %v832_v63  ;;  %v835_v63 = vld [vmem:[#allocation8 + $0x3c0] sm:$0xff] }
  0x87   :  { %8493 = vst [vmem:[#allocation60_spill] sm:$0xff] %v6802_v54  ;;  %v6811_v21 = vpack.c.bf16 %v769_v1, %v767_v57  ;;  %v772_v57 = vld [vmem:[#allocation8 + $0x1d0] sm:$0xff] }
  0x88   :  { %3961 = vmatpush1.bf16.msra.mxu0 %v6753_v13  ;;  %4025 = vmatpush1.bf16.msra.mxu1 %v6759_v14  ;;  %8497 = vst [vmem:[#allocation64_spill] sm:$0xff] %v6814_v0 }
  0x89   :  { %3963 = vmatprep.subr.bf16.mxu0 %v6761_v60  ;;  %4027 = vmatprep.subr.bf16.mxu1 %v6764_v25  ;;  %8496 = vst [vmem:[#allocation63_spill] sm:$0xff] %v6811_v21 }
  0x8c   :  { %3965 = vmatpush1.bf16.msra.mxu0 %v6769_v31  ;;  %4029 = vmatpush1.bf16.msra.mxu1 %v6773_v38 }
  0x8d   :  { %3967 = vmatprep.subr.bf16.mxu0 %v6775_v39  ;;  %4031 = vmatprep.subr.bf16.mxu1 %v6778_v45 }
  0x90   :  { %3969 = vmatpush1.bf16.msra.mxu0 %v6781_v5  ;;  %4033 = vmatpush1.bf16.msra.mxu1 %v6785_v6  ;;  %v6805_v6 = vpack.c.bf16 %v764_v62, %v762_v44  ;;  %v836_v44 = vld [vmem:[#allocation8 + $0x3c8] sm:$0xff]  ;;  %v838_v62 = vld [vmem:[#allocation8 + $0x3d8] sm:$0xff] }
  0x91   :  { %3971 = vmatprep.subr.bf16.mxu0 %v6787_v7  ;;  %4035 = vmatprep.subr.bf16.mxu1 %v6790_v20  ;;  %v833_v20 = vld [vmem:[#allocation8 + $0x3b0] sm:$0xff]  ;;  %v771_v7 = vld [vmem:[#allocation8 + $0x1c8] sm:$0xff]  ;;  %v6826_v9 = vpack.c.bf16 %v838_v62, %v836_v44  ;;  %v839_v44 = vld [vmem:[#allocation8 + $0x3e0] sm:$0xff] }
  0x92   :  { %8494 = vst [vmem:[#allocation61_spill] sm:$0xff] %v6805_v6  ;;  %v6821_v1 = vpack.c.bf16 %v833_v20, %v831_v30  ;;  %v776_v30 = vld [vmem:[#allocation8 + $0x1f0] sm:$0xff]  ;;  %v857_v5 = vld [vmem:[#allocation8 + $0x468] sm:$0xff] }
  0x93   :  { %8501 = vst [vmem:[#allocation68_spill] sm:$0xff] %v6826_v9 }
  0x94   :  { %3973 = vmatpush1.bf16.msra.mxu0 %v6793_v61  ;;  %4037 = vmatpush1.bf16.msra.mxu1 %v6797_v41  ;;  %v773_v61 = vld [vmem:[#allocation8 + $0x1d8] sm:$0xff]  ;;  %v6817_v41 = vpack.c.bf16 %v768_v29, %v766_v27  ;;  %8499 = vst [vmem:[#allocation66_spill] sm:$0xff] %v6821_v1  ;;  %v840_v27 = vld [vmem:[#allocation8 + $0x3e8] sm:$0xff] }
  0x95   :  { %3975 = vmatprep.subr.bf16.mxu0 %v6799_v43  ;;  %4039 = vmatprep.subr.bf16.mxu1 %v6802_v54  ;;  %v6823_v49 = vpack.c.bf16 %v773_v61, %v771_v7  ;;  %v837_v54 = vld [vmem:[#allocation8 + $0x3d0] sm:$0xff]  ;;  %v775_v43 = vld [vmem:[#allocation8 + $0x1e8] sm:$0xff]  ;;  %v842_v29 = vld [vmem:[#allocation8 + $0x3f8] sm:$0xff] }
  0x96   :  { %8498 = vst [vmem:[#allocation65_spill] sm:$0xff] %v6817_v41  ;;  %v6833_v7 = vpack.c.bf16 %v837_v54, %v835_v63  ;;  %v774_v61 = vld [vmem:[#allocation8 + $0x1e0] sm:$0xff]  ;;  %v6838_v62 = vpack.c.bf16 %v842_v29, %v840_v27  ;;  %v846_v63 = vld [vmem:[#allocation8 + $0x410] sm:$0xff] }
  0x97   :  { %8500 = vst [vmem:[#allocation67_spill] sm:$0xff] %v6823_v49  ;;  %v844_v54 = vld [vmem:[#allocation8 + $0x400] sm:$0xff] }
  0x98   :  { %3977 = vmatpush1.bf16.msra.mxu0 %v6805_v6  ;;  %4041 = vmatpush1.bf16.msra.mxu1 %v6809_v15  ;;  %v777_v6 = vld [vmem:[#allocation8 + $0x1f8] sm:$0xff]  ;;  %v6829_v15 = vpack.c.bf16 %v772_v57, %v770_v56  ;;  %8503 = vst [vmem:[#allocation70_spill] sm:$0xff] %v6833_v7  ;;  %8505 = vst [vmem:[#allocation72_spill] sm:$0xff] %v6838_v62  ;;  %v910_v56 = vld [vmem:[#allocation8 + $0x608] sm:$0xff] }
  0x99   :  { %3979 = vmatprep.subr.bf16.mxu0 %v6811_v21  ;;  %4043 = vmatprep.subr.bf16.mxu1 %v6814_v0  ;;  %v6835_v20 = vpack.c.bf16 %v777_v6, %v775_v43  ;;  %v841_v0 = vld [vmem:[#allocation8 + $0x3f0] sm:$0xff]  ;;  %v845_v21 = vld [vmem:[#allocation8 + $0x408] sm:$0xff]  ;;  %v912_v57 = vld [vmem:[#allocation8 + $0x618] sm:$0xff] }
  0x9a   :  { %8502 = vst [vmem:[#allocation69_spill] sm:$0xff] %v6829_v15  ;;  %v6845_v6 = vpack.c.bf16 %v841_v0, %v839_v44  ;;  %v909_v27 = vld [vmem:[#allocation8 + $0x600] sm:$0xff]  ;;  %v6850_v29 = vpack.c.bf16 %v912_v57, %v910_v56  ;;  %v850_v44 = vld [vmem:[#allocation8 + $0x430] sm:$0xff] }
  0x9b   :  { %8504 = vst [vmem:[#allocation71_spill] sm:$0xff] %v6835_v20  ;;  %v848_v0 = vld [vmem:[#allocation8 + $0x420] sm:$0xff] }
  0x9c   :  { %3981 = vmatpush1.bf16.msra.mxu0 %v6817_v41  ;;  %4045 = vmatpush1.bf16.msra.mxu1 %v6821_v1  ;;  %v847_v41 = vld [vmem:[#allocation8 + $0x418] sm:$0xff]  ;;  %v6841_v1 = vpack.c.bf16 %v776_v30, %v774_v61  ;;  %8507 = vst [vmem:[#allocation74_spill] sm:$0xff] %v6845_v6  ;;  %8509 = vst [vmem:[#allocation76_spill] sm:$0xff] %v6850_v29  ;;  %v914_v61 = vld [vmem:[#allocation8 + $0x628] sm:$0xff] }
  0x9d   :  { %3983 = vmatprep.subr.bf16.mxu0 %v6823_v49  ;;  %4047 = vmatprep.subr.bf16.mxu1 %v6826_v9  ;;  %v6847_v43 = vpack.c.bf16 %v847_v41, %v845_v21  ;;  %v911_v9 = vld [vmem:[#allocation8 + $0x610] sm:$0xff]  ;;  %v849_v49 = vld [vmem:[#allocation8 + $0x428] sm:$0xff]  ;;  %v916_v30 = vld [vmem:[#allocation8 + $0x638] sm:$0xff] }
  0x9e   :  { %8506 = vst [vmem:[#allocation73_spill] sm:$0xff] %v6841_v1  ;;  %v6857_v41 = vpack.c.bf16 %v911_v9, %v909_v27  ;;  %v913_v56 = vld [vmem:[#allocation8 + $0x620] sm:$0xff]  ;;  %v6862_v57 = vpack.c.bf16 %v916_v30, %v914_v61  ;;  %v854_v61 = vld [vmem:[#allocation8 + $0x450] sm:$0xff] }
  0x9f   :  { %8508 = vst [vmem:[#allocation75_spill] sm:$0xff] %v6847_v43  ;;  %v852_v27 = vld [vmem:[#allocation8 + $0x440] sm:$0xff] }
  0xa0   :  { %3985 = vmatpush1.bf16.msra.mxu0 %v6829_v15  ;;  %4049 = vmatpush1.bf16.msra.mxu1 %v6833_v7  ;;  %v851_v15 = vld [vmem:[#allocation8 + $0x438] sm:$0xff]  ;;  %v6853_v7 = vpack.c.bf16 %v846_v63, %v844_v54  ;;  %8511 = vst [vmem:[#allocation78_spill] sm:$0xff] %v6857_v41  ;;  %8513 = vst [vmem:[#allocation80_spill] sm:$0xff] %v6862_v57  ;;  %v8514_v54 = vmov 0.0   ;;  %v918_v63 = vld [vmem:[#allocation8 + $0x648] sm:$0xff] }
  0xa1   :  { %3987 = vmatprep.subr.bf16.mxu0 %v6835_v20  ;;  %4051 = vmatprep.subr.bf16.mxu1 %v6838_v62  ;;  %v6859_v21 = vpack.c.bf16 %v851_v15, %v849_v49  ;;  %v915_v62 = vld [vmem:[#allocation8 + $0x630] sm:$0xff]  ;;  %v853_v20 = vld [vmem:[#allocation8 + $0x448] sm:$0xff]  ;;  %v6867_v15 = vpack.c.bf16 %v850_v44, %v848_v0  ;;  %v917_v30 = vld [vmem:[#allocation8 + $0x640] sm:$0xff] }
  0xa2   :  { %8510 = vst [vmem:[#allocation77_spill] sm:$0xff] %v6853_v7  ;;  %v6871_v49 = vpack.c.bf16 %v915_v62, %v913_v56  ;;  %v922_v0 = vld [vmem:[#allocation8 + $0x668] sm:$0xff]  ;;  %v924_v44 = vld [vmem:[#allocation8 + $0x678] sm:$0xff]  ;;  %v858_v56 = vld [vmem:[#allocation8 + $0x470] sm:$0xff] }
  0xa3   :  { %8512 = vst [vmem:[#allocation79_spill] sm:$0xff] %v6859_v21  ;;  %8515 = vst [vmem:[#allocation81_spill] sm:$0xff] %v6867_v15 }
  0xa4   :  { %3989 = vmatpush1.bf16.msra.mxu0 %v6841_v1  ;;  %4053 = vmatpush1.bf16.msra.mxu1 %v6845_v6  ;;  %v855_v1 = vld [vmem:[#allocation8 + $0x458] sm:$0xff]  ;;  %8516 = vst [vmem:[#allocation82_spill] sm:$0xff] %v6871_v49 }
  0xa5   :  { %4055 = vmatprep.subr.bf16.mxu0 %v6847_v43  ;;  %4119 = vmatprep.subr.bf16.mxu1 %v6850_v29  ;;  %v920_v6 = vld [vmem:[#allocation8 + $0x658] sm:$0xff]  ;;  %v6873_v9 = vpack.c.bf16 %v855_v1, %v853_v20  ;;  %v919_v43 = vld [vmem:[#allocation8 + $0x650] sm:$0xff]  ;;  %v6881_v1 = vpack.c.bf16 %v854_v61, %v852_v27  ;;  %v926_v27 = vld [vmem:[#allocation8 + $0x688] sm:$0xff] }
  0xa6   :  { %v6876_v29 = vpack.c.bf16 %v920_v6, %v918_v63  ;;  %v6885_v20 = vpack.c.bf16 %v919_v43, %v917_v30  ;;  %v856_v6 = vld [vmem:[#allocation8 + $0x460] sm:$0xff]  ;;  %v928_v61 = vld [vmem:[#allocation8 + $0x698] sm:$0xff]  ;;  %v862_v30 = vld [vmem:[#allocation8 + $0x490] sm:$0xff] }
  0xa7   :  { %1046 = vmatmul.mubr.f32.vlgmr.msra.gmra.mrb[0].mxu0 %v8514_v54  ;;  %1131 = vmatmul.mubr.f32.vlgmr.msra.gmra.mrb[0].mxu1 %v8514_v54  ;;  %8517 = vst [vmem:[#allocation83_spill] sm:$0xff] %v6873_v9  ;;  %8519 = vst [vmem:[#allocation85_spill] sm:$0xff] %v6881_v1  ;;  %v921_v63 = vld [vmem:[#allocation8 + $0x660] sm:$0xff] }
  0xa8   :  { %4057 = vmatpush1.bf16.msra.mxu0 %v6853_v7  ;;  %4121 = vmatpush1.bf16.msra.mxu1 %v6857_v41  ;;  %8518 = vst [vmem:[#allocation84_spill] sm:$0xff] %v6876_v29  ;;  %v859_v7 = vld [vmem:[#allocation8 + $0x478] sm:$0xff]  ;;  %8520 = vst [vmem:[#allocation86_spill] sm:$0xff] %v6885_v20  ;;  %v861_v41 = vld [vmem:[#allocation8 + $0x488] sm:$0xff] }
  0xa9   :  { %4059 = vmatprep.subr.bf16.mxu0 %v6859_v21  ;;  %4123 = vmatprep.subr.bf16.mxu1 %v6862_v57  ;;  %v6887_v62 = vpack.c.bf16 %v859_v7, %v857_v5  ;;  %v6890_v57 = vpack.c.bf16 %v924_v44, %v922_v0  ;;  %v923_v21 = vld [vmem:[#allocation8 + $0x670] sm:$0xff]  ;;  %v860_v43 = vld [vmem:[#allocation8 + $0x480] sm:$0xff]  ;;  %v6902_v44 = vpack.c.bf16 %v928_v61, %v926_v27 }
  0xaa   :  { %1215 = vmatprep.mubr.f32.mxu0 %v8514_v54  ;;  %1296 = vmatprep.mubr.f32.mxu1 %v8514_v54  ;;  %v6897_v5 = vpack.c.bf16 %v923_v21, %v921_v63  ;;  %v925_v0 = vld [vmem:[#allocation8 + $0x680] sm:$0xff]  ;;  %v866_v63 = vld [vmem:[#allocation8 + $0x4b0] sm:$0xff] }
  0xab   :  { %8521 = vst [vmem:[#allocation87_spill] sm:$0xff] %v6887_v62  ;;  %8522 = vst [vmem:[#allocation88_spill] sm:$0xff] %v6890_v57  ;;  %v929_v27 = vld [vmem:[#allocation8 + $0x6a0] sm:$0xff] }
  0xac   :  { %4061 = vmatpush1.bf16.msra.mxu0 %v6867_v15  ;;  %4125 = vmatpush1.bf16.msra.mxu1 %v6871_v49  ;;  %v863_v15 = vld [vmem:[#allocation8 + $0x498] sm:$0xff]  ;;  %v6893_v49 = vpack.c.bf16 %v858_v56, %v856_v6  ;;  %8524 = vst [vmem:[#allocation90_spill] sm:$0xff] %v6897_v5  ;;  %8526 = vst [vmem:[#allocation92_spill] sm:$0xff] %v6902_v44  ;;  %v930_v6 = vld [vmem:[#allocation8 + $0x6a8] sm:$0xff] }
  0xad   :  { %4063 = vmatprep.subr.bf16.mxu0 %v6873_v9  ;;  %4127 = vmatprep.subr.bf16.mxu1 %v6876_v29  ;;  %v6899_v7 = vpack.c.bf16 %v863_v15, %v861_v41  ;;  %v927_v29 = vld [vmem:[#allocation8 + $0x690] sm:$0xff]  ;;  %v865_v9 = vld [vmem:[#allocation8 + $0x4a8] sm:$0xff]  ;;  %v932_v56 = vld [vmem:[#allocation8 + $0x6b8] sm:$0xff] }
  0xae   :  { %8523 = vst [vmem:[#allocation89_spill] sm:$0xff] %v6893_v49  ;;  %v6909_v41 = vpack.c.bf16 %v927_v29, %v925_v0  ;;  %v864_v15 = vld [vmem:[#allocation8 + $0x4a0] sm:$0xff]  ;;  %v6914_v61 = vpack.c.bf16 %v932_v56, %v930_v6  ;;  %v870_v0 = vld [vmem:[#allocation8 + $0x4d0] sm:$0xff] }
  0xaf   :  { %8525 = vst [vmem:[#allocation91_spill] sm:$0xff] %v6899_v7  ;;  %v933_v6 = vld [vmem:[#allocation8 + $0x6c0] sm:$0xff] }
  0xb0   :  { %4065 = vmatpush1.bf16.msra.mxu0 %v6881_v1  ;;  %4129 = vmatpush1.bf16.msra.mxu1 %v6885_v20  ;;  %v867_v1 = vld [vmem:[#allocation8 + $0x4b8] sm:$0xff]  ;;  %v6905_v20 = vpack.c.bf16 %v862_v30, %v860_v43  ;;  %8528 = vst [vmem:[#allocation94_spill] sm:$0xff] %v6909_v41  ;;  %8530 = vst [vmem:[#allocation96_spill] sm:$0xff] %v6914_v61  ;;  %v934_v43 = vld [vmem:[#allocation8 + $0x6c8] sm:$0xff] }
  0xb1   :  { %4067 = vmatprep.subr.bf16.mxu0 %v6887_v62  ;;  %4131 = vmatprep.subr.bf16.mxu1 %v6890_v57  ;;  %v6911_v21 = vpack.c.bf16 %v867_v1, %v865_v9  ;;  %v931_v57 = vld [vmem:[#allocation8 + $0x6b0] sm:$0xff]  ;;  %v869_v62 = vld [vmem:[#allocation8 + $0x4c8] sm:$0xff]  ;;  %v936_v30 = vld [vmem:[#allocation8 + $0x6d8] sm:$0xff] }
  0xb2   :  { %8527 = vst [vmem:[#allocation93_spill] sm:$0xff] %v6905_v20  ;;  %v6921_v29 = vpack.c.bf16 %v931_v57, %v929_v27  ;;  %v868_v1 = vld [vmem:[#allocation8 + $0x4c0] sm:$0xff]  ;;  %v6926_v56 = vpack.c.bf16 %v936_v30, %v934_v43  ;;  %v874_v27 = vld [vmem:[#allocation8 + $0x4f0] sm:$0xff] }
  0xb3   :  { %8529 = vst [vmem:[#allocation95_spill] sm:$0xff] %v6911_v21  ;;  %v937_v43 = vld [vmem:[#allocation8 + $0x6e0] sm:$0xff] }
  0xb4   :  { %4069 = vmatpush1.bf16.msra.mxu0 %v6893_v49  ;;  %4133 = vmatpush1.bf16.msra.mxu1 %v6897_v5  ;;  %v871_v49 = vld [vmem:[#allocation8 + $0x4d8] sm:$0xff]  ;;  %v6917_v5 = vpack.c.bf16 %v866_v63, %v864_v15  ;;  %8532 = vst [vmem:[#allocation98_spill] sm:$0xff] %v6921_v29  ;;  %8534 = vst [vmem:[#allocation100_spill] sm:$0xff] %v6926_v56  ;;  %v938_v15 = vld [vmem:[#allocation8 + $0x6e8] sm:$0xff] }
  0xb5   :  { %4071 = vmatprep.subr.bf16.mxu0 %v6899_v7  ;;  %4135 = vmatprep.subr.bf16.mxu1 %v6902_v44  ;;  %v6923_v9 = vpack.c.bf16 %v871_v49, %v869_v62  ;;  %v935_v44 = vld [vmem:[#allocation8 + $0x6d0] sm:$0xff]  ;;  %v873_v7 = vld [vmem:[#allocation8 + $0x4e8] sm:$0xff]  ;;  %v940_v63 = vld [vmem:[#allocation8 + $0x6f8] sm:$0xff] }
  0xb6   :  { %8531 = vst [vmem:[#allocation97_spill] sm:$0xff] %v6917_v5  ;;  %v6933_v57 = vpack.c.bf16 %v935_v44, %v933_v6  ;;  %v872_v62 = vld [vmem:[#allocation8 + $0x4e0] sm:$0xff]  ;;  %v6938_v30 = vpack.c.bf16 %v940_v63, %v938_v15  ;;  %v878_v6 = vld [vmem:[#allocation8 + $0x510] sm:$0xff] }
  0xb7   :  { %8533 = vst [vmem:[#allocation99_spill] sm:$0xff] %v6923_v9  ;;  %v876_v44 = vld [vmem:[#allocation8 + $0x500] sm:$0xff] }
  0xb8   :  { %4073 = vmatpush1.bf16.msra.mxu0 %v6905_v20  ;;  %4137 = vmatpush1.bf16.msra.mxu1 %v6909_v41  ;;  %v875_v20 = vld [vmem:[#allocation8 + $0x4f8] sm:$0xff]  ;;  %v6929_v41 = vpack.c.bf16 %v870_v0, %v868_v1  ;;  %8536 = vst [vmem:[#allocation102_spill] sm:$0xff] %v6933_v57  ;;  %8538 = vst [vmem:[#allocation104_spill] sm:$0xff] %v6938_v30  ;;  %v942_v1 = vld [vmem:[#allocation8 + $0x708] sm:$0xff] }
  0xb9   :  { %4075 = vmatprep.subr.bf16.mxu0 %v6911_v21  ;;  %4139 = vmatprep.subr.bf16.mxu1 %v6914_v61  ;;  %v6935_v49 = vpack.c.bf16 %v875_v20, %v873_v7  ;;  %v939_v61 = vld [vmem:[#allocation8 + $0x6f0] sm:$0xff]  ;;  %v877_v21 = vld [vmem:[#allocation8 + $0x508] sm:$0xff]  ;;  %v944_v0 = vld [vmem:[#allocation8 + $0x718] sm:$0xff] }
  0xba   :  { %8535 = vst [vmem:[#allocation101_spill] sm:$0xff] %v6929_v41  ;;  %v6945_v20 = vpack.c.bf16 %v939_v61, %v937_v43  ;;  %v941_v15 = vld [vmem:[#allocation8 + $0x700] sm:$0xff]  ;;  %v6950_v63 = vpack.c.bf16 %v944_v0, %v942_v1  ;;  %v882_v43 = vld [vmem:[#allocation8 + $0x530] sm:$0xff] }
  0xbb   :  { %8537 = vst [vmem:[#allocation103_spill] sm:$0xff] %v6935_v49  ;;  %v880_v61 = vld [vmem:[#allocation8 + $0x520] sm:$0xff] }
  0xbc   :  { %4077 = vmatpush1.bf16.msra.mxu0 %v6917_v5  ;;  %4141 = vmatpush1.bf16.msra.mxu1 %v6921_v29  ;;  %v879_v5 = vld [vmem:[#allocation8 + $0x518] sm:$0xff]  ;;  %v6941_v29 = vpack.c.bf16 %v874_v27, %v872_v62  ;;  %8540 = vst [vmem:[#allocation106_spill] sm:$0xff] %v6945_v20  ;;  %8542 = vst [vmem:[#allocation108_spill] sm:$0xff] %v6950_v63  ;;  %v946_v62 = vld [vmem:[#allocation8 + $0x728] sm:$0xff] }
  0xbd   :  { %4079 = vmatprep.subr.bf16.mxu0 %v6923_v9  ;;  %4143 = vmatprep.subr.bf16.mxu1 %v6926_v56  ;;  %v6947_v7 = vpack.c.bf16 %v879_v5, %v877_v21  ;;  %v943_v56 = vld [vmem:[#allocation8 + $0x710] sm:$0xff]  ;;  %v881_v9 = vld [vmem:[#allocation8 + $0x528] sm:$0xff]  ;;  %v948_v27 = vld [vmem:[#allocation8 + $0x738] sm:$0xff] }
  0xbe   :  { %8539 = vst [vmem:[#allocation105_spill] sm:$0xff] %v6941_v29  ;;  %v6957_v5 = vpack.c.bf16 %v943_v56, %v941_v15  ;;  %v945_v1 = vld [vmem:[#allocation8 + $0x720] sm:$0xff]  ;;  %v6962_v0 = vpack.c.bf16 %v948_v27, %v946_v62  ;;  %v886_v15 = vld [vmem:[#allocation8 + $0x550] sm:$0xff] }
  0xbf   :  { %8541 = vst [vmem:[#allocation107_spill] sm:$0xff] %v6947_v7  ;;  %v884_v56 = vld [vmem:[#allocation8 + $0x540] sm:$0xff] }
  0xc0   :  { %4081 = vmatpush1.bf16.msra.mxu0 %v6929_v41  ;;  %4145 = vmatpush1.bf16.msra.mxu1 %v6933_v57  ;;  %v883_v41 = vld [vmem:[#allocation8 + $0x538] sm:$0xff]  ;;  %v6953_v57 = vpack.c.bf16 %v878_v6, %v876_v44  ;;  %8544 = vst [vmem:[#allocation110_spill] sm:$0xff] %v6957_v5  ;;  %8546 = vst [vmem:[#allocation112_spill] sm:$0xff] %v6962_v0  ;;  %v950_v44 = vld [vmem:[#allocation8 + $0x748] sm:$0xff] }
  0xc1   :  { %4083 = vmatprep.subr.bf16.mxu0 %v6935_v49  ;;  %4147 = vmatprep.subr.bf16.mxu1 %v6938_v30  ;;  %v6959_v21 = vpack.c.bf16 %v883_v41, %v881_v9  ;;  %v947_v30 = vld [vmem:[#allocation8 + $0x730] sm:$0xff]  ;;  %v885_v49 = vld [vmem:[#allocation8 + $0x548] sm:$0xff]  ;;  %v952_v6 = vld [vmem:[#allocation8 + $0x758] sm:$0xff] }
  0xc2   :  { %8543 = vst [vmem:[#allocation109_spill] sm:$0xff] %v6953_v57  ;;  %v6969_v41 = vpack.c.bf16 %v947_v30, %v945_v1  ;;  %v949_v62 = vld [vmem:[#allocation8 + $0x740] sm:$0xff]  ;;  %v6974_v27 = vpack.c.bf16 %v952_v6, %v950_v44  ;;  %v890_v1 = vld [vmem:[#allocation8 + $0x570] sm:$0xff] }
  0xc3   :  { %8545 = vst [vmem:[#allocation111_spill] sm:$0xff] %v6959_v21  ;;  %v888_v30 = vld [vmem:[#allocation8 + $0x560] sm:$0xff] }
  0xc4   :  { %4085 = vmatpush1.bf16.msra.mxu0 %v6941_v29  ;;  %4149 = vmatpush1.bf16.msra.mxu1 %v6945_v20  ;;  %v887_v29 = vld [vmem:[#allocation8 + $0x558] sm:$0xff]  ;;  %v6965_v20 = vpack.c.bf16 %v882_v43, %v880_v61  ;;  %8548 = vst [vmem:[#allocation114_spill] sm:$0xff] %v6969_v41  ;;  %8550 = vst [vmem:[#allocation116_spill] sm:$0xff] %v6974_v27  ;;  %v954_v61 = vld [vmem:[#allocation8 + $0x768] sm:$0xff] }
  0xc5   :  { %4087 = vmatprep.subr.bf16.mxu0 %v6947_v7  ;;  %4151 = vmatprep.subr.bf16.mxu1 %v6950_v63  ;;  %v6971_v9 = vpack.c.bf16 %v887_v29, %v885_v49  ;;  %v951_v63 = vld [vmem:[#allocation8 + $0x750] sm:$0xff]  ;;  %v889_v7 = vld [vmem:[#allocation8 + $0x568] sm:$0xff]  ;;  %v956_v43 = vld [vmem:[#allocation8 + $0x778] sm:$0xff] }
  0xc6   :  { %8547 = vst [vmem:[#allocation113_spill] sm:$0xff] %v6965_v20  ;;  %v6981_v29 = vpack.c.bf16 %v951_v63, %v949_v62  ;;  %v953_v44 = vld [vmem:[#allocation8 + $0x760] sm:$0xff]  ;;  %v6986_v6 = vpack.c.bf16 %v956_v43, %v954_v61  ;;  %v894_v62 = vld [vmem:[#allocation8 + $0x590] sm:$0xff] }
  0xc7   :  { %8549 = vst [vmem:[#allocation115_spill] sm:$0xff] %v6971_v9  ;;  %v892_v63 = vld [vmem:[#allocation8 + $0x580] sm:$0xff] }
  0xc8   :  { %4089 = vmatpush1.bf16.msra.mxu0 %v6953_v57  ;;  %4153 = vmatpush1.bf16.msra.mxu1 %v6957_v5  ;;  %v891_v57 = vld [vmem:[#allocation8 + $0x578] sm:$0xff]  ;;  %v6977_v5 = vpack.c.bf16 %v886_v15, %v884_v56  ;;  %8552 = vst [vmem:[#allocation118_spill] sm:$0xff] %v6981_v29  ;;  %8554 = vst [vmem:[#allocation120_spill] sm:$0xff] %v6986_v6  ;;  %v958_v56 = vld [vmem:[#allocation8 + $0x788] sm:$0xff] }
  0xc9   :  { %4091 = vmatprep.subr.bf16.mxu0 %v6959_v21  ;;  %4155 = vmatprep.subr.bf16.mxu1 %v6962_v0  ;;  %v6983_v49 = vpack.c.bf16 %v891_v57, %v889_v7  ;;  %v955_v0 = vld [vmem:[#allocation8 + $0x770] sm:$0xff]  ;;  %v893_v21 = vld [vmem:[#allocation8 + $0x588] sm:$0xff]  ;;  %v960_v15 = vld [vmem:[#allocation8 + $0x798] sm:$0xff] }
  0xca   :  { %8551 = vst [vmem:[#allocation117_spill] sm:$0xff] %v6977_v5  ;;  %v6993_v57 = vpack.c.bf16 %v955_v0, %v953_v44  ;;  %v957_v61 = vld [vmem:[#allocation8 + $0x780] sm:$0xff]  ;;  %v6998_v43 = vpack.c.bf16 %v960_v15, %v958_v56  ;;  %v898_v44 = vld [vmem:[#allocation8 + $0x5b0] sm:$0xff] }
  0xcb   :  { %8553 = vst [vmem:[#allocation119_spill] sm:$0xff] %v6983_v49  ;;  %v896_v0 = vld [vmem:[#allocation8 + $0x5a0] sm:$0xff] }
  0xcc   :  { %4093 = vmatpush1.bf16.msra.mxu0 %v6965_v20  ;;  %4157 = vmatpush1.bf16.msra.mxu1 %v6969_v41  ;;  %v895_v20 = vld [vmem:[#allocation8 + $0x598] sm:$0xff]  ;;  %v6989_v41 = vpack.c.bf16 %v890_v1, %v888_v30  ;;  %8556 = vst [vmem:[#allocation122_spill] sm:$0xff] %v6993_v57  ;;  %8558 = vst [vmem:[#allocation124_spill] sm:$0xff] %v6998_v43  ;;  %v962_v30 = vld [vmem:[#allocation8 + $0x7a8] sm:$0xff] }
  0xcd   :  { %4095 = vmatprep.subr.bf16.mxu0 %v6971_v9  ;;  %4159 = vmatprep.subr.bf16.mxu1 %v6974_v27  ;;  %v6995_v7 = vpack.c.bf16 %v895_v20, %v893_v21  ;;  %v959_v27 = vld [vmem:[#allocation8 + $0x790] sm:$0xff]  ;;  %v897_v9 = vld [vmem:[#allocation8 + $0x5a8] sm:$0xff]  ;;  %v964_v1 = vld [vmem:[#allocation8 + $0x7b8] sm:$0xff] }
  0xce   :  { %8555 = vst [vmem:[#allocation121_spill] sm:$0xff] %v6989_v41  ;;  %v7005_v20 = vpack.c.bf16 %v959_v27, %v957_v61  ;;  %v961_v56 = vld [vmem:[#allocation8 + $0x7a0] sm:$0xff]  ;;  %v7010_v15 = vpack.c.bf16 %v964_v1, %v962_v30  ;;  %v902_v61 = vld [vmem:[#allocation8 + $0x5d0] sm:$0xff] }
  0xcf   :  { %8557 = vst [vmem:[#allocation123_spill] sm:$0xff] %v6995_v7  ;;  %v900_v27 = vld [vmem:[#allocation8 + $0x5c0] sm:$0xff] }
  0xd0   :  { %4097 = vmatpush1.bf16.msra.mxu0 %v6977_v5  ;;  %4161 = vmatpush1.bf16.msra.mxu1 %v6981_v29  ;;  %v899_v5 = vld [vmem:[#allocation8 + $0x5b8] sm:$0xff]  ;;  %v7001_v29 = vpack.c.bf16 %v894_v62, %v892_v63  ;;  %8560 = vst [vmem:[#allocation126_spill] sm:$0xff] %v7005_v20  ;;  %8562 = vst [vmem:[#allocation128_spill] sm:$0xff] %v7010_v15  ;;  %v966_v63 = vld [vmem:[#allocation8 + $0x7c8] sm:$0xff] }
  0xd1   :  { %4099 = vmatprep.subr.bf16.mxu0 %v6983_v49  ;;  %4163 = vmatprep.subr.bf16.mxu1 %v6986_v6  ;;  %v7007_v21 = vpack.c.bf16 %v899_v5, %v897_v9  ;;  %v963_v6 = vld [vmem:[#allocation8 + $0x7b0] sm:$0xff]  ;;  %v901_v49 = vld [vmem:[#allocation8 + $0x5c8] sm:$0xff]  ;;  %v968_v62 = vld [vmem:[#allocation8 + $0x7d8] sm:$0xff] }
  0xd2   :  { %8559 = vst [vmem:[#allocation125_spill] sm:$0xff] %v7001_v29  ;;  %v7017_v5 = vpack.c.bf16 %v963_v6, %v961_v56  ;;  %v965_v30 = vld [vmem:[#allocation8 + $0x7c0] sm:$0xff]  ;;  %v7022_v1 = vpack.c.bf16 %v968_v62, %v966_v63  ;;  %v906_v56 = vld [vmem:[#allocation8 + $0x5f0] sm:$0xff] }
  0xd3   :  { %8561 = vst [vmem:[#allocation127_spill] sm:$0xff] %v7007_v21  ;;  %v904_v6 = vld [vmem:[#allocation8 + $0x5e0] sm:$0xff] }
  0xd4   :  { %4101 = vmatpush1.bf16.msra.mxu0 %v6989_v41  ;;  %4165 = vmatpush1.bf16.msra.mxu1 %v6993_v57  ;;  %v903_v41 = vld [vmem:[#allocation8 + $0x5d8] sm:$0xff]  ;;  %v7013_v57 = vpack.c.bf16 %v898_v44, %v896_v0  ;;  %8564 = vst [vmem:[#allocation130_spill] sm:$0xff] %v7017_v5  ;;  %8566 = vst [vmem:[#allocation132_spill] sm:$0xff] %v7022_v1  ;;  %v970_v0 = vld [vmem:[#allocation8 + $0x7e8] sm:$0xff] }
  0xd5   :  { %4103 = vmatprep.subr.bf16.mxu0 %v6995_v7  ;;  %4167 = vmatprep.subr.bf16.mxu1 %v6998_v43  ;;  %v7019_v9 = vpack.c.bf16 %v903_v41, %v901_v49  ;;  %v967_v43 = vld [vmem:[#allocation8 + $0x7d0] sm:$0xff]  ;;  %v905_v7 = vld [vmem:[#allocation8 + $0x5e8] sm:$0xff]  ;;  %v972_v44 = vld [vmem:[#allocation8 + $0x7f8] sm:$0xff] }
  0xd6   :  { %8563 = vst [vmem:[#allocation129_spill] sm:$0xff] %v7013_v57  ;;  %v7029_v41 = vpack.c.bf16 %v967_v43, %v965_v30  ;;  %v7034_v63 = vpack.c.bf16 %v972_v44, %v970_v0  ;;  %v969_v62 = vld [vmem:[#allocation8 + $0x7e0] sm:$0xff]  ;;  %v8578_v30 = vld [vmem:[#allocation58_spill] sm:$0xff]  ;;  %v8580_v44 = vld [vmem:[#allocation60_spill] sm:$0xff] }
  0xd7   :  { %8565 = vst [vmem:[#allocation131_spill] sm:$0xff] %v7019_v9  ;;  %v8579_v0 = vld [vmem:[#allocation59_spill] sm:$0xff] }
  0xd8   :  { %4105 = vmatpush1.bf16.msra.mxu0 %v7001_v29  ;;  %4169 = vmatpush1.bf16.msra.mxu1 %v7005_v20  ;;  %v907_v29 = vld [vmem:[#allocation8 + $0x5f8] sm:$0xff]  ;;  %v7025_v20 = vpack.c.bf16 %v902_v61, %v900_v27  ;;  %8568 = vst [vmem:[#allocation134_spill] sm:$0xff] %v7029_v41  ;;  %8570 = vst [vmem:[#allocation136_spill] sm:$0xff] %v7034_v63  ;;  %v7037_v27 = vpack.c.bf16 %v906_v56, %v904_v6  ;;  %v8577_v61 = vld [vmem:[#allocation57_spill] sm:$0xff] }
  0xd9   :  { %4107 = vmatprep.subr.bf16.mxu0 %v7007_v21  ;;  %4171 = vmatprep.subr.bf16.mxu1 %v7010_v15  ;;  %v7031_v49 = vpack.c.bf16 %v907_v29, %v905_v7  ;;  %v971_v15 = vld [vmem:[#allocation8 + $0x7f0] sm:$0xff]  ;;  %v8574_v29 = vld [vmem:[#allocation54_spill] sm:$0xff]  ;;  %v8575_v7 = vld [vmem:[#allocation55_spill] sm:$0xff] }
  0xda   :  { %8567 = vst [vmem:[#allocation133_spill] sm:$0xff] %v7025_v20  ;;  %8571 = vst [vmem:[#allocation137_spill] sm:$0xff] %v7037_v27  ;;  %v7041_v43 = vpack.c.bf16 %v971_v15, %v969_v62  ;;  %v8576_v15 = vld [vmem:[#allocation56_spill] sm:$0xff]  ;;  %v8581_v6 = vld [vmem:[#allocation61_spill] sm:$0xff] }
  0xdb   :  { %8569 = vst [vmem:[#allocation135_spill] sm:$0xff] %v7031_v49  ;;  %v8582_v56 = vld [vmem:[#allocation62_spill] sm:$0xff]  ;;  %v8583_v62 = vld [vmem:[#allocation63_spill] sm:$0xff] }
  0xdc   :  { %4109 = vmatpush1.bf16.msra.mxu0 %v7013_v57  ;;  %4173 = vmatpush1.bf16.msra.mxu1 %v7017_v5  ;;  %8572 = vst [vmem:[#allocation138_spill] sm:$0xff] %v7041_v43 }
  0xdd   :  { %4111 = vmatprep.subr.bf16.mxu0 %v7019_v9  ;;  %4175 = vmatprep.subr.bf16.mxu1 %v7022_v1 }
  0xe0   :  { %4113 = vmatpush1.bf16.msra.mxu0 %v7025_v20  ;;  %4177 = vmatpush1.bf16.msra.mxu1 %v7029_v41 }
  0xe1   :  { %4115 = vmatprep.subr.bf16.mxu0 %v7031_v49  ;;  %4179 = vmatprep.subr.bf16.mxu1 %v7034_v63 }
  0xe4   :  { %4117 = vmatpush1.bf16.msra.mxu0 %v7037_v27  ;;  %4181 = vmatpush1.bf16.msra.mxu1 %v7041_v43 }
  0xe5   :  { %4183 = vmatprep.subr.bf16.mxu0 %v6550_v55  ;;  %4247 = vmatprep.subr.bf16.mxu1 %v6556_v58 }
  0xe7   :  { %1216 = vmatmul.mubr.f32.vlgmr.msra.gmra.mrb[16].mxu0 %v8514_v54  ;;  %1297 = vmatmul.mubr.f32.vlgmr.msra.gmra.mrb[16].mxu1 %v8514_v54  ;;  %v8573_v54 = vld [vmem:[#allocation53_spill] sm:$0xff] }
  0xe8   :  { %4185 = vmatpush1.bf16.msra.mxu0 %v6615_v10  ;;  %4249 = vmatpush1.bf16.msra.mxu1 %v6618_v11 }
  0xe9   :  { %4187 = vmatprep.subr.bf16.mxu0 %v6620_v12  ;;  %4251 = vmatprep.subr.bf16.mxu1 %v6622_v16 }
  0xec   :  { %4189 = vmatpush1.bf16.msra.mxu0 %v6629_v22  ;;  %4253 = vmatpush1.bf16.msra.mxu1 %v6633_v23 }
  0xed   :  { %4191 = vmatprep.subr.bf16.mxu0 %v6635_v24  ;;  %4255 = vmatprep.subr.bf16.mxu1 %v6638_v28 }
  0xf0   :  { %4193 = vmatpush1.bf16.msra.mxu0 %v6645_v34  ;;  %4257 = vmatpush1.bf16.msra.mxu1 %v6651_v35 }
  0xf1   :  { %4195 = vmatprep.subr.bf16.mxu0 %v6653_v36  ;;  %4259 = vmatprep.subr.bf16.mxu1 %v6656_v40 }
  0xf4   :  { %4197 = vmatpush1.bf16.msra.mxu0 %v6663_v46  ;;  %4261 = vmatpush1.bf16.msra.mxu1 %v6669_v47 }
  0xf5   :  { %4199 = vmatprep.subr.bf16.mxu0 %v6671_v48  ;;  %4263 = vmatprep.subr.bf16.mxu1 %v6674_v52 }
  0xf8   :  { %4201 = vmatpush1.bf16.msra.mxu0 %v6681_v2  ;;  %4265 = vmatpush1.bf16.msra.mxu1 %v6687_v3 }
  0xf9   :  { %4203 = vmatprep.subr.bf16.mxu0 %v6689_v4  ;;  %4267 = vmatprep.subr.bf16.mxu1 %v6692_v8 }
  0xfc   :  { %4205 = vmatpush1.bf16.msra.mxu0 %v6699_v17  ;;  %4269 = vmatpush1.bf16.msra.mxu1 %v6705_v18 }
  0xfd   :  { %4207 = vmatprep.subr.bf16.mxu0 %v6707_v19  ;;  %4271 = vmatprep.subr.bf16.mxu1 %v6710_v26 }
 0x100   :  { %4209 = vmatpush1.bf16.msra.mxu0 %v6717_v32  ;;  %4273 = vmatpush1.bf16.msra.mxu1 %v6723_v33 }
 0x101   :  { %4211 = vmatprep.subr.bf16.mxu0 %v6725_v37  ;;  %4275 = vmatprep.subr.bf16.mxu1 %v6728_v42 }
 0x104   :  { %4213 = vmatpush1.bf16.msra.mxu0 %v6735_v50  ;;  %4277 = vmatpush1.bf16.msra.mxu1 %v6741_v51 }
 0x105   :  { %4215 = vmatprep.subr.bf16.mxu0 %v6743_v53  ;;  %4279 = vmatprep.subr.bf16.mxu1 %v6746_v59 }
 0x108   :  { %4217 = vmatpush1.bf16.msra.mxu0 %v6753_v13  ;;  %4281 = vmatpush1.bf16.msra.mxu1 %v6759_v14 }
 0x109   :  { %4219 = vmatprep.subr.bf16.mxu0 %v6761_v60  ;;  %4283 = vmatprep.subr.bf16.mxu1 %v6764_v25 }
 0x10c   :  { %4221 = vmatpush1.bf16.msra.mxu0 %v6769_v31  ;;  %4285 = vmatpush1.bf16.msra.mxu1 %v6773_v38 }
 0x10d   :  { %4223 = vmatprep.subr.bf16.mxu0 %v6775_v39  ;;  %4287 = vmatprep.subr.bf16.mxu1 %v6778_v45  ;;  %v108_v39 = vlaneseq }
 0x110   :  { %4225 = vmatpush1.bf16.msra.mxu0 %v8573_v54  ;;  %4289 = vmatpush1.bf16.msra.mxu1 %v8574_v29  ;;  %v8584_v54 = vld [vmem:[#allocation64_spill] sm:$0xff]  ;;  %v8585_v29 = vld [vmem:[#allocation65_spill] sm:$0xff] }
 0x111   :  { %4227 = vmatprep.subr.bf16.mxu0 %v8575_v7  ;;  %4291 = vmatprep.subr.bf16.mxu1 %v8576_v15  ;;  %v8586_v7 = vld [vmem:[#allocation66_spill] sm:$0xff]  ;;  %v8587_v15 = vld [vmem:[#allocation67_spill] sm:$0xff] }
 0x114   :  { %4229 = vmatpush1.bf16.msra.mxu0 %v8577_v61  ;;  %4293 = vmatpush1.bf16.msra.mxu1 %v8578_v30  ;;  %v8588_v61 = vld [vmem:[#allocation68_spill] sm:$0xff]  ;;  %v8589_v30 = vld [vmem:[#allocation69_spill] sm:$0xff] }
 0x115   :  { %4231 = vmatprep.subr.bf16.mxu0 %v8579_v0  ;;  %4295 = vmatprep.subr.bf16.mxu1 %v8580_v44  ;;  %v8590_v0 = vld [vmem:[#allocation70_spill] sm:$0xff]  ;;  %v8591_v44 = vld [vmem:[#allocation71_spill] sm:$0xff] }
 0x118   :  { %4233 = vmatpush1.bf16.msra.mxu0 %v8581_v6  ;;  %4297 = vmatpush1.bf16.msra.mxu1 %v8582_v56  ;;  %v8592_v6 = vld [vmem:[#allocation72_spill] sm:$0xff]  ;;  %v8593_v56 = vld [vmem:[#allocation73_spill] sm:$0xff] }
 0x119   :  { %4235 = vmatprep.subr.bf16.mxu0 %v8583_v62  ;;  %4299 = vmatprep.subr.bf16.mxu1 %v8584_v54  ;;  %v8594_v62 = vld [vmem:[#allocation74_spill] sm:$0xff]  ;;  %v8595_v54 = vld [vmem:[#allocation75_spill] sm:$0xff] }
 0x11c   :  { %4237 = vmatpush1.bf16.msra.mxu0 %v8585_v29  ;;  %4301 = vmatpush1.bf16.msra.mxu1 %v8586_v7  ;;  %v8596_v29 = vld [vmem:[#allocation76_spill] sm:$0xff] }
 0x11d   :  { %4239 = vmatprep.subr.bf16.mxu0 %v8587_v15  ;;  %4303 = vmatprep.subr.bf16.mxu1 %v8588_v61 }
 0x120   :  { %4241 = vmatpush1.bf16.msra.mxu0 %v8589_v30  ;;  %4305 = vmatpush1.bf16.msra.mxu1 %v8590_v0  ;;  %v7114_v30 = vshrl.u32 %v108_v39, 7 }
 0x121   :  { %4243 = vmatprep.subr.bf16.mxu0 %v8591_v44  ;;  %4307 = vmatprep.subr.bf16.mxu1 %v8592_v6  ;;  %v106_v6 = vld [vmem:[%s8152_s3] sm:$0xff] }
 0x122   :  { %8597 = vst [vmem:[#allocation139_spill] sm:$0xff] %v7114_v30  ;;  %v8326_v0 = vsub.s32 0, %v7114_v30 }
 0x124   :  { %4245 = vmatpush1.bf16.msra.mxu0 %v8593_v56  ;;  %4309 = vmatpush1.bf16.msra.mxu1 %v8594_v62  ;;  %v118_v56 = vsub.s32 2, %v7114_v30  ;;  %v8329_v62 = vsub.s32 1, %v7114_v30 }
 0x125   :  { %4311 = vmatprep.subr.bf16.mxu0 %v8595_v54  ;;  %4375 = vmatprep.subr.bf16.mxu1 %v8596_v29  ;;  %v122_v54 = vsub.s32 3, %v7114_v30  ;;  %v7125_v29 = vrot.slane %v106_v6, %v8326_v0 }
 0x126   :  { %v7127_v44 = vrot.slane %v106_v6, %v118_v56  ;;  %v7131_v39 = vrot.slane %v106_v6, %v8329_v62 }
 0x127   :  { %8598 = vst [vmem:[#allocation140_spill] sm:$0xff] %v7125_v29  ;;  %v7133_v38 = vrot.slane %v106_v6, %v122_v54  ;;  %v126_v54 = vsub.s32 4, %v7114_v30 }
 0x128   :  { %8599 = vst [vmem:[#allocation141_spill] sm:$0xff] %v7127_v44  ;;  %8600 = vst [vmem:[#allocation142_spill] sm:$0xff] %v7131_v39 }
 0x129   :  { %8601 = vst [vmem:[#allocation143_spill] sm:$0xff] %v7133_v38 }
 0x17a   :  { %v1047_v7 = vpop.f32.mrb[0].mxu0  ;;  %v1132_v15 = vpop.f32.mrb[0].mxu1 }
 0x17b   :  { %v1049_v45 = vpop.f32.mrb[1].mxu0  ;;  %v1134_v61 = vpop.f32.mrb[1].mxu1  ;;  %v5974_v31 = vadd.f32 %v1047_v7, %v7125_v29  ;;  %v5990_v25 = vadd.f32 %v1132_v15, %v7127_v44  ;;  %v134_v7 = vsub.s32 6, %v7114_v30  ;;  %v130_v15 = vsub.s32 5, %v7114_v30 }
 0x17c   :  { %v5975_v60 = vadd.f32 %v1049_v45, %v7131_v39  ;;  %v5991_v14 = vadd.f32 %v1134_v61, %v7133_v38 }
 0x17d   :  { %v3837_v13 = vmul.f32 -1.442695, %v5974_v31  ;;  %v3839_v59 = vmul.f32 -1.442695, %v5990_v25  ;;  %v138_v31 = vsub.s32 7, %v7114_v30 }
 0x17e   :  { %v3838_v0 = vmul.f32 -1.442695, %v5975_v60  ;;  %v3840_v53 = vmul.f32 -1.442695, %v5991_v14  ;;  %v7143_v14 = vrot.slane %v106_v6, %v126_v54 }
 0x17f   :  { %6113 = vpow2.f32 %v3837_v13  ;;  %v7145_v13 = vrot.slane %v106_v6, %v134_v7  ;;  %v7149_v61 = vrot.slane %v106_v6, %v138_v31 }
 0x180   :  { %6115 = vpow2.f32 %v3839_v59 }
 0x181   :  { %6117 = vpow2.f32 %v3838_v0  ;;  %8602 = vst [vmem:[#allocation144_spill] sm:$0xff] %v7145_v13 }
 0x182   :  { %6119 = vpow2.f32 %v3840_v53  ;;  %v7147_v53 = vrot.slane %v106_v6, %v130_v15 }
 0x184   :  { %8603 = vst [vmem:[#allocation145_spill] sm:$0xff] %v7147_v53 }
 0x189   :  { %v6114_v56 = vpop.eup %6113 }
 0x18a   :  { %v6116_v62 = vpop.eup %6115  ;;  %v1060_v39 = vadd.f32 1.0, %v6114_v56 }
 0x18b   :  { %v6118_v51 = vpop.eup %6117  ;;  %v1145_v25 = vadd.f32 1.0, %v6116_v62 }
 0x18c   :  { %v6120_v45 = vpop.eup %6119  ;;  %v1061_v60 = vadd.f32 1.0, %v6118_v51  ;;  %6121 = vrcp.f32 %v1060_v39 }
 0x18d   :  { %v1146_v59 = vadd.f32 1.0, %v6120_v45  ;;  %6123 = vrcp.f32 %v1145_v25 }
 0x18e   :  { %6125 = vrcp.f32 %v1061_v60 }
 0x18f   :  { %6127 = vrcp.f32 %v1146_v59 }
 0x196   :  { %v6122_v39 = vpop.eup %6121 }
 0x197   :  { %v6124_v45 = vpop.eup %6123 }
 0x198   :  { %v6126_v31 = vpop.eup %6125  ;;  %v1226_v59 = vmul.f32 0.0, %v6124_v45 }
 0x199   :  { %v6128_v25 = vpop.eup %6127 }
 0x1ba   :  { %v1217_v0 = vpop.f32.mrb[16].mxu0  ;;  %v1298_v56 = vpop.f32.mrb[16].mxu1 }
 0x1bb   :  { %v6006_v38 = vadd.f32 %v1217_v0, %v7143_v14  ;;  %v1219_v44 = vpop.f32.mrb[17].mxu0  ;;  %v6022_v51 = vadd.f32 %v1298_v56, %v7145_v13  ;;  %v1300_v54 = vpop.f32.mrb[17].mxu1  ;;  %v1227_v56 = vmul.f32 0.0, %v6128_v25  ;;  %v8606_v25 = vld [vmem:[#allocation79_spill] sm:$0xff] }
 0x1bc   :  { %v6007_v62 = vadd.f32 %v1219_v44, %v7147_v53  ;;  %v6023_v7 = vadd.f32 %v1300_v54, %v7149_v61 }
 0x1bd   :  { %6129 = vtanh.f32 %v6006_v38  ;;  %v3841_v15 = vmul.f32 -1.442695, %v6022_v51 }
 0x1be   :  { %6131 = vtanh.f32 %v6007_v62  ;;  %v3842_v6 = vmul.f32 -1.442695, %v6023_v7 }
 0x1bf   :  { %6133 = vpow2.f32 %v3841_v15 }
 0x1c0   :  { %6135 = vpow2.f32 %v3842_v6 }
 0x1c7   :  { %v6130_v60 = vpop.eup %6129 }
 0x1c8   :  { %v6132_v0 = vpop.eup %6131  ;;  %v1228_v30 = vmul.f32 %v6130_v60, %v6122_v39  ;;  %v8607_v60 = vld [vmem:[#allocation80_spill] sm:$0xff] }
 0x1c9   :  { %v1229_v13 = vmul.f32 %v6132_v0, %v6126_v31  ;;  %v6134_v44 = vpop.eup %6133  ;;  %v8608_v0 = vld [vmem:[#allocation81_spill] sm:$0xff] }
 0x1ca   :  { %v7155_v53 = vadd.f32 %v1228_v30, %v1226_v59  ;;  %v6136_v38 = vpop.eup %6135  ;;  %v1311_v54 = vadd.f32 1.0, %v6134_v44  ;;  %v8604_v30 = vld [vmem:[#allocation77_spill] sm:$0xff]  ;;  %v8609_v59 = vld [vmem:[#allocation82_spill] sm:$0xff]  ;;  %v8611_v44 = vld [vmem:[#allocation84_spill] sm:$0xff] }
 0x1cb   :  { %v7157_v51 = vadd.f32 %v1229_v13, %v1227_v56  ;;  %v1312_v62 = vadd.f32 1.0, %v6136_v38  ;;  %v8605_v13 = vld [vmem:[#allocation78_spill] sm:$0xff]  ;;  %v8610_v56 = vld [vmem:[#allocation83_spill] sm:$0xff]  ;;  %v8612_v38 = vld [vmem:[#allocation85_spill] sm:$0xff] }
 0x1cc   :  { %6137 = vtanh.f32 %v7155_v53 }
 0x1cd   :  { %6139 = vrcp.f32 %v1311_v54  ;;  %v8613_v54 = vld [vmem:[#allocation86_spill] sm:$0xff] }
 0x1ce   :  { %6141 = vtanh.f32 %v7157_v51 }
 0x1cf   :  { %6143 = vrcp.f32 %v1312_v62  ;;  %v8614_v62 = vld [vmem:[#allocation87_spill] sm:$0xff] }
 0x1d6   :  { %v6138_v7 = vpop.eup %6137 }
 0x1d7   :  { %v6140_v15 = vpop.eup %6139 }
 0x1d8   :  { %v6142_v6 = vpop.eup %6141  ;;  %v7161_v31 = vmul.f32 %v6140_v15, %v6138_v7  ;;  %v8615_v7 = vld [vmem:[#allocation88_spill] sm:$0xff]  ;;  %v8616_v15 = vld [vmem:[#allocation89_spill] sm:$0xff] }
 0x1d9   :  { %v6144_v39 = vpop.eup %6143 }
 0x1da   :  { %v1320_v45 = vmul.f32 %v6144_v39, %v6142_v6  ;;  %v8617_v6 = vld [vmem:[#allocation90_spill] sm:$0xff]  ;;  %v8618_v39 = vld [vmem:[#allocation91_spill] sm:$0xff] }
 0x1dc   :  { %1394 = vmatprep.mubr.f32.mxu0 %v1320_v45  ;;  %1479 = vmatprep.mubr.f32.mxu1 %v1320_v45 }
 0x1dd   :  { %1395 = vmatmul.mubr.f32.vlgmr.msra.gmra.mrb[2].mxu0 %v7161_v31  ;;  %1480 = vmatmul.mubr.f32.vlgmr.msra.gmra.mrb[2].mxu1 %v7161_v31 }
 0x1de   :  { %4313 = vmatpush1.bf16.msra.mxu0 %v8604_v30  ;;  %4377 = vmatpush1.bf16.msra.mxu1 %v8605_v13 }
 0x1df   :  { %1564 = vmatprep.mubr.f32.mxu0 %v1320_v45  ;;  %1645 = vmatprep.mubr.f32.mxu1 %v1320_v45  ;;  %v8619_v45 = vld [vmem:[#allocation92_spill] sm:$0xff] }
 0x1e0   :  { %4315 = vmatprep.subr.bf16.mxu0 %v8606_v25  ;;  %4379 = vmatprep.subr.bf16.mxu1 %v8607_v60 }
 0x1e2   :  { %4317 = vmatpush1.bf16.msra.mxu0 %v8608_v0  ;;  %4381 = vmatpush1.bf16.msra.mxu1 %v8609_v59  ;;  %v8620_v59 = vld [vmem:[#allocation93_spill] sm:$0xff] }
 0x1e3   :  { %4319 = vmatprep.subr.bf16.mxu0 %v8610_v56  ;;  %4383 = vmatprep.subr.bf16.mxu1 %v8611_v44  ;;  %v8621_v56 = vld [vmem:[#allocation94_spill] sm:$0xff]  ;;  %v8622_v44 = vld [vmem:[#allocation95_spill] sm:$0xff] }
 0x1e6   :  { %4321 = vmatpush1.bf16.msra.mxu0 %v8612_v38  ;;  %4385 = vmatpush1.bf16.msra.mxu1 %v8613_v54  ;;  %v8623_v38 = vld [vmem:[#allocation96_spill] sm:$0xff]  ;;  %v8624_v54 = vld [vmem:[#allocation97_spill] sm:$0xff] }
 0x1e7   :  { %4323 = vmatprep.subr.bf16.mxu0 %v8614_v62  ;;  %4387 = vmatprep.subr.bf16.mxu1 %v8615_v7  ;;  %v8625_v62 = vld [vmem:[#allocation98_spill] sm:$0xff]  ;;  %v8626_v7 = vld [vmem:[#allocation99_spill] sm:$0xff] }
 0x1ea   :  { %4325 = vmatpush1.bf16.msra.mxu0 %v8616_v15  ;;  %4389 = vmatpush1.bf16.msra.mxu1 %v8617_v6  ;;  %v8627_v15 = vld [vmem:[#allocation100_spill] sm:$0xff]  ;;  %v8628_v6 = vld [vmem:[#allocation101_spill] sm:$0xff] }
 0x1eb   :  { %4327 = vmatprep.subr.bf16.mxu0 %v8618_v39  ;;  %4391 = vmatprep.subr.bf16.mxu1 %v8619_v45  ;;  %v8629_v39 = vld [vmem:[#allocation102_spill] sm:$0xff]  ;;  %v8630_v45 = vld [vmem:[#allocation103_spill] sm:$0xff] }
 0x1ee   :  { %4329 = vmatpush1.bf16.msra.mxu0 %v8620_v59  ;;  %4393 = vmatpush1.bf16.msra.mxu1 %v8621_v56  ;;  %v8631_v59 = vld [vmem:[#allocation104_spill] sm:$0xff]  ;;  %v8632_v56 = vld [vmem:[#allocation105_spill] sm:$0xff] }
 0x1ef   :  { %4331 = vmatprep.subr.bf16.mxu0 %v8622_v44  ;;  %4395 = vmatprep.subr.bf16.mxu1 %v8623_v38  ;;  %v8633_v44 = vld [vmem:[#allocation106_spill] sm:$0xff]  ;;  %v8634_v38 = vld [vmem:[#allocation107_spill] sm:$0xff] }
 0x1f2   :  { %4333 = vmatpush1.bf16.msra.mxu0 %v8624_v54  ;;  %4397 = vmatpush1.bf16.msra.mxu1 %v8625_v62  ;;  %v8635_v54 = vld [vmem:[#allocation108_spill] sm:$0xff]  ;;  %v8636_v62 = vld [vmem:[#allocation109_spill] sm:$0xff] }
 0x1f3   :  { %4335 = vmatprep.subr.bf16.mxu0 %v8626_v7  ;;  %4399 = vmatprep.subr.bf16.mxu1 %v8627_v15  ;;  %v8637_v7 = vld [vmem:[#allocation110_spill] sm:$0xff]  ;;  %v8638_v15 = vld [vmem:[#allocation111_spill] sm:$0xff] }
 0x1f6   :  { %4337 = vmatpush1.bf16.msra.mxu0 %v8628_v6  ;;  %4401 = vmatpush1.bf16.msra.mxu1 %v8629_v39  ;;  %v8639_v6 = vld [vmem:[#allocation112_spill] sm:$0xff]  ;;  %v8640_v39 = vld [vmem:[#allocation113_spill] sm:$0xff] }
 0x1f7   :  { %4339 = vmatprep.subr.bf16.mxu0 %v8630_v45  ;;  %4403 = vmatprep.subr.bf16.mxu1 %v8631_v59  ;;  %v8641_v45 = vld [vmem:[#allocation114_spill] sm:$0xff]  ;;  %v8642_v59 = vld [vmem:[#allocation115_spill] sm:$0xff] }
 0x1fa   :  { %4341 = vmatpush1.bf16.msra.mxu0 %v8632_v56  ;;  %4405 = vmatpush1.bf16.msra.mxu1 %v8633_v44  ;;  %v8643_v56 = vld [vmem:[#allocation116_spill] sm:$0xff]  ;;  %v8644_v44 = vld [vmem:[#allocation117_spill] sm:$0xff] }
 0x1fb   :  { %4343 = vmatprep.subr.bf16.mxu0 %v8634_v38  ;;  %4407 = vmatprep.subr.bf16.mxu1 %v8635_v54  ;;  %v8645_v38 = vld [vmem:[#allocation118_spill] sm:$0xff]  ;;  %v8646_v54 = vld [vmem:[#allocation119_spill] sm:$0xff] }
 0x1fe   :  { %4345 = vmatpush1.bf16.msra.mxu0 %v8636_v62  ;;  %4409 = vmatpush1.bf16.msra.mxu1 %v8637_v7  ;;  %v8647_v62 = vld [vmem:[#allocation120_spill] sm:$0xff]  ;;  %v8648_v7 = vld [vmem:[#allocation121_spill] sm:$0xff] }
 0x1ff   :  { %4347 = vmatprep.subr.bf16.mxu0 %v8638_v15  ;;  %4411 = vmatprep.subr.bf16.mxu1 %v8639_v6  ;;  %v8649_v15 = vld [vmem:[#allocation122_spill] sm:$0xff]  ;;  %v8650_v6 = vld [vmem:[#allocation123_spill] sm:$0xff] }
 0x202   :  { %4349 = vmatpush1.bf16.msra.mxu0 %v8640_v39  ;;  %4413 = vmatpush1.bf16.msra.mxu1 %v8641_v45  ;;  %v8651_v39 = vld [vmem:[#allocation124_spill] sm:$0xff]  ;;  %v8652_v45 = vld [vmem:[#allocation125_spill] sm:$0xff] }
 0x203   :  { %4351 = vmatprep.subr.bf16.mxu0 %v8642_v59  ;;  %4415 = vmatprep.subr.bf16.mxu1 %v8643_v56  ;;  %v8653_v59 = vld [vmem:[#allocation126_spill] sm:$0xff] }
 0x206   :  { %4353 = vmatpush1.bf16.msra.mxu0 %v8644_v44  ;;  %4417 = vmatpush1.bf16.msra.mxu1 %v8645_v38  ;;  %v8654_v44 = vld [vmem:[#allocation128_spill] sm:$0xff] }
 0x207   :  { %4355 = vmatprep.subr.bf16.mxu0 %v8646_v54  ;;  %4419 = vmatprep.subr.bf16.mxu1 %v8647_v62 }
 0x20a   :  { %4357 = vmatpush1.bf16.msra.mxu0 %v8648_v7  ;;  %4421 = vmatpush1.bf16.msra.mxu1 %v8649_v15 }
 0x20b   :  { %4359 = vmatprep.subr.bf16.mxu0 %v8650_v6  ;;  %4423 = vmatprep.subr.bf16.mxu1 %v8651_v39 }
 0x20e   :  { %4361 = vmatpush1.bf16.msra.mxu0 %v8652_v45  ;;  %4425 = vmatpush1.bf16.msra.mxu1 %v8653_v59 }
 0x20f   :  { %4363 = vmatprep.subr.bf16.mxu0 %v7007_v21  ;;  %4427 = vmatprep.subr.bf16.mxu1 %v8654_v44 }
 0x212   :  { %4365 = vmatpush1.bf16.msra.mxu0 %v7013_v57  ;;  %4429 = vmatpush1.bf16.msra.mxu1 %v7017_v5 }
 0x213   :  { %4367 = vmatprep.subr.bf16.mxu0 %v7019_v9  ;;  %4431 = vmatprep.subr.bf16.mxu1 %v7022_v1 }
 0x216   :  { %4369 = vmatpush1.bf16.msra.mxu0 %v7025_v20  ;;  %4433 = vmatpush1.bf16.msra.mxu1 %v7029_v41 }
 0x217   :  { %4371 = vmatprep.subr.bf16.mxu0 %v7031_v49  ;;  %4435 = vmatprep.subr.bf16.mxu1 %v7034_v63 }
 0x21a   :  { %4373 = vmatpush1.bf16.msra.mxu0 %v7037_v27  ;;  %4437 = vmatpush1.bf16.msra.mxu1 %v7041_v43 }
 0x21b   :  { %4439 = vmatprep.subr.bf16.mxu0 %v6550_v55  ;;  %4503 = vmatprep.subr.bf16.mxu1 %v6556_v58 }
 0x21d   :  { %1565 = vmatmul.mubr.f32.vlgmr.msra.gmra.mrb[18].mxu0 %v7161_v31  ;;  %1646 = vmatmul.mubr.f32.vlgmr.msra.gmra.mrb[18].mxu1 %v7161_v31  ;;  %v8655_v31 = vld [vmem:[#allocation42_spill] sm:$0xff] }
 0x21e   :  { %4441 = vmatpush1.bf16.msra.mxu0 %v6615_v10  ;;  %4505 = vmatpush1.bf16.msra.mxu1 %v6618_v11 }
 0x21f   :  { %4443 = vmatprep.subr.bf16.mxu0 %v6620_v12  ;;  %4507 = vmatprep.subr.bf16.mxu1 %v6622_v16 }
 0x222   :  { %4445 = vmatpush1.bf16.msra.mxu0 %v6629_v22  ;;  %4509 = vmatpush1.bf16.msra.mxu1 %v6633_v23 }
 0x223   :  { %4447 = vmatprep.subr.bf16.mxu0 %v6635_v24  ;;  %4511 = vmatprep.subr.bf16.mxu1 %v6638_v28 }
 0x226   :  { %4449 = vmatpush1.bf16.msra.mxu0 %v6645_v34  ;;  %4513 = vmatpush1.bf16.msra.mxu1 %v6651_v35 }
 0x227   :  { %4451 = vmatprep.subr.bf16.mxu0 %v6653_v36  ;;  %4515 = vmatprep.subr.bf16.mxu1 %v6656_v40 }
 0x22a   :  { %4453 = vmatpush1.bf16.msra.mxu0 %v6663_v46  ;;  %4517 = vmatpush1.bf16.msra.mxu1 %v6669_v47 }
 0x22b   :  { %4455 = vmatprep.subr.bf16.mxu0 %v6671_v48  ;;  %4519 = vmatprep.subr.bf16.mxu1 %v6674_v52  ;;  %v8692_v52 = vld [vmem:[#allocation143_spill] sm:$0xff] }
 0x22e   :  { %4457 = vmatpush1.bf16.msra.mxu0 %v6681_v2  ;;  %4521 = vmatpush1.bf16.msra.mxu1 %v6687_v3  ;;  %v8690_v3 = vld [vmem:[#allocation141_spill] sm:$0xff]  ;;  %v8691_v2 = vld [vmem:[#allocation142_spill] sm:$0xff] }
 0x22f   :  { %4459 = vmatprep.subr.bf16.mxu0 %v6689_v4  ;;  %4523 = vmatprep.subr.bf16.mxu1 %v6692_v8  ;;  %v8656_v8 = vld [vmem:[#allocation43_spill] sm:$0xff] }
 0x232   :  { %4461 = vmatpush1.bf16.msra.mxu0 %v6699_v17  ;;  %4525 = vmatpush1.bf16.msra.mxu1 %v6705_v18  ;;  %v8657_v17 = vld [vmem:[#allocation44_spill] sm:$0xff]  ;;  %v8658_v18 = vld [vmem:[#allocation45_spill] sm:$0xff] }
 0x233   :  { %4463 = vmatprep.subr.bf16.mxu0 %v6707_v19  ;;  %4527 = vmatprep.subr.bf16.mxu1 %v6710_v26  ;;  %v8659_v19 = vld [vmem:[#allocation46_spill] sm:$0xff]  ;;  %v8660_v26 = vld [vmem:[#allocation47_spill] sm:$0xff] }
 0x236   :  { %4465 = vmatpush1.bf16.msra.mxu0 %v6717_v32  ;;  %4529 = vmatpush1.bf16.msra.mxu1 %v6723_v33  ;;  %v8661_v32 = vld [vmem:[#allocation48_spill] sm:$0xff]  ;;  %v8662_v33 = vld [vmem:[#allocation49_spill] sm:$0xff] }
 0x237   :  { %4467 = vmatprep.subr.bf16.mxu0 %v6725_v37  ;;  %4531 = vmatprep.subr.bf16.mxu1 %v6728_v42  ;;  %v8663_v37 = vld [vmem:[#allocation50_spill] sm:$0xff]  ;;  %v8664_v42 = vld [vmem:[#allocation51_spill] sm:$0xff] }
 0x23a   :  { %4469 = vmatpush1.bf16.msra.mxu0 %v6735_v50  ;;  %4533 = vmatpush1.bf16.msra.mxu1 %v8655_v31  ;;  %v8665_v50 = vld [vmem:[#allocation52_spill] sm:$0xff]  ;;  %v8666_v31 = vld [vmem:[#allocation53_spill] sm:$0xff] }
 0x23b   :  { %4471 = vmatprep.subr.bf16.mxu0 %v8656_v8  ;;  %4535 = vmatprep.subr.bf16.mxu1 %v8657_v17  ;;  %v8667_v8 = vld [vmem:[#allocation54_spill] sm:$0xff]  ;;  %v8668_v17 = vld [vmem:[#allocation55_spill] sm:$0xff] }
 0x23e   :  { %4473 = vmatpush1.bf16.msra.mxu0 %v8658_v18  ;;  %4537 = vmatpush1.bf16.msra.mxu1 %v8659_v19  ;;  %v8669_v18 = vld [vmem:[#allocation56_spill] sm:$0xff]  ;;  %v8670_v19 = vld [vmem:[#allocation57_spill] sm:$0xff] }
 0x23f   :  { %4475 = vmatprep.subr.bf16.mxu0 %v8660_v26  ;;  %4539 = vmatprep.subr.bf16.mxu1 %v8661_v32  ;;  %v8671_v26 = vld [vmem:[#allocation58_spill] sm:$0xff]  ;;  %v8672_v32 = vld [vmem:[#allocation59_spill] sm:$0xff] }
 0x242   :  { %4477 = vmatpush1.bf16.msra.mxu0 %v8662_v33  ;;  %4541 = vmatpush1.bf16.msra.mxu1 %v8663_v37  ;;  %v8673_v33 = vld [vmem:[#allocation60_spill] sm:$0xff]  ;;  %v8674_v37 = vld [vmem:[#allocation61_spill] sm:$0xff] }
 0x243   :  { %4479 = vmatprep.subr.bf16.mxu0 %v8664_v42  ;;  %4543 = vmatprep.subr.bf16.mxu1 %v8665_v50  ;;  %v8675_v42 = vld [vmem:[#allocation62_spill] sm:$0xff]  ;;  %v8676_v50 = vld [vmem:[#allocation63_spill] sm:$0xff] }
 0x246   :  { %4481 = vmatpush1.bf16.msra.mxu0 %v8666_v31  ;;  %4545 = vmatpush1.bf16.msra.mxu1 %v8667_v8  ;;  %v8677_v31 = vld [vmem:[#allocation64_spill] sm:$0xff]  ;;  %v8678_v8 = vld [vmem:[#allocation65_spill] sm:$0xff] }
 0x247   :  { %4483 = vmatprep.subr.bf16.mxu0 %v8668_v17  ;;  %4547 = vmatprep.subr.bf16.mxu1 %v8669_v18  ;;  %v8679_v17 = vld [vmem:[#allocation66_spill] sm:$0xff]  ;;  %v8680_v18 = vld [vmem:[#allocation67_spill] sm:$0xff] }
 0x24a   :  { %4485 = vmatpush1.bf16.msra.mxu0 %v8670_v19  ;;  %4549 = vmatpush1.bf16.msra.mxu1 %v8671_v26  ;;  %v8681_v19 = vld [vmem:[#allocation68_spill] sm:$0xff]  ;;  %v8682_v26 = vld [vmem:[#allocation69_spill] sm:$0xff] }
 0x24b   :  { %4487 = vmatprep.subr.bf16.mxu0 %v8672_v32  ;;  %4551 = vmatprep.subr.bf16.mxu1 %v8673_v33  ;;  %v8683_v32 = vld [vmem:[#allocation70_spill] sm:$0xff]  ;;  %v8684_v33 = vld [vmem:[#allocation71_spill] sm:$0xff] }
 0x24e   :  { %4489 = vmatpush1.bf16.msra.mxu0 %v8674_v37  ;;  %4553 = vmatpush1.bf16.msra.mxu1 %v8675_v42  ;;  %v8685_v37 = vld [vmem:[#allocation72_spill] sm:$0xff]  ;;  %v8686_v42 = vld [vmem:[#allocation73_spill] sm:$0xff] }
 0x24f   :  { %4491 = vmatprep.subr.bf16.mxu0 %v8676_v50  ;;  %4555 = vmatprep.subr.bf16.mxu1 %v8677_v31  ;;  %v8687_v50 = vld [vmem:[#allocation74_spill] sm:$0xff]  ;;  %v8688_v31 = vld [vmem:[#allocation75_spill] sm:$0xff] }
 0x252   :  { %4493 = vmatpush1.bf16.msra.mxu0 %v8678_v8  ;;  %4557 = vmatpush1.bf16.msra.mxu1 %v8679_v17  ;;  %v8689_v8 = vld [vmem:[#allocation76_spill] sm:$0xff] }
 0x253   :  { %4495 = vmatprep.subr.bf16.mxu0 %v8680_v18  ;;  %4559 = vmatprep.subr.bf16.mxu1 %v8681_v19 }
 0x256   :  { %4497 = vmatpush1.bf16.msra.mxu0 %v8682_v26  ;;  %4561 = vmatpush1.bf16.msra.mxu1 %v8683_v32 }
 0x257   :  { %4499 = vmatprep.subr.bf16.mxu0 %v8684_v33  ;;  %4563 = vmatprep.subr.bf16.mxu1 %v8685_v37 }
 0x25a   :  { %4501 = vmatpush1.bf16.msra.mxu0 %v8686_v42  ;;  %4565 = vmatpush1.bf16.msra.mxu1 %v8687_v50 }
 0x25b   :  { %4567 = vmatprep.subr.bf16.mxu0 %v8688_v31  ;;  %4631 = vmatprep.subr.bf16.mxu1 %v8689_v8 }
 0x2b0   :  { %v1396_v17 = vpop.f32.mrb[2].mxu0  ;;  %v1481_v18 = vpop.f32.mrb[2].mxu1 }
 0x2b1   :  { %v1398_v4 = vpop.f32.mrb[3].mxu0  ;;  %v1483_v19 = vpop.f32.mrb[3].mxu1  ;;  %v5976_v26 = vadd.f32 %v1396_v17, %v7125_v29  ;;  %v5992_v32 = vadd.f32 %v1481_v18, %v8690_v3 }
 0x2b2   :  { %v5977_v33 = vadd.f32 %v1398_v4, %v8691_v2  ;;  %v5993_v37 = vadd.f32 %v1483_v19, %v8692_v52 }
 0x2b3   :  { %v3843_v48 = vmul.f32 -1.442695, %v5976_v26  ;;  %v3845_v42 = vmul.f32 -1.442695, %v5992_v32  ;;  %v8693_v32 = vld [vmem:[#allocation144_spill] sm:$0xff] }
 0x2b4   :  { %v3844_v47 = vmul.f32 -1.442695, %v5977_v33  ;;  %v3846_v50 = vmul.f32 -1.442695, %v5993_v37  ;;  %v8694_v37 = vld [vmem:[#allocation145_spill] sm:$0xff] }
 0x2b5   :  { %6145 = vpow2.f32 %v3843_v48 }
 0x2b6   :  { %6147 = vpow2.f32 %v3845_v42 }
 0x2b7   :  { %6149 = vpow2.f32 %v3844_v47 }
 0x2b8   :  { %6151 = vpow2.f32 %v3846_v50 }
 0x2bf   :  { %v6146_v8 = vpop.eup %6145 }
 0x2c0   :  { %v6148_v31 = vpop.eup %6147  ;;  %v1409_v36 = vadd.f32 1.0, %v6146_v8 }
 0x2c1   :  { %v6150_v46 = vpop.eup %6149  ;;  %v1494_v17 = vadd.f32 1.0, %v6148_v31 }
 0x2c2   :  { %v6152_v40 = vpop.eup %6151  ;;  %v1410_v29 = vadd.f32 1.0, %v6150_v46  ;;  %6153 = vrcp.f32 %v1409_v36 }
 0x2c3   :  { %v1495_v18 = vadd.f32 1.0, %v6152_v40  ;;  %6155 = vrcp.f32 %v1494_v17 }
 0x2c4   :  { %6157 = vrcp.f32 %v1410_v29 }
 0x2c5   :  { %6159 = vrcp.f32 %v1495_v18 }
 0x2cc   :  { %v6154_v36 = vpop.eup %6153 }
 0x2cd   :  { %v6156_v46 = vpop.eup %6155 }
 0x2ce   :  { %v6158_v29 = vpop.eup %6157 }
 0x2cf   :  { %v6160_v31 = vpop.eup %6159 }
 0x2f0   :  { %v1566_v4 = vpop.f32.mrb[18].mxu0  ;;  %v1647_v19 = vpop.f32.mrb[18].mxu1 }
 0x2f1   :  { %v6008_v26 = vadd.f32 %v1566_v4, %v7143_v14  ;;  %v6024_v48 = vadd.f32 %v1647_v19, %v8693_v32  ;;  %v1568_v33 = vpop.f32.mrb[19].mxu0  ;;  %v1649_v47 = vpop.f32.mrb[19].mxu1  ;;  %v1575_v19 = vmul.f32 %v6156_v46, %v7155_v53 }
 0x2f2   :  { %v6009_v42 = vadd.f32 %v1568_v33, %v8694_v37  ;;  %v6025_v50 = vadd.f32 %v1649_v47, %v7149_v61  ;;  %v1576_v33 = vmul.f32 %v6160_v31, %v7157_v51  ;;  %v8698_v31 = vld [vmem:[#allocation85_spill] sm:$0xff] }
 0x2f3   :  { %6161 = vtanh.f32 %v6008_v26  ;;  %v3847_v8 = vmul.f32 -1.442695, %v6024_v48 }
 0x2f4   :  { %6163 = vtanh.f32 %v6009_v42  ;;  %v3848_v40 = vmul.f32 -1.442695, %v6025_v50 }
 0x2f5   :  { %6165 = vpow2.f32 %v3847_v8 }
 0x2f6   :  { %6167 = vpow2.f32 %v3848_v40 }
 0x2fd   :  { %v6162_v17 = vpop.eup %6161 }
 0x2fe   :  { %v6164_v4 = vpop.eup %6163  ;;  %v1577_v32 = vmul.f32 %v6162_v17, %v6154_v36  ;;  %v8699_v17 = vld [vmem:[#allocation86_spill] sm:$0xff] }
 0x2ff   :  { %v6166_v18 = vpop.eup %6165  ;;  %v1578_v37 = vmul.f32 %v6164_v4, %v6158_v29  ;;  %v8697_v29 = vld [vmem:[#allocation84_spill] sm:$0xff]  ;;  %v8700_v4 = vld [vmem:[#allocation87_spill] sm:$0xff] }
 0x300   :  { %v6168_v47 = vpop.eup %6167  ;;  %v7305_v26 = vadd.f32 %v1577_v32, %v1575_v19  ;;  %v1660_v48 = vadd.f32 1.0, %v6166_v18  ;;  %v8695_v32 = vld [vmem:[#allocation82_spill] sm:$0xff]  ;;  %v8701_v19 = vld [vmem:[#allocation88_spill] sm:$0xff]  ;;  %v8702_v18 = vld [vmem:[#allocation89_spill] sm:$0xff] }
 0x301   :  { %v7307_v42 = vadd.f32 %v1578_v37, %v1576_v33  ;;  %v1661_v50 = vadd.f32 1.0, %v6168_v47  ;;  %v8696_v37 = vld [vmem:[#allocation83_spill] sm:$0xff]  ;;  %v8703_v33 = vld [vmem:[#allocation90_spill] sm:$0xff] }
 0x302   :  { %6169 = vtanh.f32 %v7305_v26  ;;  %v8704_v47 = vld [vmem:[#allocation91_spill] sm:$0xff] }
 0x303   :  { %6171 = vrcp.f32 %v1660_v48  ;;  %v8705_v48 = vld [vmem:[#allocation92_spill] sm:$0xff] }
 0x304   :  { %6173 = vtanh.f32 %v7307_v42 }
 0x305   :  { %6175 = vrcp.f32 %v1661_v50  ;;  %v8706_v50 = vld [vmem:[#allocation93_spill] sm:$0xff] }
 0x30c   :  { %v6170_v8 = vpop.eup %6169 }
 0x30d   :  { %v6172_v53 = vpop.eup %6171 }
 0x30e   :  { %v6174_v40 = vpop.eup %6173  ;;  %v7311_v51 = vmul.f32 %v6172_v53, %v6170_v8  ;;  %v8707_v8 = vld [vmem:[#allocation94_spill] sm:$0xff]  ;;  %v8708_v53 = vld [vmem:[#allocation95_spill] sm:$0xff] }
 0x30f   :  { %v6176_v36 = vpop.eup %6175 }
 0x310   :  { %v1669_v46 = vmul.f32 %v6176_v36, %v6174_v40  ;;  %v8709_v40 = vld [vmem:[#allocation96_spill] sm:$0xff]  ;;  %v8710_v36 = vld [vmem:[#allocation97_spill] sm:$0xff] }
 0x312   :  { %1743 = vmatprep.mubr.f32.mxu0 %v1669_v46  ;;  %1828 = vmatprep.mubr.f32.mxu1 %v1669_v46 }
 0x313   :  { %1744 = vmatmul.mubr.f32.vlgmr.msra.gmra.mrb[4].mxu0 %v7311_v51  ;;  %1829 = vmatmul.mubr.f32.vlgmr.msra.gmra.mrb[4].mxu1 %v7311_v51 }
 0x314   :  { %4569 = vmatpush1.bf16.msra.mxu0 %v8604_v30  ;;  %4633 = vmatpush1.bf16.msra.mxu1 %v8605_v13 }
 0x315   :  { %1913 = vmatprep.mubr.f32.mxu0 %v1669_v46  ;;  %1994 = vmatprep.mubr.f32.mxu1 %v1669_v46  ;;  %v8711_v46 = vld [vmem:[#allocation98_spill] sm:$0xff] }
 0x316   :  { %4571 = vmatprep.subr.bf16.mxu0 %v8606_v25  ;;  %4635 = vmatprep.subr.bf16.mxu1 %v8607_v60 }
 0x318   :  { %4573 = vmatpush1.bf16.msra.mxu0 %v8608_v0  ;;  %4637 = vmatpush1.bf16.msra.mxu1 %v8695_v32 }
 0x319   :  { %4575 = vmatprep.subr.bf16.mxu0 %v8696_v37  ;;  %4639 = vmatprep.subr.bf16.mxu1 %v8697_v29 }
 0x31c   :  { %4577 = vmatpush1.bf16.msra.mxu0 %v8698_v31  ;;  %4641 = vmatpush1.bf16.msra.mxu1 %v8699_v17 }
 0x31d   :  { %4579 = vmatprep.subr.bf16.mxu0 %v8700_v4  ;;  %4643 = vmatprep.subr.bf16.mxu1 %v8701_v19  ;;  %v8712_v19 = vld [vmem:[#allocation99_spill] sm:$0xff] }
 0x320   :  { %4581 = vmatpush1.bf16.msra.mxu0 %v8702_v18  ;;  %4645 = vmatpush1.bf16.msra.mxu1 %v8703_v33  ;;  %v8713_v18 = vld [vmem:[#allocation100_spill] sm:$0xff]  ;;  %v8714_v33 = vld [vmem:[#allocation101_spill] sm:$0xff] }
 0x321   :  { %4583 = vmatprep.subr.bf16.mxu0 %v8704_v47  ;;  %4647 = vmatprep.subr.bf16.mxu1 %v8705_v48  ;;  %v8715_v47 = vld [vmem:[#allocation102_spill] sm:$0xff]  ;;  %v8716_v48 = vld [vmem:[#allocation103_spill] sm:$0xff] }
 0x324   :  { %4585 = vmatpush1.bf16.msra.mxu0 %v8706_v50  ;;  %4649 = vmatpush1.bf16.msra.mxu1 %v8707_v8  ;;  %v8717_v50 = vld [vmem:[#allocation104_spill] sm:$0xff]  ;;  %v8718_v8 = vld [vmem:[#allocation105_spill] sm:$0xff] }
 0x325   :  { %4587 = vmatprep.subr.bf16.mxu0 %v8708_v53  ;;  %4651 = vmatprep.subr.bf16.mxu1 %v8709_v40  ;;  %v8719_v53 = vld [vmem:[#allocation106_spill] sm:$0xff]  ;;  %v8720_v40 = vld [vmem:[#allocation107_spill] sm:$0xff] }
 0x328   :  { %4589 = vmatpush1.bf16.msra.mxu0 %v8710_v36  ;;  %4653 = vmatpush1.bf16.msra.mxu1 %v8711_v46  ;;  %v8721_v36 = vld [vmem:[#allocation108_spill] sm:$0xff]  ;;  %v8722_v46 = vld [vmem:[#allocation109_spill] sm:$0xff] }
 0x329   :  { %4591 = vmatprep.subr.bf16.mxu0 %v8712_v19  ;;  %4655 = vmatprep.subr.bf16.mxu1 %v8713_v18  ;;  %v8723_v19 = vld [vmem:[#allocation110_spill] sm:$0xff]  ;;  %v8724_v18 = vld [vmem:[#allocation111_spill] sm:$0xff] }
 0x32c   :  { %4593 = vmatpush1.bf16.msra.mxu0 %v8714_v33  ;;  %4657 = vmatpush1.bf16.msra.mxu1 %v8715_v47  ;;  %v8725_v33 = vld [vmem:[#allocation112_spill] sm:$0xff]  ;;  %v8726_v47 = vld [vmem:[#allocation113_spill] sm:$0xff] }
 0x32d   :  { %4595 = vmatprep.subr.bf16.mxu0 %v8716_v48  ;;  %4659 = vmatprep.subr.bf16.mxu1 %v8717_v50  ;;  %v8727_v48 = vld [vmem:[#allocation114_spill] sm:$0xff]  ;;  %v8728_v50 = vld [vmem:[#allocation115_spill] sm:$0xff] }
 0x330   :  { %4597 = vmatpush1.bf16.msra.mxu0 %v8718_v8  ;;  %4661 = vmatpush1.bf16.msra.mxu1 %v8719_v53  ;;  %v8729_v53 = vld [vmem:[#allocation117_spill] sm:$0xff] }
 0x331   :  { %4599 = vmatprep.subr.bf16.mxu0 %v8720_v40  ;;  %4663 = vmatprep.subr.bf16.mxu1 %v8721_v36 }
 0x334   :  { %4601 = vmatpush1.bf16.msra.mxu0 %v8722_v46  ;;  %4665 = vmatpush1.bf16.msra.mxu1 %v8723_v19 }
 0x335   :  { %4603 = vmatprep.subr.bf16.mxu0 %v8724_v18  ;;  %4667 = vmatprep.subr.bf16.mxu1 %v8725_v33 }
 0x338   :  { %4605 = vmatpush1.bf16.msra.mxu0 %v8726_v47  ;;  %4669 = vmatpush1.bf16.msra.mxu1 %v8727_v48 }
 0x339   :  { %4607 = vmatprep.subr.bf16.mxu0 %v8728_v50  ;;  %4671 = vmatprep.subr.bf16.mxu1 %v8643_v56 }
 0x33c   :  { %4609 = vmatpush1.bf16.msra.mxu0 %v8729_v53  ;;  %4673 = vmatpush1.bf16.msra.mxu1 %v8645_v38 }
 0x33d   :  { %4611 = vmatprep.subr.bf16.mxu0 %v8646_v54  ;;  %4675 = vmatprep.subr.bf16.mxu1 %v8647_v62 }
 0x340   :  { %4613 = vmatpush1.bf16.msra.mxu0 %v8648_v7  ;;  %4677 = vmatpush1.bf16.msra.mxu1 %v8649_v15 }
 0x341   :  { %4615 = vmatprep.subr.bf16.mxu0 %v8650_v6  ;;  %4679 = vmatprep.subr.bf16.mxu1 %v8651_v39 }
 0x344   :  { %4617 = vmatpush1.bf16.msra.mxu0 %v8652_v45  ;;  %4681 = vmatpush1.bf16.msra.mxu1 %v8653_v59 }
 0x345   :  { %4619 = vmatprep.subr.bf16.mxu0 %v7007_v21  ;;  %4683 = vmatprep.subr.bf16.mxu1 %v8654_v44 }
 0x348   :  { %4621 = vmatpush1.bf16.msra.mxu0 %v7013_v57  ;;  %4685 = vmatpush1.bf16.msra.mxu1 %v7017_v5 }
 0x349   :  { %4623 = vmatprep.subr.bf16.mxu0 %v7019_v9  ;;  %4687 = vmatprep.subr.bf16.mxu1 %v7022_v1 }
 0x34c   :  { %4625 = vmatpush1.bf16.msra.mxu0 %v7025_v20  ;;  %4689 = vmatpush1.bf16.msra.mxu1 %v7029_v41 }
 0x34d   :  { %4627 = vmatprep.subr.bf16.mxu0 %v7031_v49  ;;  %4691 = vmatprep.subr.bf16.mxu1 %v7034_v63 }
 0x350   :  { %4629 = vmatpush1.bf16.msra.mxu0 %v7037_v27  ;;  %4693 = vmatpush1.bf16.msra.mxu1 %v7041_v43 }
 0x351   :  { %4695 = vmatprep.subr.bf16.mxu0 %v6550_v55  ;;  %4759 = vmatprep.subr.bf16.mxu1 %v6556_v58  ;;  %v8784_v55 = vld [vmem:[#allocation140_spill] sm:$0xff] }
 0x353   :  { %1914 = vmatmul.mubr.f32.vlgmr.msra.gmra.mrb[20].mxu0 %v7311_v51  ;;  %1995 = vmatmul.mubr.f32.vlgmr.msra.gmra.mrb[20].mxu1 %v7311_v51  ;;  %v8730_v51 = vld [vmem:[#allocation23_spill] sm:$0xff] }
 0x354   :  { %4697 = vmatpush1.bf16.msra.mxu0 %v6615_v10  ;;  %4761 = vmatpush1.bf16.msra.mxu1 %v6618_v11  ;;  %v8731_v10 = vld [vmem:[#allocation24_spill] sm:$0xff]  ;;  %v8732_v11 = vld [vmem:[#allocation25_spill] sm:$0xff] }
 0x355   :  { %4699 = vmatprep.subr.bf16.mxu0 %v6620_v12  ;;  %4763 = vmatprep.subr.bf16.mxu1 %v6622_v16  ;;  %v8733_v12 = vld [vmem:[#allocation26_spill] sm:$0xff]  ;;  %v8734_v16 = vld [vmem:[#allocation27_spill] sm:$0xff] }
 0x358   :  { %4701 = vmatpush1.bf16.msra.mxu0 %v6629_v22  ;;  %4765 = vmatpush1.bf16.msra.mxu1 %v6633_v23  ;;  %v8735_v22 = vld [vmem:[#allocation28_spill] sm:$0xff]  ;;  %v8736_v23 = vld [vmem:[#allocation29_spill] sm:$0xff] }
 0x359   :  { %4703 = vmatprep.subr.bf16.mxu0 %v6635_v24  ;;  %4767 = vmatprep.subr.bf16.mxu1 %v6638_v28  ;;  %v8737_v24 = vld [vmem:[#allocation30_spill] sm:$0xff]  ;;  %v8738_v28 = vld [vmem:[#allocation31_spill] sm:$0xff] }
 0x35c   :  { %4705 = vmatpush1.bf16.msra.mxu0 %v6645_v34  ;;  %4769 = vmatpush1.bf16.msra.mxu1 %v6651_v35  ;;  %v8739_v34 = vld [vmem:[#allocation32_spill] sm:$0xff]  ;;  %v8740_v35 = vld [vmem:[#allocation33_spill] sm:$0xff] }
 0x35d   :  { %4707 = vmatprep.subr.bf16.mxu0 %v8730_v51  ;;  %4771 = vmatprep.subr.bf16.mxu1 %v8731_v10  ;;  %v8741_v51 = vld [vmem:[#allocation34_spill] sm:$0xff]  ;;  %v8742_v10 = vld [vmem:[#allocation35_spill] sm:$0xff] }
 0x360   :  { %4709 = vmatpush1.bf16.msra.mxu0 %v8732_v11  ;;  %4773 = vmatpush1.bf16.msra.mxu1 %v8733_v12  ;;  %v8743_v11 = vld [vmem:[#allocation36_spill] sm:$0xff]  ;;  %v8744_v12 = vld [vmem:[#allocation37_spill] sm:$0xff] }
 0x361   :  { %4711 = vmatprep.subr.bf16.mxu0 %v8734_v16  ;;  %4775 = vmatprep.subr.bf16.mxu1 %v8735_v22  ;;  %v8745_v16 = vld [vmem:[#allocation38_spill] sm:$0xff]  ;;  %v8746_v22 = vld [vmem:[#allocation39_spill] sm:$0xff] }
 0x364   :  { %4713 = vmatpush1.bf16.msra.mxu0 %v8736_v23  ;;  %4777 = vmatpush1.bf16.msra.mxu1 %v8737_v24  ;;  %v8747_v23 = vld [vmem:[#allocation40_spill] sm:$0xff]  ;;  %v8748_v24 = vld [vmem:[#allocation41_spill] sm:$0xff] }
 0x365   :  { %4715 = vmatprep.subr.bf16.mxu0 %v8738_v28  ;;  %4779 = vmatprep.subr.bf16.mxu1 %v8739_v34  ;;  %v8749_v28 = vld [vmem:[#allocation42_spill] sm:$0xff]  ;;  %v8750_v34 = vld [vmem:[#allocation43_spill] sm:$0xff] }
 0x368   :  { %4717 = vmatpush1.bf16.msra.mxu0 %v8740_v35  ;;  %4781 = vmatpush1.bf16.msra.mxu1 %v8741_v51  ;;  %v8751_v35 = vld [vmem:[#allocation44_spill] sm:$0xff]  ;;  %v8752_v51 = vld [vmem:[#allocation45_spill] sm:$0xff] }
 0x369   :  { %4719 = vmatprep.subr.bf16.mxu0 %v8742_v10  ;;  %4783 = vmatprep.subr.bf16.mxu1 %v8743_v11  ;;  %v8753_v10 = vld [vmem:[#allocation46_spill] sm:$0xff]  ;;  %v8754_v11 = vld [vmem:[#allocation47_spill] sm:$0xff] }
 0x36c   :  { %4721 = vmatpush1.bf16.msra.mxu0 %v8744_v12  ;;  %4785 = vmatpush1.bf16.msra.mxu1 %v8745_v16  ;;  %v8755_v12 = vld [vmem:[#allocation48_spill] sm:$0xff]  ;;  %v8756_v16 = vld [vmem:[#allocation49_spill] sm:$0xff] }
 0x36d   :  { %4723 = vmatprep.subr.bf16.mxu0 %v8746_v22  ;;  %4787 = vmatprep.subr.bf16.mxu1 %v8747_v23  ;;  %v8757_v22 = vld [vmem:[#allocation50_spill] sm:$0xff]  ;;  %v8758_v23 = vld [vmem:[#allocation51_spill] sm:$0xff] }
 0x370   :  { %4725 = vmatpush1.bf16.msra.mxu0 %v8748_v24  ;;  %4789 = vmatpush1.bf16.msra.mxu1 %v8749_v28  ;;  %v8759_v24 = vld [vmem:[#allocation52_spill] sm:$0xff]  ;;  %v8760_v28 = vld [vmem:[#allocation53_spill] sm:$0xff] }
 0x371   :  { %4727 = vmatprep.subr.bf16.mxu0 %v8750_v34  ;;  %4791 = vmatprep.subr.bf16.mxu1 %v8751_v35  ;;  %v8761_v34 = vld [vmem:[#allocation54_spill] sm:$0xff]  ;;  %v8762_v35 = vld [vmem:[#allocation55_spill] sm:$0xff] }
 0x374   :  { %4729 = vmatpush1.bf16.msra.mxu0 %v8752_v51  ;;  %4793 = vmatpush1.bf16.msra.mxu1 %v8753_v10  ;;  %v8763_v51 = vld [vmem:[#allocation56_spill] sm:$0xff]  ;;  %v8764_v10 = vld [vmem:[#allocation57_spill] sm:$0xff] }
 0x375   :  { %4731 = vmatprep.subr.bf16.mxu0 %v8754_v11  ;;  %4795 = vmatprep.subr.bf16.mxu1 %v8755_v12  ;;  %v8765_v11 = vld [vmem:[#allocation58_spill] sm:$0xff]  ;;  %v8766_v12 = vld [vmem:[#allocation59_spill] sm:$0xff] }
 0x378   :  { %4733 = vmatpush1.bf16.msra.mxu0 %v8756_v16  ;;  %4797 = vmatpush1.bf16.msra.mxu1 %v8757_v22  ;;  %v8767_v16 = vld [vmem:[#allocation60_spill] sm:$0xff]  ;;  %v8768_v22 = vld [vmem:[#allocation61_spill] sm:$0xff] }
 0x379   :  { %4735 = vmatprep.subr.bf16.mxu0 %v8758_v23  ;;  %4799 = vmatprep.subr.bf16.mxu1 %v8759_v24  ;;  %v8769_v23 = vld [vmem:[#allocation62_spill] sm:$0xff]  ;;  %v8770_v24 = vld [vmem:[#allocation63_spill] sm:$0xff] }
 0x37c   :  { %4737 = vmatpush1.bf16.msra.mxu0 %v8760_v28  ;;  %4801 = vmatpush1.bf16.msra.mxu1 %v8761_v34  ;;  %v8771_v28 = vld [vmem:[#allocation64_spill] sm:$0xff]  ;;  %v8772_v34 = vld [vmem:[#allocation65_spill] sm:$0xff] }
 0x37d   :  { %4739 = vmatprep.subr.bf16.mxu0 %v8762_v35  ;;  %4803 = vmatprep.subr.bf16.mxu1 %v8763_v51  ;;  %v8773_v35 = vld [vmem:[#allocation66_spill] sm:$0xff]  ;;  %v8774_v51 = vld [vmem:[#allocation67_spill] sm:$0xff] }
 0x380   :  { %4741 = vmatpush1.bf16.msra.mxu0 %v8764_v10  ;;  %4805 = vmatpush1.bf16.msra.mxu1 %v8765_v11  ;;  %v8775_v10 = vld [vmem:[#allocation68_spill] sm:$0xff]  ;;  %v8776_v11 = vld [vmem:[#allocation69_spill] sm:$0xff] }
 0x381   :  { %4743 = vmatprep.subr.bf16.mxu0 %v8766_v12  ;;  %4807 = vmatprep.subr.bf16.mxu1 %v8767_v16  ;;  %v8777_v12 = vld [vmem:[#allocation70_spill] sm:$0xff]  ;;  %v8778_v16 = vld [vmem:[#allocation71_spill] sm:$0xff] }
 0x384   :  { %4745 = vmatpush1.bf16.msra.mxu0 %v8768_v22  ;;  %4809 = vmatpush1.bf16.msra.mxu1 %v8769_v23  ;;  %v8779_v22 = vld [vmem:[#allocation72_spill] sm:$0xff]  ;;  %v8780_v23 = vld [vmem:[#allocation73_spill] sm:$0xff] }
 0x385   :  { %4747 = vmatprep.subr.bf16.mxu0 %v8770_v24  ;;  %4811 = vmatprep.subr.bf16.mxu1 %v8771_v28  ;;  %v8781_v24 = vld [vmem:[#allocation74_spill] sm:$0xff]  ;;  %v8782_v28 = vld [vmem:[#allocation75_spill] sm:$0xff] }
 0x388   :  { %4749 = vmatpush1.bf16.msra.mxu0 %v8772_v34  ;;  %4813 = vmatpush1.bf16.msra.mxu1 %v8773_v35  ;;  %v8783_v34 = vld [vmem:[#allocation76_spill] sm:$0xff] }
 0x389   :  { %4751 = vmatprep.subr.bf16.mxu0 %v8774_v51  ;;  %4815 = vmatprep.subr.bf16.mxu1 %v8775_v10 }
 0x38c   :  { %4753 = vmatpush1.bf16.msra.mxu0 %v8776_v11  ;;  %4817 = vmatpush1.bf16.msra.mxu1 %v8777_v12 }
 0x38d   :  { %4755 = vmatprep.subr.bf16.mxu0 %v8778_v16  ;;  %4819 = vmatprep.subr.bf16.mxu1 %v8779_v22 }
 0x390   :  { %4757 = vmatpush1.bf16.msra.mxu0 %v8780_v23  ;;  %4821 = vmatpush1.bf16.msra.mxu1 %v8781_v24 }
 0x391   :  { %4823 = vmatprep.subr.bf16.mxu0 %v8782_v28  ;;  %4887 = vmatprep.subr.bf16.mxu1 %v8783_v34 }
 0x3e6   :  { %v1745_v35 = vpop.f32.mrb[4].mxu0  ;;  %v1830_v51 = vpop.f32.mrb[4].mxu1 }
 0x3e7   :  { %v1747_v58 = vpop.f32.mrb[5].mxu0  ;;  %v1832_v10 = vpop.f32.mrb[5].mxu1  ;;  %v5978_v11 = vadd.f32 %v1745_v35, %v8784_v55  ;;  %v5994_v12 = vadd.f32 %v1830_v51, %v8690_v3 }
 0x3e8   :  { %v5979_v16 = vadd.f32 %v1747_v58, %v8691_v2  ;;  %v5995_v22 = vadd.f32 %v1832_v10, %v8692_v52 }
 0x3e9   :  { %v3849_v43 = vmul.f32 -1.442695, %v5978_v11  ;;  %v3851_v23 = vmul.f32 -1.442695, %v5994_v12  ;;  %v8785_v12 = vld [vmem:[#allocation144_spill] sm:$0xff] }
 0x3ea   :  { %v3850_v27 = vmul.f32 -1.442695, %v5979_v16  ;;  %v3852_v24 = vmul.f32 -1.442695, %v5995_v22 }
 0x3eb   :  { %6177 = vpow2.f32 %v3849_v43 }
 0x3ec   :  { %6179 = vpow2.f32 %v3851_v23 }
 0x3ed   :  { %6181 = vpow2.f32 %v3850_v27 }
 0x3ee   :  { %6183 = vpow2.f32 %v3852_v24  ;;  %v8786_v24 = vld [vmem:[#allocation145_spill] sm:$0xff] }
 0x3f5   :  { %v6178_v34 = vpop.eup %6177 }
 0x3f6   :  { %v6180_v28 = vpop.eup %6179  ;;  %v1758_v41 = vadd.f32 1.0, %v6178_v34 }
 0x3f7   :  { %v6182_v63 = vpop.eup %6181  ;;  %v1843_v35 = vadd.f32 1.0, %v6180_v28 }
 0x3f8   :  { %v6184_v49 = vpop.eup %6183  ;;  %v1759_v55 = vadd.f32 1.0, %v6182_v63  ;;  %6185 = vrcp.f32 %v1758_v41 }
 0x3f9   :  { %v1844_v51 = vadd.f32 1.0, %v6184_v49  ;;  %6187 = vrcp.f32 %v1843_v35 }
 0x3fa   :  { %6189 = vrcp.f32 %v1759_v55 }
 0x3fb   :  { %6191 = vrcp.f32 %v1844_v51 }
 0x402   :  { %v6186_v41 = vpop.eup %6185 }
 0x403   :  { %v6188_v49 = vpop.eup %6187 }
 0x404   :  { %v6190_v55 = vpop.eup %6189 }
 0x405   :  { %v6192_v63 = vpop.eup %6191 }
 0x426   :  { %v1915_v58 = vpop.f32.mrb[20].mxu0  ;;  %v1996_v10 = vpop.f32.mrb[20].mxu1 }
 0x427   :  { %v6010_v11 = vadd.f32 %v1915_v58, %v7143_v14  ;;  %v6026_v16 = vadd.f32 %v1996_v10, %v8785_v12  ;;  %v1917_v22 = vpop.f32.mrb[21].mxu0  ;;  %v1998_v23 = vpop.f32.mrb[21].mxu1  ;;  %v1924_v10 = vmul.f32 %v6188_v49, %v7305_v26 }
 0x428   :  { %v6011_v27 = vadd.f32 %v1917_v22, %v8786_v24  ;;  %v6027_v43 = vadd.f32 %v1998_v23, %v7149_v61  ;;  %v1925_v22 = vmul.f32 %v6192_v63, %v7307_v42  ;;  %v8790_v63 = vld [vmem:[#allocation91_spill] sm:$0xff] }
 0x429   :  { %6193 = vtanh.f32 %v6010_v11  ;;  %v3853_v28 = vmul.f32 -1.442695, %v6026_v16 }
 0x42a   :  { %6195 = vtanh.f32 %v6011_v27  ;;  %v3854_v34 = vmul.f32 -1.442695, %v6027_v43 }
 0x42b   :  { %6197 = vpow2.f32 %v3853_v28 }
 0x42c   :  { %6199 = vpow2.f32 %v3854_v34 }
 0x433   :  { %v6194_v35 = vpop.eup %6193 }
 0x434   :  { %v6196_v58 = vpop.eup %6195  ;;  %v1926_v12 = vmul.f32 %v6194_v35, %v6186_v41  ;;  %v8791_v35 = vld [vmem:[#allocation92_spill] sm:$0xff] }
 0x435   :  { %v6198_v51 = vpop.eup %6197  ;;  %v1927_v24 = vmul.f32 %v6196_v58, %v6190_v55  ;;  %v8789_v55 = vld [vmem:[#allocation90_spill] sm:$0xff]  ;;  %v8792_v58 = vld [vmem:[#allocation93_spill] sm:$0xff] }
 0x436   :  { %v6200_v23 = vpop.eup %6199  ;;  %v7455_v11 = vadd.f32 %v1926_v12, %v1924_v10  ;;  %v2009_v16 = vadd.f32 1.0, %v6198_v51  ;;  %v8787_v12 = vld [vmem:[#allocation88_spill] sm:$0xff]  ;;  %v8793_v10 = vld [vmem:[#allocation94_spill] sm:$0xff]  ;;  %v8794_v51 = vld [vmem:[#allocation95_spill] sm:$0xff] }
 0x437   :  { %v7457_v27 = vadd.f32 %v1927_v24, %v1925_v22  ;;  %v2010_v43 = vadd.f32 1.0, %v6200_v23  ;;  %v8788_v24 = vld [vmem:[#allocation89_spill] sm:$0xff]  ;;  %v8795_v22 = vld [vmem:[#allocation96_spill] sm:$0xff] }
 0x438   :  { %6201 = vtanh.f32 %v7455_v11  ;;  %v8796_v23 = vld [vmem:[#allocation97_spill] sm:$0xff] }
 0x439   :  { %6203 = vrcp.f32 %v2009_v16  ;;  %v8797_v16 = vld [vmem:[#allocation98_spill] sm:$0xff] }
 0x43a   :  { %6205 = vtanh.f32 %v7457_v27 }
 0x43b   :  { %6207 = vrcp.f32 %v2010_v43  ;;  %v8798_v43 = vld [vmem:[#allocation99_spill] sm:$0xff] }
 0x442   :  { %v6202_v28 = vpop.eup %6201 }
 0x443   :  { %v6204_v26 = vpop.eup %6203 }
 0x444   :  { %v6206_v34 = vpop.eup %6205  ;;  %v7461_v42 = vmul.f32 %v6204_v26, %v6202_v28  ;;  %v8799_v28 = vld [vmem:[#allocation100_spill] sm:$0xff]  ;;  %v8800_v26 = vld [vmem:[#allocation101_spill] sm:$0xff] }
 0x445   :  { %v6208_v41 = vpop.eup %6207 }
 0x446   :  { %v2018_v49 = vmul.f32 %v6208_v41, %v6206_v34  ;;  %v8801_v34 = vld [vmem:[#allocation102_spill] sm:$0xff]  ;;  %v8802_v41 = vld [vmem:[#allocation103_spill] sm:$0xff] }
 0x448   :  { %2092 = vmatprep.mubr.f32.mxu0 %v2018_v49  ;;  %2177 = vmatprep.mubr.f32.mxu1 %v2018_v49 }
 0x449   :  { %2093 = vmatmul.mubr.f32.vlgmr.msra.gmra.mrb[6].mxu0 %v7461_v42  ;;  %2178 = vmatmul.mubr.f32.vlgmr.msra.gmra.mrb[6].mxu1 %v7461_v42 }
 0x44a   :  { %4825 = vmatpush1.bf16.msra.mxu0 %v8604_v30  ;;  %4889 = vmatpush1.bf16.msra.mxu1 %v8605_v13 }
 0x44b   :  { %2262 = vmatprep.mubr.f32.mxu0 %v2018_v49  ;;  %2343 = vmatprep.mubr.f32.mxu1 %v2018_v49  ;;  %v8803_v49 = vld [vmem:[#allocation104_spill] sm:$0xff] }
 0x44c   :  { %4827 = vmatprep.subr.bf16.mxu0 %v8606_v25  ;;  %4891 = vmatprep.subr.bf16.mxu1 %v8607_v60 }
 0x44e   :  { %4829 = vmatpush1.bf16.msra.mxu0 %v8608_v0  ;;  %4893 = vmatpush1.bf16.msra.mxu1 %v8695_v32 }
 0x44f   :  { %4831 = vmatprep.subr.bf16.mxu0 %v8696_v37  ;;  %4895 = vmatprep.subr.bf16.mxu1 %v8697_v29 }
 0x452   :  { %4833 = vmatpush1.bf16.msra.mxu0 %v8698_v31  ;;  %4897 = vmatpush1.bf16.msra.mxu1 %v8699_v17 }
 0x453   :  { %4835 = vmatprep.subr.bf16.mxu0 %v8700_v4  ;;  %4899 = vmatprep.subr.bf16.mxu1 %v8787_v12 }
 0x456   :  { %4837 = vmatpush1.bf16.msra.mxu0 %v8788_v24  ;;  %4901 = vmatpush1.bf16.msra.mxu1 %v8789_v55 }
 0x457   :  { %4839 = vmatprep.subr.bf16.mxu0 %v8790_v63  ;;  %4903 = vmatprep.subr.bf16.mxu1 %v8791_v35 }
 0x45a   :  { %4841 = vmatpush1.bf16.msra.mxu0 %v8792_v58  ;;  %4905 = vmatpush1.bf16.msra.mxu1 %v8793_v10 }
 0x45b   :  { %4843 = vmatprep.subr.bf16.mxu0 %v8794_v51  ;;  %4907 = vmatprep.subr.bf16.mxu1 %v8795_v22  ;;  %v8804_v51 = vld [vmem:[#allocation106_spill] sm:$0xff] }
 0x45e   :  { %4845 = vmatpush1.bf16.msra.mxu0 %v8796_v23  ;;  %4909 = vmatpush1.bf16.msra.mxu1 %v8797_v16 }
 0x45f   :  { %4847 = vmatprep.subr.bf16.mxu0 %v8798_v43  ;;  %4911 = vmatprep.subr.bf16.mxu1 %v8799_v28 }
 0x462   :  { %4849 = vmatpush1.bf16.msra.mxu0 %v8800_v26  ;;  %4913 = vmatpush1.bf16.msra.mxu1 %v8801_v34 }
 0x463   :  { %4851 = vmatprep.subr.bf16.mxu0 %v8802_v41  ;;  %4915 = vmatprep.subr.bf16.mxu1 %v8803_v49 }
 0x466   :  { %4853 = vmatpush1.bf16.msra.mxu0 %v8718_v8  ;;  %4917 = vmatpush1.bf16.msra.mxu1 %v8804_v51 }
 0x467   :  { %4855 = vmatprep.subr.bf16.mxu0 %v8720_v40  ;;  %4919 = vmatprep.subr.bf16.mxu1 %v8721_v36 }
 0x46a   :  { %4857 = vmatpush1.bf16.msra.mxu0 %v8722_v46  ;;  %4921 = vmatpush1.bf16.msra.mxu1 %v8723_v19 }
 0x46b   :  { %4859 = vmatprep.subr.bf16.mxu0 %v8724_v18  ;;  %4923 = vmatprep.subr.bf16.mxu1 %v8725_v33 }
 0x46e   :  { %4861 = vmatpush1.bf16.msra.mxu0 %v8726_v47  ;;  %4925 = vmatpush1.bf16.msra.mxu1 %v8727_v48 }
 0x46f   :  { %4863 = vmatprep.subr.bf16.mxu0 %v8728_v50  ;;  %4927 = vmatprep.subr.bf16.mxu1 %v8643_v56 }
 0x472   :  { %4865 = vmatpush1.bf16.msra.mxu0 %v8729_v53  ;;  %4929 = vmatpush1.bf16.msra.mxu1 %v8645_v38 }
 0x473   :  { %4867 = vmatprep.subr.bf16.mxu0 %v8646_v54  ;;  %4931 = vmatprep.subr.bf16.mxu1 %v8647_v62 }
 0x476   :  { %4869 = vmatpush1.bf16.msra.mxu0 %v8648_v7  ;;  %4933 = vmatpush1.bf16.msra.mxu1 %v8649_v15  ;;  %v8876_v15 = vld [vmem:[#allocation140_spill] sm:$0xff] }
 0x477   :  { %4871 = vmatprep.subr.bf16.mxu0 %v8650_v6  ;;  %4935 = vmatprep.subr.bf16.mxu1 %v8651_v39  ;;  %v8805_v6 = vld [vmem:[#allocation134_spill] sm:$0xff]  ;;  %v8806_v39 = vld [vmem:[#allocation135_spill] sm:$0xff] }
 0x47a   :  { %4873 = vmatpush1.bf16.msra.mxu0 %v8652_v45  ;;  %4937 = vmatpush1.bf16.msra.mxu1 %v8653_v59  ;;  %v8807_v45 = vld [vmem:[#allocation136_spill] sm:$0xff]  ;;  %v8808_v59 = vld [vmem:[#allocation137_spill] sm:$0xff] }
 0x47b   :  { %4875 = vmatprep.subr.bf16.mxu0 %v7007_v21  ;;  %4939 = vmatprep.subr.bf16.mxu1 %v8654_v44  ;;  %v8809_v21 = vld [vmem:[#allocation138_spill] sm:$0xff]  ;;  %v8810_v44 = vld [vmem:[#allocation11_spill] sm:$0xff] }
 0x47e   :  { %4877 = vmatpush1.bf16.msra.mxu0 %v7013_v57  ;;  %4941 = vmatpush1.bf16.msra.mxu1 %v7017_v5  ;;  %v8811_v57 = vld [vmem:[#allocation12_spill] sm:$0xff] }
 0x47f   :  { %4879 = vmatprep.subr.bf16.mxu0 %v7019_v9  ;;  %4943 = vmatprep.subr.bf16.mxu1 %v7022_v1  ;;  %v8812_v1 = vld [vmem:[#allocation13_spill] sm:$0xff]  ;;  %v8821_v9 = vld [vmem:[#allocation22_spill] sm:$0xff] }
 0x482   :  { %4881 = vmatpush1.bf16.msra.mxu0 %v7025_v20  ;;  %4945 = vmatpush1.bf16.msra.mxu1 %v8805_v6  ;;  %v8813_v20 = vld [vmem:[#allocation14_spill] sm:$0xff]  ;;  %v8814_v6 = vld [vmem:[#allocation15_spill] sm:$0xff] }
 0x483   :  { %4883 = vmatprep.subr.bf16.mxu0 %v8806_v39  ;;  %4947 = vmatprep.subr.bf16.mxu1 %v8807_v45  ;;  %v8815_v39 = vld [vmem:[#allocation16_spill] sm:$0xff]  ;;  %v8816_v45 = vld [vmem:[#allocation17_spill] sm:$0xff] }
 0x486   :  { %4885 = vmatpush1.bf16.msra.mxu0 %v8808_v59  ;;  %4949 = vmatpush1.bf16.msra.mxu1 %v8809_v21  ;;  %v8817_v59 = vld [vmem:[#allocation18_spill] sm:$0xff]  ;;  %v8818_v21 = vld [vmem:[#allocation19_spill] sm:$0xff] }
 0x487   :  { %4951 = vmatprep.subr.bf16.mxu0 %v8810_v44  ;;  %5015 = vmatprep.subr.bf16.mxu1 %v8811_v57  ;;  %v8819_v44 = vld [vmem:[#allocation20_spill] sm:$0xff]  ;;  %v8820_v57 = vld [vmem:[#allocation21_spill] sm:$0xff] }
 0x489   :  { %2263 = vmatmul.mubr.f32.vlgmr.msra.gmra.mrb[22].mxu0 %v7461_v42  ;;  %2344 = vmatmul.mubr.f32.vlgmr.msra.gmra.mrb[22].mxu1 %v7461_v42  ;;  %v8822_v42 = vld [vmem:[#allocation23_spill] sm:$0xff] }
 0x48a   :  { %4953 = vmatpush1.bf16.msra.mxu0 %v8812_v1  ;;  %5017 = vmatpush1.bf16.msra.mxu1 %v8813_v20  ;;  %v8823_v1 = vld [vmem:[#allocation24_spill] sm:$0xff]  ;;  %v8824_v20 = vld [vmem:[#allocation25_spill] sm:$0xff] }
 0x48b   :  { %4955 = vmatprep.subr.bf16.mxu0 %v8814_v6  ;;  %5019 = vmatprep.subr.bf16.mxu1 %v8815_v39  ;;  %v8825_v6 = vld [vmem:[#allocation26_spill] sm:$0xff]  ;;  %v8826_v39 = vld [vmem:[#allocation27_spill] sm:$0xff] }
 0x48e   :  { %4957 = vmatpush1.bf16.msra.mxu0 %v8816_v45  ;;  %5021 = vmatpush1.bf16.msra.mxu1 %v8817_v59  ;;  %v8827_v45 = vld [vmem:[#allocation28_spill] sm:$0xff]  ;;  %v8828_v59 = vld [vmem:[#allocation29_spill] sm:$0xff] }
 0x48f   :  { %4959 = vmatprep.subr.bf16.mxu0 %v8818_v21  ;;  %5023 = vmatprep.subr.bf16.mxu1 %v8819_v44  ;;  %v8829_v21 = vld [vmem:[#allocation30_spill] sm:$0xff]  ;;  %v8830_v44 = vld [vmem:[#allocation31_spill] sm:$0xff] }
 0x492   :  { %4961 = vmatpush1.bf16.msra.mxu0 %v8820_v57  ;;  %5025 = vmatpush1.bf16.msra.mxu1 %v8821_v9  ;;  %v8831_v57 = vld [vmem:[#allocation32_spill] sm:$0xff]  ;;  %v8832_v9 = vld [vmem:[#allocation33_spill] sm:$0xff] }
 0x493   :  { %4963 = vmatprep.subr.bf16.mxu0 %v8822_v42  ;;  %5027 = vmatprep.subr.bf16.mxu1 %v8823_v1  ;;  %v8833_v42 = vld [vmem:[#allocation34_spill] sm:$0xff]  ;;  %v8834_v1 = vld [vmem:[#allocation35_spill] sm:$0xff] }
 0x496   :  { %4965 = vmatpush1.bf16.msra.mxu0 %v8824_v20  ;;  %5029 = vmatpush1.bf16.msra.mxu1 %v8825_v6  ;;  %v8835_v20 = vld [vmem:[#allocation36_spill] sm:$0xff]  ;;  %v8836_v6 = vld [vmem:[#allocation37_spill] sm:$0xff] }
 0x497   :  { %4967 = vmatprep.subr.bf16.mxu0 %v8826_v39  ;;  %5031 = vmatprep.subr.bf16.mxu1 %v8827_v45  ;;  %v8837_v39 = vld [vmem:[#allocation38_spill] sm:$0xff]  ;;  %v8838_v45 = vld [vmem:[#allocation39_spill] sm:$0xff] }
 0x49a   :  { %4969 = vmatpush1.bf16.msra.mxu0 %v8828_v59  ;;  %5033 = vmatpush1.bf16.msra.mxu1 %v8829_v21  ;;  %v8839_v59 = vld [vmem:[#allocation40_spill] sm:$0xff]  ;;  %v8840_v21 = vld [vmem:[#allocation41_spill] sm:$0xff] }
 0x49b   :  { %4971 = vmatprep.subr.bf16.mxu0 %v8830_v44  ;;  %5035 = vmatprep.subr.bf16.mxu1 %v8831_v57  ;;  %v8841_v44 = vld [vmem:[#allocation42_spill] sm:$0xff]  ;;  %v8842_v57 = vld [vmem:[#allocation43_spill] sm:$0xff] }
 0x49e   :  { %4973 = vmatpush1.bf16.msra.mxu0 %v8832_v9  ;;  %5037 = vmatpush1.bf16.msra.mxu1 %v8833_v42  ;;  %v8843_v9 = vld [vmem:[#allocation44_spill] sm:$0xff]  ;;  %v8844_v42 = vld [vmem:[#allocation45_spill] sm:$0xff] }
 0x49f   :  { %4975 = vmatprep.subr.bf16.mxu0 %v8834_v1  ;;  %5039 = vmatprep.subr.bf16.mxu1 %v8835_v20  ;;  %v8845_v1 = vld [vmem:[#allocation46_spill] sm:$0xff]  ;;  %v8846_v20 = vld [vmem:[#allocation47_spill] sm:$0xff] }
 0x4a2   :  { %4977 = vmatpush1.bf16.msra.mxu0 %v8836_v6  ;;  %5041 = vmatpush1.bf16.msra.mxu1 %v8837_v39  ;;  %v8847_v6 = vld [vmem:[#allocation48_spill] sm:$0xff]  ;;  %v8848_v39 = vld [vmem:[#allocation49_spill] sm:$0xff] }
 0x4a3   :  { %4979 = vmatprep.subr.bf16.mxu0 %v8838_v45  ;;  %5043 = vmatprep.subr.bf16.mxu1 %v8839_v59  ;;  %v8849_v45 = vld [vmem:[#allocation50_spill] sm:$0xff]  ;;  %v8850_v59 = vld [vmem:[#allocation51_spill] sm:$0xff] }
 0x4a6   :  { %4981 = vmatpush1.bf16.msra.mxu0 %v8840_v21  ;;  %5045 = vmatpush1.bf16.msra.mxu1 %v8841_v44  ;;  %v8851_v21 = vld [vmem:[#allocation52_spill] sm:$0xff]  ;;  %v8852_v44 = vld [vmem:[#allocation53_spill] sm:$0xff] }
 0x4a7   :  { %4983 = vmatprep.subr.bf16.mxu0 %v8842_v57  ;;  %5047 = vmatprep.subr.bf16.mxu1 %v8843_v9  ;;  %v8853_v57 = vld [vmem:[#allocation54_spill] sm:$0xff]  ;;  %v8854_v9 = vld [vmem:[#allocation55_spill] sm:$0xff] }
 0x4aa   :  { %4985 = vmatpush1.bf16.msra.mxu0 %v8844_v42  ;;  %5049 = vmatpush1.bf16.msra.mxu1 %v8845_v1  ;;  %v8855_v42 = vld [vmem:[#allocation56_spill] sm:$0xff]  ;;  %v8856_v1 = vld [vmem:[#allocation57_spill] sm:$0xff] }
 0x4ab   :  { %4987 = vmatprep.subr.bf16.mxu0 %v8846_v20  ;;  %5051 = vmatprep.subr.bf16.mxu1 %v8847_v6  ;;  %v8857_v20 = vld [vmem:[#allocation58_spill] sm:$0xff]  ;;  %v8858_v6 = vld [vmem:[#allocation59_spill] sm:$0xff] }
 0x4ae   :  { %4989 = vmatpush1.bf16.msra.mxu0 %v8848_v39  ;;  %5053 = vmatpush1.bf16.msra.mxu1 %v8849_v45  ;;  %v8859_v39 = vld [vmem:[#allocation60_spill] sm:$0xff]  ;;  %v8860_v45 = vld [vmem:[#allocation61_spill] sm:$0xff] }
 0x4af   :  { %4991 = vmatprep.subr.bf16.mxu0 %v8850_v59  ;;  %5055 = vmatprep.subr.bf16.mxu1 %v8851_v21  ;;  %v8861_v59 = vld [vmem:[#allocation62_spill] sm:$0xff]  ;;  %v8862_v21 = vld [vmem:[#allocation63_spill] sm:$0xff] }
 0x4b2   :  { %4993 = vmatpush1.bf16.msra.mxu0 %v8852_v44  ;;  %5057 = vmatpush1.bf16.msra.mxu1 %v8853_v57  ;;  %v8863_v44 = vld [vmem:[#allocation64_spill] sm:$0xff]  ;;  %v8864_v57 = vld [vmem:[#allocation65_spill] sm:$0xff] }
 0x4b3   :  { %4995 = vmatprep.subr.bf16.mxu0 %v8854_v9  ;;  %5059 = vmatprep.subr.bf16.mxu1 %v8855_v42  ;;  %v8865_v9 = vld [vmem:[#allocation66_spill] sm:$0xff]  ;;  %v8866_v42 = vld [vmem:[#allocation67_spill] sm:$0xff] }
 0x4b6   :  { %4997 = vmatpush1.bf16.msra.mxu0 %v8856_v1  ;;  %5061 = vmatpush1.bf16.msra.mxu1 %v8857_v20  ;;  %v8867_v1 = vld [vmem:[#allocation68_spill] sm:$0xff]  ;;  %v8868_v20 = vld [vmem:[#allocation69_spill] sm:$0xff] }
 0x4b7   :  { %4999 = vmatprep.subr.bf16.mxu0 %v8858_v6  ;;  %5063 = vmatprep.subr.bf16.mxu1 %v8859_v39  ;;  %v8869_v6 = vld [vmem:[#allocation70_spill] sm:$0xff]  ;;  %v8870_v39 = vld [vmem:[#allocation71_spill] sm:$0xff] }
 0x4ba   :  { %5001 = vmatpush1.bf16.msra.mxu0 %v8860_v45  ;;  %5065 = vmatpush1.bf16.msra.mxu1 %v8861_v59  ;;  %v8871_v45 = vld [vmem:[#allocation72_spill] sm:$0xff]  ;;  %v8872_v59 = vld [vmem:[#allocation73_spill] sm:$0xff] }
 0x4bb   :  { %5003 = vmatprep.subr.bf16.mxu0 %v8862_v21  ;;  %5067 = vmatprep.subr.bf16.mxu1 %v8863_v44  ;;  %v8873_v21 = vld [vmem:[#allocation74_spill] sm:$0xff]  ;;  %v8874_v44 = vld [vmem:[#allocation75_spill] sm:$0xff] }
 0x4be   :  { %5005 = vmatpush1.bf16.msra.mxu0 %v8864_v57  ;;  %5069 = vmatpush1.bf16.msra.mxu1 %v8865_v9  ;;  %v8875_v57 = vld [vmem:[#allocation76_spill] sm:$0xff] }
 0x4bf   :  { %5007 = vmatprep.subr.bf16.mxu0 %v8866_v42  ;;  %5071 = vmatprep.subr.bf16.mxu1 %v8867_v1 }
 0x4c2   :  { %5009 = vmatpush1.bf16.msra.mxu0 %v8868_v20  ;;  %5073 = vmatpush1.bf16.msra.mxu1 %v8869_v6 }
 0x4c3   :  { %5011 = vmatprep.subr.bf16.mxu0 %v8870_v39  ;;  %5075 = vmatprep.subr.bf16.mxu1 %v8871_v45 }
 0x4c6   :  { %5013 = vmatpush1.bf16.msra.mxu0 %v8872_v59  ;;  %5077 = vmatpush1.bf16.msra.mxu1 %v8873_v21 }
 0x4c7   :  { %5079 = vmatprep.subr.bf16.mxu0 %v8874_v44  ;;  %5143 = vmatprep.subr.bf16.mxu1 %v8875_v57 }
 0x51c   :  { %v2094_v9 = vpop.f32.mrb[6].mxu0  ;;  %v2179_v42 = vpop.f32.mrb[6].mxu1 }
 0x51d   :  { %v2096_v5 = vpop.f32.mrb[7].mxu0  ;;  %v2181_v1 = vpop.f32.mrb[7].mxu1  ;;  %v5980_v20 = vadd.f32 %v2094_v9, %v8876_v15  ;;  %v5996_v6 = vadd.f32 %v2179_v42, %v8690_v3 }
 0x51e   :  { %v5981_v39 = vadd.f32 %v2096_v5, %v8691_v2  ;;  %v5997_v45 = vadd.f32 %v2181_v1, %v8692_v52 }
 0x51f   :  { %v3855_v7 = vmul.f32 -1.442695, %v5980_v20  ;;  %v3857_v59 = vmul.f32 -1.442695, %v5996_v6  ;;  %v8877_v6 = vld [vmem:[#allocation144_spill] sm:$0xff] }
 0x520   :  { %v3856_v62 = vmul.f32 -1.442695, %v5981_v39  ;;  %v3858_v21 = vmul.f32 -1.442695, %v5997_v45 }
 0x521   :  { %6209 = vpow2.f32 %v3855_v7 }
 0x522   :  { %6211 = vpow2.f32 %v3857_v59 }
 0x523   :  { %6213 = vpow2.f32 %v3856_v62 }
 0x524   :  { %6215 = vpow2.f32 %v3858_v21  ;;  %v8878_v21 = vld [vmem:[#allocation145_spill] sm:$0xff] }
 0x52b   :  { %v6210_v57 = vpop.eup %6209 }
 0x52c   :  { %v6212_v44 = vpop.eup %6211  ;;  %v2107_v53 = vadd.f32 1.0, %v6210_v57 }
 0x52d   :  { %v6214_v54 = vpop.eup %6213  ;;  %v2192_v9 = vadd.f32 1.0, %v6212_v44 }
 0x52e   :  { %v6216_v38 = vpop.eup %6215  ;;  %v2108_v15 = vadd.f32 1.0, %v6214_v54  ;;  %6217 = vrcp.f32 %v2107_v53 }
 0x52f   :  { %v2193_v42 = vadd.f32 1.0, %v6216_v38  ;;  %6219 = vrcp.f32 %v2192_v9 }
 0x530   :  { %6221 = vrcp.f32 %v2108_v15 }
 0x531   :  { %6223 = vrcp.f32 %v2193_v42 }
 0x538   :  { %v6218_v38 = vpop.eup %6217 }
 0x539   :  { %v6220_v54 = vpop.eup %6219 }
 0x53a   :  { %v6222_v15 = vpop.eup %6221 }
 0x53b   :  { %v6224_v53 = vpop.eup %6223 }
 0x55c   :  { %v2264_v5 = vpop.f32.mrb[22].mxu0  ;;  %v2345_v1 = vpop.f32.mrb[22].mxu1 }
 0x55d   :  { %v6012_v20 = vadd.f32 %v2264_v5, %v7143_v14  ;;  %v6028_v7 = vadd.f32 %v2345_v1, %v8877_v6  ;;  %v2266_v59 = vpop.f32.mrb[23].mxu0  ;;  %v2347_v62 = vpop.f32.mrb[23].mxu1  ;;  %v2273_v1 = vmul.f32 %v6220_v54, %v7455_v11 }
 0x55e   :  { %v6013_v39 = vadd.f32 %v2266_v59, %v8878_v21  ;;  %v6029_v45 = vadd.f32 %v2347_v62, %v7149_v61  ;;  %v2274_v59 = vmul.f32 %v6224_v53, %v7457_v27  ;;  %v8882_v53 = vld [vmem:[#allocation119_spill] sm:$0xff] }
 0x55f   :  { %6225 = vtanh.f32 %v6012_v20  ;;  %v3859_v57 = vmul.f32 -1.442695, %v6028_v7 }
 0x560   :  { %6227 = vtanh.f32 %v6013_v39  ;;  %v3860_v44 = vmul.f32 -1.442695, %v6029_v45 }
 0x561   :  { %6229 = vpow2.f32 %v3859_v57 }
 0x562   :  { %6231 = vpow2.f32 %v3860_v44 }
 0x569   :  { %v6226_v9 = vpop.eup %6225 }
 0x56a   :  { %v6228_v5 = vpop.eup %6227  ;;  %v2275_v6 = vmul.f32 %v6226_v9, %v6218_v38  ;;  %v8883_v9 = vld [vmem:[#allocation120_spill] sm:$0xff] }
 0x56b   :  { %v6230_v42 = vpop.eup %6229  ;;  %v2276_v21 = vmul.f32 %v6228_v5, %v6222_v15  ;;  %v8881_v15 = vld [vmem:[#allocation118_spill] sm:$0xff]  ;;  %v8884_v5 = vld [vmem:[#allocation121_spill] sm:$0xff] }
 0x56c   :  { %v6232_v62 = vpop.eup %6231  ;;  %v7605_v20 = vadd.f32 %v2275_v6, %v2273_v1  ;;  %v2358_v7 = vadd.f32 1.0, %v6230_v42  ;;  %v8879_v6 = vld [vmem:[#allocation95_spill] sm:$0xff]  ;;  %v8885_v1 = vld [vmem:[#allocation122_spill] sm:$0xff] }
 0x56d   :  { %v7607_v39 = vadd.f32 %v2276_v21, %v2274_v59  ;;  %v2359_v45 = vadd.f32 1.0, %v6232_v62  ;;  %v8880_v21 = vld [vmem:[#allocation117_spill] sm:$0xff]  ;;  %v8886_v42 = vld [vmem:[#allocation123_spill] sm:$0xff]  ;;  %v8887_v59 = vld [vmem:[#allocation124_spill] sm:$0xff] }
 0x56e   :  { %6233 = vtanh.f32 %v7605_v20  ;;  %v8888_v62 = vld [vmem:[#allocation125_spill] sm:$0xff] }
 0x56f   :  { %6235 = vrcp.f32 %v2358_v7  ;;  %v8889_v7 = vld [vmem:[#allocation126_spill] sm:$0xff] }
 0x570   :  { %6237 = vtanh.f32 %v7607_v39 }
 0x571   :  { %6239 = vrcp.f32 %v2359_v45  ;;  %v8890_v45 = vld [vmem:[#allocation127_spill] sm:$0xff] }
 0x578   :  { %v6234_v57 = vpop.eup %6233 }
 0x579   :  { %v6236_v11 = vpop.eup %6235 }
 0x57a   :  { %v6238_v44 = vpop.eup %6237  ;;  %v7611_v27 = vmul.f32 %v6236_v11, %v6234_v57  ;;  %v8891_v57 = vld [vmem:[#allocation128_spill] sm:$0xff]  ;;  %v8892_v11 = vld [vmem:[#allocation129_spill] sm:$0xff] }
 0x57b   :  { %v6240_v38 = vpop.eup %6239 }
 0x57c   :  { %v2367_v54 = vmul.f32 %v6240_v38, %v6238_v44  ;;  %v8893_v44 = vld [vmem:[#allocation130_spill] sm:$0xff]  ;;  %v8894_v38 = vld [vmem:[#allocation131_spill] sm:$0xff] }
 0x57e   :  { %2441 = vmatprep.mubr.f32.mxu0 %v2367_v54  ;;  %2526 = vmatprep.mubr.f32.mxu1 %v2367_v54 }
 0x57f   :  { %2442 = vmatmul.mubr.f32.vlgmr.msra.gmra.mrb[8].mxu0 %v7611_v27  ;;  %2527 = vmatmul.mubr.f32.vlgmr.msra.gmra.mrb[8].mxu1 %v7611_v27 }
 0x580   :  { %5081 = vmatpush1.bf16.msra.mxu0 %v8604_v30  ;;  %5145 = vmatpush1.bf16.msra.mxu1 %v8605_v13 }
 0x581   :  { %2611 = vmatprep.mubr.f32.mxu0 %v2367_v54  ;;  %2692 = vmatprep.mubr.f32.mxu1 %v2367_v54  ;;  %v8895_v54 = vld [vmem:[#allocation132_spill] sm:$0xff] }
 0x582   :  { %5083 = vmatprep.subr.bf16.mxu0 %v8606_v25  ;;  %5147 = vmatprep.subr.bf16.mxu1 %v8607_v60 }
 0x584   :  { %5085 = vmatpush1.bf16.msra.mxu0 %v8608_v0  ;;  %5149 = vmatpush1.bf16.msra.mxu1 %v8695_v32 }
 0x585   :  { %5087 = vmatprep.subr.bf16.mxu0 %v8696_v37  ;;  %5151 = vmatprep.subr.bf16.mxu1 %v8697_v29 }
 0x588   :  { %5089 = vmatpush1.bf16.msra.mxu0 %v8698_v31  ;;  %5153 = vmatpush1.bf16.msra.mxu1 %v8699_v17 }
 0x589   :  { %5091 = vmatprep.subr.bf16.mxu0 %v8700_v4  ;;  %5155 = vmatprep.subr.bf16.mxu1 %v8787_v12 }
 0x58c   :  { %5093 = vmatpush1.bf16.msra.mxu0 %v8788_v24  ;;  %5157 = vmatpush1.bf16.msra.mxu1 %v8789_v55 }
 0x58d   :  { %5095 = vmatprep.subr.bf16.mxu0 %v8790_v63  ;;  %5159 = vmatprep.subr.bf16.mxu1 %v8791_v35 }
 0x590   :  { %5097 = vmatpush1.bf16.msra.mxu0 %v8792_v58  ;;  %5161 = vmatpush1.bf16.msra.mxu1 %v8793_v10 }
 0x591   :  { %5099 = vmatprep.subr.bf16.mxu0 %v8879_v6  ;;  %5163 = vmatprep.subr.bf16.mxu1 %v8795_v22 }
 0x594   :  { %5101 = vmatpush1.bf16.msra.mxu0 %v8796_v23  ;;  %5165 = vmatpush1.bf16.msra.mxu1 %v8797_v16 }
 0x595   :  { %5103 = vmatprep.subr.bf16.mxu0 %v8798_v43  ;;  %5167 = vmatprep.subr.bf16.mxu1 %v8799_v28 }
 0x598   :  { %5105 = vmatpush1.bf16.msra.mxu0 %v8800_v26  ;;  %5169 = vmatpush1.bf16.msra.mxu1 %v8801_v34 }
 0x599   :  { %5107 = vmatprep.subr.bf16.mxu0 %v8802_v41  ;;  %5171 = vmatprep.subr.bf16.mxu1 %v8803_v49 }
 0x59c   :  { %5109 = vmatpush1.bf16.msra.mxu0 %v8718_v8  ;;  %5173 = vmatpush1.bf16.msra.mxu1 %v8804_v51 }
 0x59d   :  { %5111 = vmatprep.subr.bf16.mxu0 %v8720_v40  ;;  %5175 = vmatprep.subr.bf16.mxu1 %v8721_v36 }
 0x5a0   :  { %5113 = vmatpush1.bf16.msra.mxu0 %v8722_v46  ;;  %5177 = vmatpush1.bf16.msra.mxu1 %v8723_v19 }
 0x5a1   :  { %5115 = vmatprep.subr.bf16.mxu0 %v8724_v18  ;;  %5179 = vmatprep.subr.bf16.mxu1 %v8725_v33 }
 0x5a4   :  { %5117 = vmatpush1.bf16.msra.mxu0 %v8726_v47  ;;  %5181 = vmatpush1.bf16.msra.mxu1 %v8727_v48 }
 0x5a5   :  { %5119 = vmatprep.subr.bf16.mxu0 %v8728_v50  ;;  %5183 = vmatprep.subr.bf16.mxu1 %v8643_v56 }
 0x5a8   :  { %5121 = vmatpush1.bf16.msra.mxu0 %v8880_v21  ;;  %5185 = vmatpush1.bf16.msra.mxu1 %v8881_v15 }
 0x5a9   :  { %5123 = vmatprep.subr.bf16.mxu0 %v8882_v53  ;;  %5187 = vmatprep.subr.bf16.mxu1 %v8883_v9 }
 0x5ac   :  { %5125 = vmatpush1.bf16.msra.mxu0 %v8884_v5  ;;  %5189 = vmatpush1.bf16.msra.mxu1 %v8885_v1  ;;  %v8896_v1 = vld [vmem:[#allocation133_spill] sm:$0xff]  ;;  %v8968_v5 = vld [vmem:[#allocation140_spill] sm:$0xff] }
 0x5ad   :  { %5127 = vmatprep.subr.bf16.mxu0 %v8886_v42  ;;  %5191 = vmatprep.subr.bf16.mxu1 %v8887_v59  ;;  %v8897_v42 = vld [vmem:[#allocation134_spill] sm:$0xff]  ;;  %v8898_v59 = vld [vmem:[#allocation135_spill] sm:$0xff] }
 0x5b0   :  { %5129 = vmatpush1.bf16.msra.mxu0 %v8888_v62  ;;  %5193 = vmatpush1.bf16.msra.mxu1 %v8889_v7  ;;  %v8899_v62 = vld [vmem:[#allocation136_spill] sm:$0xff]  ;;  %v8900_v7 = vld [vmem:[#allocation137_spill] sm:$0xff] }
 0x5b1   :  { %5131 = vmatprep.subr.bf16.mxu0 %v8890_v45  ;;  %5195 = vmatprep.subr.bf16.mxu1 %v8891_v57  ;;  %v8901_v45 = vld [vmem:[#allocation138_spill] sm:$0xff]  ;;  %v8902_v57 = vld [vmem:[#allocation11_spill] sm:$0xff] }
 0x5b4   :  { %5133 = vmatpush1.bf16.msra.mxu0 %v8892_v11  ;;  %5197 = vmatpush1.bf16.msra.mxu1 %v8893_v44  ;;  %v8903_v11 = vld [vmem:[#allocation12_spill] sm:$0xff] }
 0x5b5   :  { %5135 = vmatprep.subr.bf16.mxu0 %v8894_v38  ;;  %5199 = vmatprep.subr.bf16.mxu1 %v8895_v54  ;;  %v8904_v54 = vld [vmem:[#allocation13_spill] sm:$0xff]  ;;  %v8913_v38 = vld [vmem:[#allocation22_spill] sm:$0xff] }
 0x5b8   :  { %5137 = vmatpush1.bf16.msra.mxu0 %v8896_v1  ;;  %5201 = vmatpush1.bf16.msra.mxu1 %v8897_v42  ;;  %v8905_v1 = vld [vmem:[#allocation14_spill] sm:$0xff]  ;;  %v8906_v42 = vld [vmem:[#allocation15_spill] sm:$0xff] }
 0x5b9   :  { %5139 = vmatprep.subr.bf16.mxu0 %v8898_v59  ;;  %5203 = vmatprep.subr.bf16.mxu1 %v8899_v62  ;;  %v8907_v59 = vld [vmem:[#allocation16_spill] sm:$0xff]  ;;  %v8908_v62 = vld [vmem:[#allocation17_spill] sm:$0xff] }
 0x5bc   :  { %5141 = vmatpush1.bf16.msra.mxu0 %v8900_v7  ;;  %5205 = vmatpush1.bf16.msra.mxu1 %v8901_v45  ;;  %v8909_v7 = vld [vmem:[#allocation18_spill] sm:$0xff]  ;;  %v8910_v45 = vld [vmem:[#allocation19_spill] sm:$0xff] }
 0x5bd   :  { %5207 = vmatprep.subr.bf16.mxu0 %v8902_v57  ;;  %5271 = vmatprep.subr.bf16.mxu1 %v8903_v11  ;;  %v8911_v57 = vld [vmem:[#allocation20_spill] sm:$0xff]  ;;  %v8912_v11 = vld [vmem:[#allocation21_spill] sm:$0xff] }
 0x5bf   :  { %2612 = vmatmul.mubr.f32.vlgmr.msra.gmra.mrb[24].mxu0 %v7611_v27  ;;  %2693 = vmatmul.mubr.f32.vlgmr.msra.gmra.mrb[24].mxu1 %v7611_v27  ;;  %v8914_v27 = vld [vmem:[#allocation23_spill] sm:$0xff] }
 0x5c0   :  { %5209 = vmatpush1.bf16.msra.mxu0 %v8904_v54  ;;  %5273 = vmatpush1.bf16.msra.mxu1 %v8905_v1  ;;  %v8915_v54 = vld [vmem:[#allocation24_spill] sm:$0xff]  ;;  %v8916_v1 = vld [vmem:[#allocation25_spill] sm:$0xff] }
 0x5c1   :  { %5211 = vmatprep.subr.bf16.mxu0 %v8906_v42  ;;  %5275 = vmatprep.subr.bf16.mxu1 %v8907_v59  ;;  %v8917_v42 = vld [vmem:[#allocation26_spill] sm:$0xff]  ;;  %v8918_v59 = vld [vmem:[#allocation27_spill] sm:$0xff] }
 0x5c4   :  { %5213 = vmatpush1.bf16.msra.mxu0 %v8908_v62  ;;  %5277 = vmatpush1.bf16.msra.mxu1 %v8909_v7  ;;  %v8919_v62 = vld [vmem:[#allocation28_spill] sm:$0xff]  ;;  %v8920_v7 = vld [vmem:[#allocation29_spill] sm:$0xff] }
 0x5c5   :  { %5215 = vmatprep.subr.bf16.mxu0 %v8910_v45  ;;  %5279 = vmatprep.subr.bf16.mxu1 %v8911_v57  ;;  %v8921_v45 = vld [vmem:[#allocation30_spill] sm:$0xff]  ;;  %v8922_v57 = vld [vmem:[#allocation31_spill] sm:$0xff] }
 0x5c8   :  { %5217 = vmatpush1.bf16.msra.mxu0 %v8912_v11  ;;  %5281 = vmatpush1.bf16.msra.mxu1 %v8913_v38  ;;  %v8923_v11 = vld [vmem:[#allocation32_spill] sm:$0xff]  ;;  %v8924_v38 = vld [vmem:[#allocation33_spill] sm:$0xff] }
 0x5c9   :  { %5219 = vmatprep.subr.bf16.mxu0 %v8914_v27  ;;  %5283 = vmatprep.subr.bf16.mxu1 %v8915_v54  ;;  %v8925_v27 = vld [vmem:[#allocation34_spill] sm:$0xff]  ;;  %v8926_v54 = vld [vmem:[#allocation35_spill] sm:$0xff] }
 0x5cc   :  { %5221 = vmatpush1.bf16.msra.mxu0 %v8916_v1  ;;  %5285 = vmatpush1.bf16.msra.mxu1 %v8917_v42  ;;  %v8927_v1 = vld [vmem:[#allocation36_spill] sm:$0xff]  ;;  %v8928_v42 = vld [vmem:[#allocation37_spill] sm:$0xff] }
 0x5cd   :  { %5223 = vmatprep.subr.bf16.mxu0 %v8918_v59  ;;  %5287 = vmatprep.subr.bf16.mxu1 %v8919_v62  ;;  %v8929_v59 = vld [vmem:[#allocation38_spill] sm:$0xff]  ;;  %v8930_v62 = vld [vmem:[#allocation39_spill] sm:$0xff] }
 0x5d0   :  { %5225 = vmatpush1.bf16.msra.mxu0 %v8920_v7  ;;  %5289 = vmatpush1.bf16.msra.mxu1 %v8921_v45  ;;  %v8931_v7 = vld [vmem:[#allocation40_spill] sm:$0xff]  ;;  %v8932_v45 = vld [vmem:[#allocation41_spill] sm:$0xff] }
 0x5d1   :  { %5227 = vmatprep.subr.bf16.mxu0 %v8922_v57  ;;  %5291 = vmatprep.subr.bf16.mxu1 %v8923_v11  ;;  %v8933_v57 = vld [vmem:[#allocation42_spill] sm:$0xff]  ;;  %v8934_v11 = vld [vmem:[#allocation43_spill] sm:$0xff] }
 0x5d4   :  { %5229 = vmatpush1.bf16.msra.mxu0 %v8924_v38  ;;  %5293 = vmatpush1.bf16.msra.mxu1 %v8925_v27  ;;  %v8935_v38 = vld [vmem:[#allocation44_spill] sm:$0xff]  ;;  %v8936_v27 = vld [vmem:[#allocation45_spill] sm:$0xff] }
 0x5d5   :  { %5231 = vmatprep.subr.bf16.mxu0 %v8926_v54  ;;  %5295 = vmatprep.subr.bf16.mxu1 %v8927_v1  ;;  %v8937_v54 = vld [vmem:[#allocation46_spill] sm:$0xff]  ;;  %v8938_v1 = vld [vmem:[#allocation47_spill] sm:$0xff] }
 0x5d8   :  { %5233 = vmatpush1.bf16.msra.mxu0 %v8928_v42  ;;  %5297 = vmatpush1.bf16.msra.mxu1 %v8929_v59  ;;  %v8939_v42 = vld [vmem:[#allocation48_spill] sm:$0xff]  ;;  %v8940_v59 = vld [vmem:[#allocation49_spill] sm:$0xff] }
 0x5d9   :  { %5235 = vmatprep.subr.bf16.mxu0 %v8930_v62  ;;  %5299 = vmatprep.subr.bf16.mxu1 %v8931_v7  ;;  %v8941_v62 = vld [vmem:[#allocation50_spill] sm:$0xff]  ;;  %v8942_v7 = vld [vmem:[#allocation51_spill] sm:$0xff] }
 0x5dc   :  { %5237 = vmatpush1.bf16.msra.mxu0 %v8932_v45  ;;  %5301 = vmatpush1.bf16.msra.mxu1 %v8933_v57  ;;  %v8943_v45 = vld [vmem:[#allocation52_spill] sm:$0xff]  ;;  %v8944_v57 = vld [vmem:[#allocation53_spill] sm:$0xff] }
 0x5dd   :  { %5239 = vmatprep.subr.bf16.mxu0 %v8934_v11  ;;  %5303 = vmatprep.subr.bf16.mxu1 %v8935_v38  ;;  %v8945_v11 = vld [vmem:[#allocation54_spill] sm:$0xff]  ;;  %v8946_v38 = vld [vmem:[#allocation55_spill] sm:$0xff] }
 0x5e0   :  { %5241 = vmatpush1.bf16.msra.mxu0 %v8936_v27  ;;  %5305 = vmatpush1.bf16.msra.mxu1 %v8937_v54  ;;  %v8947_v27 = vld [vmem:[#allocation56_spill] sm:$0xff]  ;;  %v8948_v54 = vld [vmem:[#allocation57_spill] sm:$0xff] }
 0x5e1   :  { %5243 = vmatprep.subr.bf16.mxu0 %v8938_v1  ;;  %5307 = vmatprep.subr.bf16.mxu1 %v8939_v42  ;;  %v8949_v1 = vld [vmem:[#allocation58_spill] sm:$0xff]  ;;  %v8950_v42 = vld [vmem:[#allocation59_spill] sm:$0xff] }
 0x5e4   :  { %5245 = vmatpush1.bf16.msra.mxu0 %v8940_v59  ;;  %5309 = vmatpush1.bf16.msra.mxu1 %v8941_v62  ;;  %v8951_v59 = vld [vmem:[#allocation60_spill] sm:$0xff]  ;;  %v8952_v62 = vld [vmem:[#allocation61_spill] sm:$0xff] }
 0x5e5   :  { %5247 = vmatprep.subr.bf16.mxu0 %v8942_v7  ;;  %5311 = vmatprep.subr.bf16.mxu1 %v8943_v45  ;;  %v8953_v7 = vld [vmem:[#allocation62_spill] sm:$0xff]  ;;  %v8954_v45 = vld [vmem:[#allocation63_spill] sm:$0xff] }
 0x5e8   :  { %5249 = vmatpush1.bf16.msra.mxu0 %v8944_v57  ;;  %5313 = vmatpush1.bf16.msra.mxu1 %v8945_v11  ;;  %v8955_v57 = vld [vmem:[#allocation64_spill] sm:$0xff]  ;;  %v8956_v11 = vld [vmem:[#allocation65_spill] sm:$0xff] }
 0x5e9   :  { %5251 = vmatprep.subr.bf16.mxu0 %v8946_v38  ;;  %5315 = vmatprep.subr.bf16.mxu1 %v8947_v27  ;;  %v8957_v38 = vld [vmem:[#allocation66_spill] sm:$0xff]  ;;  %v8958_v27 = vld [vmem:[#allocation67_spill] sm:$0xff] }
 0x5ec   :  { %5253 = vmatpush1.bf16.msra.mxu0 %v8948_v54  ;;  %5317 = vmatpush1.bf16.msra.mxu1 %v8949_v1  ;;  %v8959_v54 = vld [vmem:[#allocation68_spill] sm:$0xff]  ;;  %v8960_v1 = vld [vmem:[#allocation69_spill] sm:$0xff] }
 0x5ed   :  { %5255 = vmatprep.subr.bf16.mxu0 %v8950_v42  ;;  %5319 = vmatprep.subr.bf16.mxu1 %v8951_v59  ;;  %v8961_v42 = vld [vmem:[#allocation70_spill] sm:$0xff]  ;;  %v8962_v59 = vld [vmem:[#allocation71_spill] sm:$0xff] }
 0x5f0   :  { %5257 = vmatpush1.bf16.msra.mxu0 %v8952_v62  ;;  %5321 = vmatpush1.bf16.msra.mxu1 %v8953_v7  ;;  %v8963_v62 = vld [vmem:[#allocation72_spill] sm:$0xff]  ;;  %v8964_v7 = vld [vmem:[#allocation73_spill] sm:$0xff] }
 0x5f1   :  { %5259 = vmatprep.subr.bf16.mxu0 %v8954_v45  ;;  %5323 = vmatprep.subr.bf16.mxu1 %v8955_v57  ;;  %v8965_v45 = vld [vmem:[#allocation74_spill] sm:$0xff]  ;;  %v8966_v57 = vld [vmem:[#allocation75_spill] sm:$0xff] }
 0x5f4   :  { %5261 = vmatpush1.bf16.msra.mxu0 %v8956_v11  ;;  %5325 = vmatpush1.bf16.msra.mxu1 %v8957_v38  ;;  %v8967_v11 = vld [vmem:[#allocation76_spill] sm:$0xff] }
 0x5f5   :  { %5263 = vmatprep.subr.bf16.mxu0 %v8958_v27  ;;  %5327 = vmatprep.subr.bf16.mxu1 %v8959_v54 }
 0x5f8   :  { %5265 = vmatpush1.bf16.msra.mxu0 %v8960_v1  ;;  %5329 = vmatpush1.bf16.msra.mxu1 %v8961_v42 }
 0x5f9   :  { %5267 = vmatprep.subr.bf16.mxu0 %v8962_v59  ;;  %5331 = vmatprep.subr.bf16.mxu1 %v8963_v62 }
 0x5fc   :  { %5269 = vmatpush1.bf16.msra.mxu0 %v8964_v7  ;;  %5333 = vmatpush1.bf16.msra.mxu1 %v8965_v45 }
 0x5fd   :  { %5335 = vmatprep.subr.bf16.mxu0 %v8966_v57  ;;  %5399 = vmatprep.subr.bf16.mxu1 %v8967_v11 }
 0x652   :  { %v2443_v38 = vpop.f32.mrb[8].mxu0  ;;  %v2528_v27 = vpop.f32.mrb[8].mxu1 }
 0x653   :  { %v2445_v44 = vpop.f32.mrb[9].mxu0  ;;  %v2530_v54 = vpop.f32.mrb[9].mxu1  ;;  %v5982_v1 = vadd.f32 %v2443_v38, %v8968_v5  ;;  %v5998_v42 = vadd.f32 %v2528_v27, %v8690_v3 }
 0x654   :  { %v5983_v59 = vadd.f32 %v2445_v44, %v8691_v2  ;;  %v5999_v62 = vadd.f32 %v2530_v54, %v8692_v52 }
 0x655   :  { %v3861_v9 = vmul.f32 -1.442695, %v5982_v1  ;;  %v3863_v7 = vmul.f32 -1.442695, %v5998_v42  ;;  %v8969_v42 = vld [vmem:[#allocation144_spill] sm:$0xff] }
 0x656   :  { %v3862_v53 = vmul.f32 -1.442695, %v5983_v59  ;;  %v3864_v45 = vmul.f32 -1.442695, %v5999_v62  ;;  %v8970_v62 = vld [vmem:[#allocation145_spill] sm:$0xff] }
 0x657   :  { %6241 = vpow2.f32 %v3861_v9 }
 0x658   :  { %6243 = vpow2.f32 %v3863_v7 }
 0x659   :  { %6245 = vpow2.f32 %v3862_v53 }
 0x65a   :  { %6247 = vpow2.f32 %v3864_v45 }
 0x661   :  { %v6242_v11 = vpop.eup %6241 }
 0x662   :  { %v6244_v57 = vpop.eup %6243  ;;  %v2456_v56 = vadd.f32 1.0, %v6242_v11 }
 0x663   :  { %v6246_v15 = vpop.eup %6245  ;;  %v2541_v38 = vadd.f32 1.0, %v6244_v57 }
 0x664   :  { %v6248_v21 = vpop.eup %6247  ;;  %v2457_v5 = vadd.f32 1.0, %v6246_v15  ;;  %6249 = vrcp.f32 %v2456_v56 }
 0x665   :  { %v2542_v27 = vadd.f32 1.0, %v6248_v21  ;;  %6251 = vrcp.f32 %v2541_v38 }
 0x666   :  { %6253 = vrcp.f32 %v2457_v5 }
 0x667   :  { %6255 = vrcp.f32 %v2542_v27 }
 0x66e   :  { %v6250_v56 = vpop.eup %6249 }
 0x66f   :  { %v6252_v15 = vpop.eup %6251 }
 0x670   :  { %v6254_v5 = vpop.eup %6253 }
 0x671   :  { %v6256_v11 = vpop.eup %6255 }
 0x692   :  { %v2613_v44 = vpop.f32.mrb[24].mxu0  ;;  %v2694_v54 = vpop.f32.mrb[24].mxu1 }
 0x693   :  { %v6014_v1 = vadd.f32 %v2613_v44, %v7143_v14  ;;  %v6030_v9 = vadd.f32 %v2694_v54, %v8969_v42  ;;  %v2615_v59 = vpop.f32.mrb[25].mxu0  ;;  %v2696_v53 = vpop.f32.mrb[25].mxu1  ;;  %v2622_v54 = vmul.f32 %v6252_v15, %v7605_v20 }
 0x694   :  { %v6015_v7 = vadd.f32 %v2615_v59, %v8970_v62  ;;  %v6031_v45 = vadd.f32 %v2696_v53, %v7149_v61  ;;  %v2623_v59 = vmul.f32 %v6256_v11, %v7607_v39  ;;  %v8974_v11 = vld [vmem:[#allocation119_spill] sm:$0xff] }
 0x695   :  { %6257 = vtanh.f32 %v6014_v1  ;;  %v3865_v57 = vmul.f32 -1.442695, %v6030_v9 }
 0x696   :  { %6259 = vtanh.f32 %v6015_v7  ;;  %v3866_v21 = vmul.f32 -1.442695, %v6031_v45 }
 0x697   :  { %6261 = vpow2.f32 %v3865_v57 }
 0x698   :  { %6263 = vpow2.f32 %v3866_v21 }
 0x69f   :  { %v6258_v38 = vpop.eup %6257 }
 0x6a0   :  { %v6260_v44 = vpop.eup %6259  ;;  %v2624_v42 = vmul.f32 %v6258_v38, %v6250_v56  ;;  %v8975_v38 = vld [vmem:[#allocation120_spill] sm:$0xff] }
 0x6a1   :  { %v6262_v27 = vpop.eup %6261  ;;  %v2625_v62 = vmul.f32 %v6260_v44, %v6254_v5  ;;  %v8973_v5 = vld [vmem:[#allocation118_spill] sm:$0xff]  ;;  %v8976_v44 = vld [vmem:[#allocation121_spill] sm:$0xff] }
 0x6a2   :  { %v6264_v53 = vpop.eup %6263  ;;  %v7755_v1 = vadd.f32 %v2624_v42, %v2622_v54  ;;  %v2707_v9 = vadd.f32 1.0, %v6262_v27  ;;  %v8971_v42 = vld [vmem:[#allocation116_spill] sm:$0xff]  ;;  %v8977_v54 = vld [vmem:[#allocation122_spill] sm:$0xff]  ;;  %v8978_v27 = vld [vmem:[#allocation123_spill] sm:$0xff] }
 0x6a3   :  { %v7757_v7 = vadd.f32 %v2625_v62, %v2623_v59  ;;  %v2708_v45 = vadd.f32 1.0, %v6264_v53  ;;  %v8972_v62 = vld [vmem:[#allocation117_spill] sm:$0xff]  ;;  %v8979_v59 = vld [vmem:[#allocation124_spill] sm:$0xff] }
 0x6a4   :  { %6265 = vtanh.f32 %v7755_v1  ;;  %v8980_v53 = vld [vmem:[#allocation125_spill] sm:$0xff] }
 0x6a5   :  { %6267 = vrcp.f32 %v2707_v9  ;;  %v8981_v9 = vld [vmem:[#allocation126_spill] sm:$0xff] }
 0x6a6   :  { %6269 = vtanh.f32 %v7757_v7 }
 0x6a7   :  { %6271 = vrcp.f32 %v2708_v45  ;;  %v8982_v45 = vld [vmem:[#allocation127_spill] sm:$0xff] }
 0x6ae   :  { %v6266_v57 = vpop.eup %6265 }
 0x6af   :  { %v6268_v20 = vpop.eup %6267 }
 0x6b0   :  { %v6270_v21 = vpop.eup %6269  ;;  %v7761_v39 = vmul.f32 %v6268_v20, %v6266_v57  ;;  %v8983_v57 = vld [vmem:[#allocation128_spill] sm:$0xff]  ;;  %v8984_v20 = vld [vmem:[#allocation129_spill] sm:$0xff] }
 0x6b1   :  { %v6272_v56 = vpop.eup %6271 }
 0x6b2   :  { %v2716_v15 = vmul.f32 %v6272_v56, %v6270_v21  ;;  %v8985_v21 = vld [vmem:[#allocation130_spill] sm:$0xff]  ;;  %v8986_v56 = vld [vmem:[#allocation131_spill] sm:$0xff] }
 0x6b4   :  { %2790 = vmatprep.mubr.f32.mxu0 %v2716_v15  ;;  %2875 = vmatprep.mubr.f32.mxu1 %v2716_v15 }
 0x6b5   :  { %2791 = vmatmul.mubr.f32.vlgmr.msra.gmra.mrb[10].mxu0 %v7761_v39  ;;  %2876 = vmatmul.mubr.f32.vlgmr.msra.gmra.mrb[10].mxu1 %v7761_v39 }
 0x6b6   :  { %5337 = vmatpush1.bf16.msra.mxu0 %v8604_v30  ;;  %5401 = vmatpush1.bf16.msra.mxu1 %v8605_v13 }
 0x6b7   :  { %2960 = vmatprep.mubr.f32.mxu0 %v2716_v15  ;;  %3041 = vmatprep.mubr.f32.mxu1 %v2716_v15  ;;  %v8987_v15 = vld [vmem:[#allocation132_spill] sm:$0xff] }
 0x6b8   :  { %5339 = vmatprep.subr.bf16.mxu0 %v8606_v25  ;;  %5403 = vmatprep.subr.bf16.mxu1 %v8607_v60 }
 0x6ba   :  { %5341 = vmatpush1.bf16.msra.mxu0 %v8608_v0  ;;  %5405 = vmatpush1.bf16.msra.mxu1 %v8695_v32 }
 0x6bb   :  { %5343 = vmatprep.subr.bf16.mxu0 %v8696_v37  ;;  %5407 = vmatprep.subr.bf16.mxu1 %v8697_v29 }
 0x6be   :  { %5345 = vmatpush1.bf16.msra.mxu0 %v8698_v31  ;;  %5409 = vmatpush1.bf16.msra.mxu1 %v8699_v17 }
 0x6bf   :  { %5347 = vmatprep.subr.bf16.mxu0 %v8700_v4  ;;  %5411 = vmatprep.subr.bf16.mxu1 %v8787_v12 }
 0x6c2   :  { %5349 = vmatpush1.bf16.msra.mxu0 %v8788_v24  ;;  %5413 = vmatpush1.bf16.msra.mxu1 %v8789_v55 }
 0x6c3   :  { %5351 = vmatprep.subr.bf16.mxu0 %v8790_v63  ;;  %5415 = vmatprep.subr.bf16.mxu1 %v8791_v35 }
 0x6c6   :  { %5353 = vmatpush1.bf16.msra.mxu0 %v8792_v58  ;;  %5417 = vmatpush1.bf16.msra.mxu1 %v8793_v10 }
 0x6c7   :  { %5355 = vmatprep.subr.bf16.mxu0 %v8879_v6  ;;  %5419 = vmatprep.subr.bf16.mxu1 %v8795_v22 }
 0x6ca   :  { %5357 = vmatpush1.bf16.msra.mxu0 %v8796_v23  ;;  %5421 = vmatpush1.bf16.msra.mxu1 %v8797_v16 }
 0x6cb   :  { %5359 = vmatprep.subr.bf16.mxu0 %v8798_v43  ;;  %5423 = vmatprep.subr.bf16.mxu1 %v8799_v28 }
 0x6ce   :  { %5361 = vmatpush1.bf16.msra.mxu0 %v8800_v26  ;;  %5425 = vmatpush1.bf16.msra.mxu1 %v8801_v34 }
 0x6cf   :  { %5363 = vmatprep.subr.bf16.mxu0 %v8802_v41  ;;  %5427 = vmatprep.subr.bf16.mxu1 %v8803_v49 }
 0x6d2   :  { %5365 = vmatpush1.bf16.msra.mxu0 %v8718_v8  ;;  %5429 = vmatpush1.bf16.msra.mxu1 %v8804_v51 }
 0x6d3   :  { %5367 = vmatprep.subr.bf16.mxu0 %v8720_v40  ;;  %5431 = vmatprep.subr.bf16.mxu1 %v8721_v36 }
 0x6d6   :  { %5369 = vmatpush1.bf16.msra.mxu0 %v8722_v46  ;;  %5433 = vmatpush1.bf16.msra.mxu1 %v8723_v19 }
 0x6d7   :  { %5371 = vmatprep.subr.bf16.mxu0 %v8724_v18  ;;  %5435 = vmatprep.subr.bf16.mxu1 %v8725_v33 }
 0x6da   :  { %5373 = vmatpush1.bf16.msra.mxu0 %v8726_v47  ;;  %5437 = vmatpush1.bf16.msra.mxu1 %v8727_v48 }
 0x6db   :  { %5375 = vmatprep.subr.bf16.mxu0 %v8728_v50  ;;  %5439 = vmatprep.subr.bf16.mxu1 %v8971_v42 }
 0x6de   :  { %5377 = vmatpush1.bf16.msra.mxu0 %v8972_v62  ;;  %5441 = vmatpush1.bf16.msra.mxu1 %v8973_v5 }
 0x6df   :  { %5379 = vmatprep.subr.bf16.mxu0 %v8974_v11  ;;  %5443 = vmatprep.subr.bf16.mxu1 %v8975_v38 }
 0x6e2   :  { %5381 = vmatpush1.bf16.msra.mxu0 %v8976_v44  ;;  %5445 = vmatpush1.bf16.msra.mxu1 %v8977_v54  ;;  %v8988_v54 = vld [vmem:[#allocation133_spill] sm:$0xff]  ;;  %v9060_v44 = vld [vmem:[#allocation140_spill] sm:$0xff] }
 0x6e3   :  { %5383 = vmatprep.subr.bf16.mxu0 %v8978_v27  ;;  %5447 = vmatprep.subr.bf16.mxu1 %v8979_v59  ;;  %v8989_v27 = vld [vmem:[#allocation134_spill] sm:$0xff]  ;;  %v8990_v59 = vld [vmem:[#allocation135_spill] sm:$0xff] }
 0x6e6   :  { %5385 = vmatpush1.bf16.msra.mxu0 %v8980_v53  ;;  %5449 = vmatpush1.bf16.msra.mxu1 %v8981_v9  ;;  %v8991_v53 = vld [vmem:[#allocation136_spill] sm:$0xff]  ;;  %v8992_v9 = vld [vmem:[#allocation137_spill] sm:$0xff] }
 0x6e7   :  { %5387 = vmatprep.subr.bf16.mxu0 %v8982_v45  ;;  %5451 = vmatprep.subr.bf16.mxu1 %v8983_v57  ;;  %v8993_v45 = vld [vmem:[#allocation138_spill] sm:$0xff]  ;;  %v8994_v57 = vld [vmem:[#allocation11_spill] sm:$0xff] }
 0x6ea   :  { %5389 = vmatpush1.bf16.msra.mxu0 %v8984_v20  ;;  %5453 = vmatpush1.bf16.msra.mxu1 %v8985_v21  ;;  %v8995_v20 = vld [vmem:[#allocation12_spill] sm:$0xff] }
 0x6eb   :  { %5391 = vmatprep.subr.bf16.mxu0 %v8986_v56  ;;  %5455 = vmatprep.subr.bf16.mxu1 %v8987_v15  ;;  %v8996_v15 = vld [vmem:[#allocation13_spill] sm:$0xff]  ;;  %v9005_v56 = vld [vmem:[#allocation22_spill] sm:$0xff] }
 0x6ee   :  { %5393 = vmatpush1.bf16.msra.mxu0 %v8988_v54  ;;  %5457 = vmatpush1.bf16.msra.mxu1 %v8989_v27  ;;  %v8997_v54 = vld [vmem:[#allocation14_spill] sm:$0xff]  ;;  %v8998_v27 = vld [vmem:[#allocation15_spill] sm:$0xff] }
 0x6ef   :  { %5395 = vmatprep.subr.bf16.mxu0 %v8990_v59  ;;  %5459 = vmatprep.subr.bf16.mxu1 %v8991_v53  ;;  %v8999_v59 = vld [vmem:[#allocation16_spill] sm:$0xff]  ;;  %v9000_v53 = vld [vmem:[#allocation17_spill] sm:$0xff] }
 0x6f2   :  { %5397 = vmatpush1.bf16.msra.mxu0 %v8992_v9  ;;  %5461 = vmatpush1.bf16.msra.mxu1 %v8993_v45  ;;  %v9001_v9 = vld [vmem:[#allocation18_spill] sm:$0xff]  ;;  %v9002_v45 = vld [vmem:[#allocation19_spill] sm:$0xff] }
 0x6f3   :  { %5463 = vmatprep.subr.bf16.mxu0 %v8994_v57  ;;  %5527 = vmatprep.subr.bf16.mxu1 %v8995_v20  ;;  %v9003_v57 = vld [vmem:[#allocation20_spill] sm:$0xff]  ;;  %v9004_v20 = vld [vmem:[#allocation21_spill] sm:$0xff] }
 0x6f5   :  { %2961 = vmatmul.mubr.f32.vlgmr.msra.gmra.mrb[26].mxu0 %v7761_v39  ;;  %3042 = vmatmul.mubr.f32.vlgmr.msra.gmra.mrb[26].mxu1 %v7761_v39  ;;  %v9006_v39 = vld [vmem:[#allocation23_spill] sm:$0xff] }
 0x6f6   :  { %5465 = vmatpush1.bf16.msra.mxu0 %v8996_v15  ;;  %5529 = vmatpush1.bf16.msra.mxu1 %v8997_v54  ;;  %v9007_v15 = vld [vmem:[#allocation24_spill] sm:$0xff]  ;;  %v9008_v54 = vld [vmem:[#allocation25_spill] sm:$0xff] }
 0x6f7   :  { %5467 = vmatprep.subr.bf16.mxu0 %v8998_v27  ;;  %5531 = vmatprep.subr.bf16.mxu1 %v8999_v59  ;;  %v9009_v27 = vld [vmem:[#allocation26_spill] sm:$0xff]  ;;  %v9010_v59 = vld [vmem:[#allocation27_spill] sm:$0xff] }
 0x6fa   :  { %5469 = vmatpush1.bf16.msra.mxu0 %v9000_v53  ;;  %5533 = vmatpush1.bf16.msra.mxu1 %v9001_v9  ;;  %v9011_v53 = vld [vmem:[#allocation28_spill] sm:$0xff]  ;;  %v9012_v9 = vld [vmem:[#allocation29_spill] sm:$0xff] }
 0x6fb   :  { %5471 = vmatprep.subr.bf16.mxu0 %v9002_v45  ;;  %5535 = vmatprep.subr.bf16.mxu1 %v9003_v57  ;;  %v9013_v45 = vld [vmem:[#allocation30_spill] sm:$0xff]  ;;  %v9014_v57 = vld [vmem:[#allocation31_spill] sm:$0xff] }
 0x6fe   :  { %5473 = vmatpush1.bf16.msra.mxu0 %v9004_v20  ;;  %5537 = vmatpush1.bf16.msra.mxu1 %v9005_v56  ;;  %v9015_v20 = vld [vmem:[#allocation32_spill] sm:$0xff]  ;;  %v9016_v56 = vld [vmem:[#allocation33_spill] sm:$0xff] }
 0x6ff   :  { %5475 = vmatprep.subr.bf16.mxu0 %v9006_v39  ;;  %5539 = vmatprep.subr.bf16.mxu1 %v9007_v15  ;;  %v9017_v39 = vld [vmem:[#allocation34_spill] sm:$0xff]  ;;  %v9018_v15 = vld [vmem:[#allocation35_spill] sm:$0xff] }
 0x702   :  { %5477 = vmatpush1.bf16.msra.mxu0 %v9008_v54  ;;  %5541 = vmatpush1.bf16.msra.mxu1 %v9009_v27  ;;  %v9019_v54 = vld [vmem:[#allocation36_spill] sm:$0xff]  ;;  %v9020_v27 = vld [vmem:[#allocation37_spill] sm:$0xff] }
 0x703   :  { %5479 = vmatprep.subr.bf16.mxu0 %v9010_v59  ;;  %5543 = vmatprep.subr.bf16.mxu1 %v9011_v53  ;;  %v9021_v59 = vld [vmem:[#allocation38_spill] sm:$0xff]  ;;  %v9022_v53 = vld [vmem:[#allocation39_spill] sm:$0xff] }
 0x706   :  { %5481 = vmatpush1.bf16.msra.mxu0 %v9012_v9  ;;  %5545 = vmatpush1.bf16.msra.mxu1 %v9013_v45  ;;  %v9023_v9 = vld [vmem:[#allocation40_spill] sm:$0xff]  ;;  %v9024_v45 = vld [vmem:[#allocation41_spill] sm:$0xff] }
 0x707   :  { %5483 = vmatprep.subr.bf16.mxu0 %v9014_v57  ;;  %5547 = vmatprep.subr.bf16.mxu1 %v9015_v20  ;;  %v9025_v57 = vld [vmem:[#allocation42_spill] sm:$0xff]  ;;  %v9026_v20 = vld [vmem:[#allocation43_spill] sm:$0xff] }
 0x70a   :  { %5485 = vmatpush1.bf16.msra.mxu0 %v9016_v56  ;;  %5549 = vmatpush1.bf16.msra.mxu1 %v9017_v39  ;;  %v9027_v56 = vld [vmem:[#allocation44_spill] sm:$0xff]  ;;  %v9028_v39 = vld [vmem:[#allocation45_spill] sm:$0xff] }
 0x70b   :  { %5487 = vmatprep.subr.bf16.mxu0 %v9018_v15  ;;  %5551 = vmatprep.subr.bf16.mxu1 %v9019_v54  ;;  %v9029_v15 = vld [vmem:[#allocation46_spill] sm:$0xff]  ;;  %v9030_v54 = vld [vmem:[#allocation47_spill] sm:$0xff] }
 0x70e   :  { %5489 = vmatpush1.bf16.msra.mxu0 %v9020_v27  ;;  %5553 = vmatpush1.bf16.msra.mxu1 %v9021_v59  ;;  %v9031_v27 = vld [vmem:[#allocation48_spill] sm:$0xff]  ;;  %v9032_v59 = vld [vmem:[#allocation49_spill] sm:$0xff] }
 0x70f   :  { %5491 = vmatprep.subr.bf16.mxu0 %v9022_v53  ;;  %5555 = vmatprep.subr.bf16.mxu1 %v9023_v9  ;;  %v9033_v53 = vld [vmem:[#allocation50_spill] sm:$0xff]  ;;  %v9034_v9 = vld [vmem:[#allocation51_spill] sm:$0xff] }
 0x712   :  { %5493 = vmatpush1.bf16.msra.mxu0 %v9024_v45  ;;  %5557 = vmatpush1.bf16.msra.mxu1 %v9025_v57  ;;  %v9035_v45 = vld [vmem:[#allocation52_spill] sm:$0xff]  ;;  %v9036_v57 = vld [vmem:[#allocation53_spill] sm:$0xff] }
 0x713   :  { %5495 = vmatprep.subr.bf16.mxu0 %v9026_v20  ;;  %5559 = vmatprep.subr.bf16.mxu1 %v9027_v56  ;;  %v9037_v20 = vld [vmem:[#allocation54_spill] sm:$0xff]  ;;  %v9038_v56 = vld [vmem:[#allocation55_spill] sm:$0xff] }
 0x716   :  { %5497 = vmatpush1.bf16.msra.mxu0 %v9028_v39  ;;  %5561 = vmatpush1.bf16.msra.mxu1 %v9029_v15  ;;  %v9039_v39 = vld [vmem:[#allocation56_spill] sm:$0xff]  ;;  %v9040_v15 = vld [vmem:[#allocation57_spill] sm:$0xff] }
 0x717   :  { %5499 = vmatprep.subr.bf16.mxu0 %v9030_v54  ;;  %5563 = vmatprep.subr.bf16.mxu1 %v9031_v27  ;;  %v9041_v54 = vld [vmem:[#allocation58_spill] sm:$0xff]  ;;  %v9042_v27 = vld [vmem:[#allocation59_spill] sm:$0xff] }
 0x71a   :  { %5501 = vmatpush1.bf16.msra.mxu0 %v9032_v59  ;;  %5565 = vmatpush1.bf16.msra.mxu1 %v9033_v53  ;;  %v9043_v59 = vld [vmem:[#allocation60_spill] sm:$0xff]  ;;  %v9044_v53 = vld [vmem:[#allocation61_spill] sm:$0xff] }
 0x71b   :  { %5503 = vmatprep.subr.bf16.mxu0 %v9034_v9  ;;  %5567 = vmatprep.subr.bf16.mxu1 %v9035_v45  ;;  %v9045_v9 = vld [vmem:[#allocation62_spill] sm:$0xff]  ;;  %v9046_v45 = vld [vmem:[#allocation63_spill] sm:$0xff] }
 0x71e   :  { %5505 = vmatpush1.bf16.msra.mxu0 %v9036_v57  ;;  %5569 = vmatpush1.bf16.msra.mxu1 %v9037_v20  ;;  %v9047_v57 = vld [vmem:[#allocation64_spill] sm:$0xff]  ;;  %v9048_v20 = vld [vmem:[#allocation65_spill] sm:$0xff] }
 0x71f   :  { %5507 = vmatprep.subr.bf16.mxu0 %v9038_v56  ;;  %5571 = vmatprep.subr.bf16.mxu1 %v9039_v39  ;;  %v9049_v56 = vld [vmem:[#allocation66_spill] sm:$0xff]  ;;  %v9050_v39 = vld [vmem:[#allocation67_spill] sm:$0xff] }
 0x722   :  { %5509 = vmatpush1.bf16.msra.mxu0 %v9040_v15  ;;  %5573 = vmatpush1.bf16.msra.mxu1 %v9041_v54  ;;  %v9051_v15 = vld [vmem:[#allocation68_spill] sm:$0xff]  ;;  %v9052_v54 = vld [vmem:[#allocation69_spill] sm:$0xff] }
 0x723   :  { %5511 = vmatprep.subr.bf16.mxu0 %v9042_v27  ;;  %5575 = vmatprep.subr.bf16.mxu1 %v9043_v59  ;;  %v9053_v27 = vld [vmem:[#allocation70_spill] sm:$0xff]  ;;  %v9054_v59 = vld [vmem:[#allocation71_spill] sm:$0xff] }
 0x726   :  { %5513 = vmatpush1.bf16.msra.mxu0 %v9044_v53  ;;  %5577 = vmatpush1.bf16.msra.mxu1 %v9045_v9  ;;  %v9055_v53 = vld [vmem:[#allocation72_spill] sm:$0xff]  ;;  %v9056_v9 = vld [vmem:[#allocation73_spill] sm:$0xff] }
 0x727   :  { %5515 = vmatprep.subr.bf16.mxu0 %v9046_v45  ;;  %5579 = vmatprep.subr.bf16.mxu1 %v9047_v57  ;;  %v9057_v45 = vld [vmem:[#allocation74_spill] sm:$0xff]  ;;  %v9058_v57 = vld [vmem:[#allocation75_spill] sm:$0xff] }
 0x72a   :  { %5517 = vmatpush1.bf16.msra.mxu0 %v9048_v20  ;;  %5581 = vmatpush1.bf16.msra.mxu1 %v9049_v56  ;;  %v9059_v20 = vld [vmem:[#allocation76_spill] sm:$0xff] }
 0x72b   :  { %5519 = vmatprep.subr.bf16.mxu0 %v9050_v39  ;;  %5583 = vmatprep.subr.bf16.mxu1 %v9051_v15 }
 0x72e   :  { %5521 = vmatpush1.bf16.msra.mxu0 %v9052_v54  ;;  %5585 = vmatpush1.bf16.msra.mxu1 %v9053_v27 }
 0x72f   :  { %5523 = vmatprep.subr.bf16.mxu0 %v9054_v59  ;;  %5587 = vmatprep.subr.bf16.mxu1 %v9055_v53 }
 0x732   :  { %5525 = vmatpush1.bf16.msra.mxu0 %v9056_v9  ;;  %5589 = vmatpush1.bf16.msra.mxu1 %v9057_v45 }
 0x733   :  { %5591 = vmatprep.subr.bf16.mxu0 %v9058_v57  ;;  %5655 = vmatprep.subr.bf16.mxu1 %v9059_v20 }
 0x788   :  { %v2792_v56 = vpop.f32.mrb[10].mxu0  ;;  %v2877_v39 = vpop.f32.mrb[10].mxu1 }
 0x789   :  { %v2794_v21 = vpop.f32.mrb[11].mxu0  ;;  %v2879_v15 = vpop.f32.mrb[11].mxu1  ;;  %v5984_v54 = vadd.f32 %v2792_v56, %v9060_v44  ;;  %v6000_v27 = vadd.f32 %v2877_v39, %v8690_v3 }
 0x78a   :  { %v5985_v59 = vadd.f32 %v2794_v21, %v8691_v2  ;;  %v6001_v53 = vadd.f32 %v2879_v15, %v8692_v52 }
 0x78b   :  { %v3867_v38 = vmul.f32 -1.442695, %v5984_v54  ;;  %v3869_v9 = vmul.f32 -1.442695, %v6000_v27  ;;  %v9061_v27 = vld [vmem:[#allocation144_spill] sm:$0xff] }
 0x78c   :  { %v3868_v11 = vmul.f32 -1.442695, %v5985_v59  ;;  %v3870_v45 = vmul.f32 -1.442695, %v6001_v53  ;;  %v9062_v53 = vld [vmem:[#allocation145_spill] sm:$0xff] }
 0x78d   :  { %6273 = vpow2.f32 %v3867_v38 }
 0x78e   :  { %6275 = vpow2.f32 %v3869_v9 }
 0x78f   :  { %6277 = vpow2.f32 %v3868_v11 }
 0x790   :  { %6279 = vpow2.f32 %v3870_v45 }
 0x797   :  { %v6274_v20 = vpop.eup %6273 }
 0x798   :  { %v6276_v57 = vpop.eup %6275  ;;  %v2805_v42 = vadd.f32 1.0, %v6274_v20 }
 0x799   :  { %v6278_v5 = vpop.eup %6277  ;;  %v2890_v56 = vadd.f32 1.0, %v6276_v57 }
 0x79a   :  { %v6280_v62 = vpop.eup %6279  ;;  %v2806_v44 = vadd.f32 1.0, %v6278_v5  ;;  %6281 = vrcp.f32 %v2805_v42 }
 0x79b   :  { %v2891_v39 = vadd.f32 1.0, %v6280_v62  ;;  %6283 = vrcp.f32 %v2890_v56 }
 0x79c   :  { %6285 = vrcp.f32 %v2806_v44 }
 0x79d   :  { %6287 = vrcp.f32 %v2891_v39 }
 0x7a4   :  { %v6282_v42 = vpop.eup %6281 }
 0x7a5   :  { %v6284_v5 = vpop.eup %6283 }
 0x7a6   :  { %v6286_v44 = vpop.eup %6285 }
 0x7a7   :  { %v6288_v20 = vpop.eup %6287 }
 0x7c8   :  { %v2962_v21 = vpop.f32.mrb[26].mxu0  ;;  %v3043_v15 = vpop.f32.mrb[26].mxu1 }
 0x7c9   :  { %v6016_v54 = vadd.f32 %v2962_v21, %v7143_v14  ;;  %v6032_v38 = vadd.f32 %v3043_v15, %v9061_v27  ;;  %v2964_v59 = vpop.f32.mrb[27].mxu0  ;;  %v3045_v11 = vpop.f32.mrb[27].mxu1  ;;  %v2971_v15 = vmul.f32 %v6284_v5, %v7755_v1 }
 0x7ca   :  { %v6017_v9 = vadd.f32 %v2964_v59, %v9062_v53  ;;  %v6033_v45 = vadd.f32 %v3045_v11, %v7149_v61  ;;  %v2972_v59 = vmul.f32 %v6288_v20, %v7757_v7  ;;  %v9066_v20 = vld [vmem:[#allocation119_spill] sm:$0xff] }
 0x7cb   :  { %6289 = vtanh.f32 %v6016_v54  ;;  %v3871_v57 = vmul.f32 -1.442695, %v6032_v38 }
 0x7cc   :  { %6291 = vtanh.f32 %v6017_v9  ;;  %v3872_v62 = vmul.f32 -1.442695, %v6033_v45 }
 0x7cd   :  { %6293 = vpow2.f32 %v3871_v57 }
 0x7ce   :  { %6295 = vpow2.f32 %v3872_v62 }
 0x7d5   :  { %v6290_v56 = vpop.eup %6289 }
 0x7d6   :  { %v6292_v21 = vpop.eup %6291  ;;  %v2973_v27 = vmul.f32 %v6290_v56, %v6282_v42  ;;  %v9067_v56 = vld [vmem:[#allocation120_spill] sm:$0xff] }
 0x7d7   :  { %v6294_v39 = vpop.eup %6293  ;;  %v2974_v53 = vmul.f32 %v6292_v21, %v6286_v44  ;;  %v9065_v44 = vld [vmem:[#allocation118_spill] sm:$0xff]  ;;  %v9068_v21 = vld [vmem:[#allocation121_spill] sm:$0xff] }
 0x7d8   :  { %v6296_v11 = vpop.eup %6295  ;;  %v7905_v54 = vadd.f32 %v2973_v27, %v2971_v15  ;;  %v3056_v38 = vadd.f32 1.0, %v6294_v39  ;;  %v9063_v27 = vld [vmem:[#allocation116_spill] sm:$0xff]  ;;  %v9069_v15 = vld [vmem:[#allocation122_spill] sm:$0xff]  ;;  %v9070_v39 = vld [vmem:[#allocation123_spill] sm:$0xff] }
 0x7d9   :  { %v7907_v9 = vadd.f32 %v2974_v53, %v2972_v59  ;;  %v3057_v45 = vadd.f32 1.0, %v6296_v11  ;;  %v9064_v53 = vld [vmem:[#allocation117_spill] sm:$0xff]  ;;  %v9071_v59 = vld [vmem:[#allocation124_spill] sm:$0xff] }
 0x7da   :  { %6297 = vtanh.f32 %v7905_v54  ;;  %v9072_v11 = vld [vmem:[#allocation125_spill] sm:$0xff] }
 0x7db   :  { %6299 = vrcp.f32 %v3056_v38  ;;  %v9073_v38 = vld [vmem:[#allocation126_spill] sm:$0xff] }
 0x7dc   :  { %6301 = vtanh.f32 %v7907_v9 }
 0x7dd   :  { %6303 = vrcp.f32 %v3057_v45  ;;  %v9074_v45 = vld [vmem:[#allocation127_spill] sm:$0xff] }
 0x7e4   :  { %v6298_v57 = vpop.eup %6297 }
 0x7e5   :  { %v6300_v1 = vpop.eup %6299 }
 0x7e6   :  { %v6302_v62 = vpop.eup %6301  ;;  %v7911_v7 = vmul.f32 %v6300_v1, %v6298_v57  ;;  %v9075_v57 = vld [vmem:[#allocation128_spill] sm:$0xff]  ;;  %v9076_v1 = vld [vmem:[#allocation129_spill] sm:$0xff] }
 0x7e7   :  { %v6304_v42 = vpop.eup %6303 }
 0x7e8   :  { %v3065_v5 = vmul.f32 %v6304_v42, %v6302_v62  ;;  %v9077_v62 = vld [vmem:[#allocation130_spill] sm:$0xff]  ;;  %v9078_v42 = vld [vmem:[#allocation131_spill] sm:$0xff] }
 0x7ea   :  { %3139 = vmatprep.mubr.f32.mxu0 %v3065_v5  ;;  %3224 = vmatprep.mubr.f32.mxu1 %v3065_v5 }
 0x7eb   :  { %3140 = vmatmul.mubr.f32.vlgmr.msra.gmra.mrb[12].mxu0 %v7911_v7  ;;  %3225 = vmatmul.mubr.f32.vlgmr.msra.gmra.mrb[12].mxu1 %v7911_v7 }
 0x7ec   :  { %5593 = vmatpush1.bf16.msra.mxu0 %v8604_v30  ;;  %5657 = vmatpush1.bf16.msra.mxu1 %v8605_v13 }
 0x7ed   :  { %3309 = vmatprep.mubr.f32.mxu0 %v3065_v5  ;;  %3390 = vmatprep.mubr.f32.mxu1 %v3065_v5  ;;  %v9079_v5 = vld [vmem:[#allocation132_spill] sm:$0xff] }
 0x7ee   :  { %5595 = vmatprep.subr.bf16.mxu0 %v8606_v25  ;;  %5659 = vmatprep.subr.bf16.mxu1 %v8607_v60 }
 0x7f0   :  { %5597 = vmatpush1.bf16.msra.mxu0 %v8608_v0  ;;  %5661 = vmatpush1.bf16.msra.mxu1 %v8695_v32 }
 0x7f1   :  { %5599 = vmatprep.subr.bf16.mxu0 %v8696_v37  ;;  %5663 = vmatprep.subr.bf16.mxu1 %v8697_v29 }
 0x7f4   :  { %5601 = vmatpush1.bf16.msra.mxu0 %v8698_v31  ;;  %5665 = vmatpush1.bf16.msra.mxu1 %v8699_v17 }
 0x7f5   :  { %5603 = vmatprep.subr.bf16.mxu0 %v8700_v4  ;;  %5667 = vmatprep.subr.bf16.mxu1 %v8787_v12 }
 0x7f8   :  { %5605 = vmatpush1.bf16.msra.mxu0 %v8788_v24  ;;  %5669 = vmatpush1.bf16.msra.mxu1 %v8789_v55 }
 0x7f9   :  { %5607 = vmatprep.subr.bf16.mxu0 %v8790_v63  ;;  %5671 = vmatprep.subr.bf16.mxu1 %v8791_v35 }
 0x7fc   :  { %5609 = vmatpush1.bf16.msra.mxu0 %v8792_v58  ;;  %5673 = vmatpush1.bf16.msra.mxu1 %v8793_v10 }
 0x7fd   :  { %5611 = vmatprep.subr.bf16.mxu0 %v8879_v6  ;;  %5675 = vmatprep.subr.bf16.mxu1 %v8795_v22 }
 0x800   :  { %5613 = vmatpush1.bf16.msra.mxu0 %v8796_v23  ;;  %5677 = vmatpush1.bf16.msra.mxu1 %v8797_v16 }
 0x801   :  { %5615 = vmatprep.subr.bf16.mxu0 %v8798_v43  ;;  %5679 = vmatprep.subr.bf16.mxu1 %v8799_v28 }
 0x804   :  { %5617 = vmatpush1.bf16.msra.mxu0 %v8800_v26  ;;  %5681 = vmatpush1.bf16.msra.mxu1 %v8801_v34 }
 0x805   :  { %5619 = vmatprep.subr.bf16.mxu0 %v8802_v41  ;;  %5683 = vmatprep.subr.bf16.mxu1 %v8803_v49 }
 0x808   :  { %5621 = vmatpush1.bf16.msra.mxu0 %v8718_v8  ;;  %5685 = vmatpush1.bf16.msra.mxu1 %v8804_v51 }
 0x809   :  { %5623 = vmatprep.subr.bf16.mxu0 %v8720_v40  ;;  %5687 = vmatprep.subr.bf16.mxu1 %v8721_v36 }
 0x80c   :  { %5625 = vmatpush1.bf16.msra.mxu0 %v8722_v46  ;;  %5689 = vmatpush1.bf16.msra.mxu1 %v8723_v19 }
 0x80d   :  { %5627 = vmatprep.subr.bf16.mxu0 %v8724_v18  ;;  %5691 = vmatprep.subr.bf16.mxu1 %v8725_v33 }
 0x810   :  { %5629 = vmatpush1.bf16.msra.mxu0 %v8726_v47  ;;  %5693 = vmatpush1.bf16.msra.mxu1 %v8727_v48 }
 0x811   :  { %5631 = vmatprep.subr.bf16.mxu0 %v8728_v50  ;;  %5695 = vmatprep.subr.bf16.mxu1 %v9063_v27 }
 0x814   :  { %5633 = vmatpush1.bf16.msra.mxu0 %v9064_v53  ;;  %5697 = vmatpush1.bf16.msra.mxu1 %v9065_v44 }
 0x815   :  { %5635 = vmatprep.subr.bf16.mxu0 %v9066_v20  ;;  %5699 = vmatprep.subr.bf16.mxu1 %v9067_v56 }
 0x818   :  { %5637 = vmatpush1.bf16.msra.mxu0 %v9068_v21  ;;  %5701 = vmatpush1.bf16.msra.mxu1 %v9069_v15  ;;  %v9080_v15 = vld [vmem:[#allocation133_spill] sm:$0xff]  ;;  %v9152_v21 = vld [vmem:[#allocation140_spill] sm:$0xff] }
 0x819   :  { %5639 = vmatprep.subr.bf16.mxu0 %v9070_v39  ;;  %5703 = vmatprep.subr.bf16.mxu1 %v9071_v59  ;;  %v9081_v39 = vld [vmem:[#allocation134_spill] sm:$0xff]  ;;  %v9082_v59 = vld [vmem:[#allocation135_spill] sm:$0xff] }
 0x81c   :  { %5641 = vmatpush1.bf16.msra.mxu0 %v9072_v11  ;;  %5705 = vmatpush1.bf16.msra.mxu1 %v9073_v38  ;;  %v9083_v11 = vld [vmem:[#allocation136_spill] sm:$0xff]  ;;  %v9084_v38 = vld [vmem:[#allocation137_spill] sm:$0xff] }
 0x81d   :  { %5643 = vmatprep.subr.bf16.mxu0 %v9074_v45  ;;  %5707 = vmatprep.subr.bf16.mxu1 %v9075_v57  ;;  %v9085_v45 = vld [vmem:[#allocation138_spill] sm:$0xff]  ;;  %v9086_v57 = vld [vmem:[#allocation11_spill] sm:$0xff] }
 0x820   :  { %5645 = vmatpush1.bf16.msra.mxu0 %v9076_v1  ;;  %5709 = vmatpush1.bf16.msra.mxu1 %v9077_v62  ;;  %v9087_v1 = vld [vmem:[#allocation12_spill] sm:$0xff] }
 0x821   :  { %5647 = vmatprep.subr.bf16.mxu0 %v9078_v42  ;;  %5711 = vmatprep.subr.bf16.mxu1 %v9079_v5  ;;  %v9088_v5 = vld [vmem:[#allocation13_spill] sm:$0xff]  ;;  %v9097_v42 = vld [vmem:[#allocation22_spill] sm:$0xff] }
 0x824   :  { %5649 = vmatpush1.bf16.msra.mxu0 %v9080_v15  ;;  %5713 = vmatpush1.bf16.msra.mxu1 %v9081_v39  ;;  %v9089_v15 = vld [vmem:[#allocation14_spill] sm:$0xff]  ;;  %v9090_v39 = vld [vmem:[#allocation15_spill] sm:$0xff] }
 0x825   :  { %5651 = vmatprep.subr.bf16.mxu0 %v9082_v59  ;;  %5715 = vmatprep.subr.bf16.mxu1 %v9083_v11  ;;  %v9091_v59 = vld [vmem:[#allocation16_spill] sm:$0xff]  ;;  %v9092_v11 = vld [vmem:[#allocation17_spill] sm:$0xff] }
 0x828   :  { %5653 = vmatpush1.bf16.msra.mxu0 %v9084_v38  ;;  %5717 = vmatpush1.bf16.msra.mxu1 %v9085_v45  ;;  %v9093_v38 = vld [vmem:[#allocation18_spill] sm:$0xff]  ;;  %v9094_v45 = vld [vmem:[#allocation19_spill] sm:$0xff] }
 0x829   :  { %5719 = vmatprep.subr.bf16.mxu0 %v9086_v57  ;;  %5783 = vmatprep.subr.bf16.mxu1 %v9087_v1  ;;  %v9095_v57 = vld [vmem:[#allocation20_spill] sm:$0xff]  ;;  %v9096_v1 = vld [vmem:[#allocation21_spill] sm:$0xff] }
 0x82b   :  { %3310 = vmatmul.mubr.f32.vlgmr.msra.gmra.mrb[28].mxu0 %v7911_v7  ;;  %3391 = vmatmul.mubr.f32.vlgmr.msra.gmra.mrb[28].mxu1 %v7911_v7  ;;  %v9098_v7 = vld [vmem:[#allocation23_spill] sm:$0xff] }
 0x82c   :  { %5721 = vmatpush1.bf16.msra.mxu0 %v9088_v5  ;;  %5785 = vmatpush1.bf16.msra.mxu1 %v9089_v15  ;;  %v9099_v5 = vld [vmem:[#allocation24_spill] sm:$0xff]  ;;  %v9100_v15 = vld [vmem:[#allocation25_spill] sm:$0xff] }
 0x82d   :  { %5723 = vmatprep.subr.bf16.mxu0 %v9090_v39  ;;  %5787 = vmatprep.subr.bf16.mxu1 %v9091_v59  ;;  %v9101_v39 = vld [vmem:[#allocation26_spill] sm:$0xff]  ;;  %v9102_v59 = vld [vmem:[#allocation27_spill] sm:$0xff] }
 0x830   :  { %5725 = vmatpush1.bf16.msra.mxu0 %v9092_v11  ;;  %5789 = vmatpush1.bf16.msra.mxu1 %v9093_v38  ;;  %v9103_v11 = vld [vmem:[#allocation28_spill] sm:$0xff]  ;;  %v9104_v38 = vld [vmem:[#allocation29_spill] sm:$0xff] }
 0x831   :  { %5727 = vmatprep.subr.bf16.mxu0 %v9094_v45  ;;  %5791 = vmatprep.subr.bf16.mxu1 %v9095_v57  ;;  %v9105_v45 = vld [vmem:[#allocation30_spill] sm:$0xff]  ;;  %v9106_v57 = vld [vmem:[#allocation31_spill] sm:$0xff] }
 0x834   :  { %5729 = vmatpush1.bf16.msra.mxu0 %v9096_v1  ;;  %5793 = vmatpush1.bf16.msra.mxu1 %v9097_v42  ;;  %v9107_v1 = vld [vmem:[#allocation32_spill] sm:$0xff]  ;;  %v9108_v42 = vld [vmem:[#allocation33_spill] sm:$0xff] }
 0x835   :  { %5731 = vmatprep.subr.bf16.mxu0 %v9098_v7  ;;  %5795 = vmatprep.subr.bf16.mxu1 %v9099_v5  ;;  %v9109_v7 = vld [vmem:[#allocation34_spill] sm:$0xff]  ;;  %v9110_v5 = vld [vmem:[#allocation35_spill] sm:$0xff] }
 0x838   :  { %5733 = vmatpush1.bf16.msra.mxu0 %v9100_v15  ;;  %5797 = vmatpush1.bf16.msra.mxu1 %v9101_v39  ;;  %v9111_v15 = vld [vmem:[#allocation36_spill] sm:$0xff]  ;;  %v9112_v39 = vld [vmem:[#allocation37_spill] sm:$0xff] }
 0x839   :  { %5735 = vmatprep.subr.bf16.mxu0 %v9102_v59  ;;  %5799 = vmatprep.subr.bf16.mxu1 %v9103_v11  ;;  %v9113_v59 = vld [vmem:[#allocation38_spill] sm:$0xff]  ;;  %v9114_v11 = vld [vmem:[#allocation39_spill] sm:$0xff] }
 0x83c   :  { %5737 = vmatpush1.bf16.msra.mxu0 %v9104_v38  ;;  %5801 = vmatpush1.bf16.msra.mxu1 %v9105_v45  ;;  %v9115_v38 = vld [vmem:[#allocation40_spill] sm:$0xff]  ;;  %v9116_v45 = vld [vmem:[#allocation41_spill] sm:$0xff] }
 0x83d   :  { %5739 = vmatprep.subr.bf16.mxu0 %v9106_v57  ;;  %5803 = vmatprep.subr.bf16.mxu1 %v9107_v1  ;;  %v9117_v57 = vld [vmem:[#allocation42_spill] sm:$0xff]  ;;  %v9118_v1 = vld [vmem:[#allocation43_spill] sm:$0xff] }
 0x840   :  { %5741 = vmatpush1.bf16.msra.mxu0 %v9108_v42  ;;  %5805 = vmatpush1.bf16.msra.mxu1 %v9109_v7  ;;  %v9119_v42 = vld [vmem:[#allocation44_spill] sm:$0xff]  ;;  %v9120_v7 = vld [vmem:[#allocation45_spill] sm:$0xff] }
 0x841   :  { %5743 = vmatprep.subr.bf16.mxu0 %v9110_v5  ;;  %5807 = vmatprep.subr.bf16.mxu1 %v9111_v15  ;;  %v9121_v5 = vld [vmem:[#allocation46_spill] sm:$0xff]  ;;  %v9122_v15 = vld [vmem:[#allocation47_spill] sm:$0xff] }
 0x844   :  { %5745 = vmatpush1.bf16.msra.mxu0 %v9112_v39  ;;  %5809 = vmatpush1.bf16.msra.mxu1 %v9113_v59  ;;  %v9123_v39 = vld [vmem:[#allocation48_spill] sm:$0xff]  ;;  %v9124_v59 = vld [vmem:[#allocation49_spill] sm:$0xff] }
 0x845   :  { %5747 = vmatprep.subr.bf16.mxu0 %v9114_v11  ;;  %5811 = vmatprep.subr.bf16.mxu1 %v9115_v38  ;;  %v9125_v11 = vld [vmem:[#allocation50_spill] sm:$0xff]  ;;  %v9126_v38 = vld [vmem:[#allocation51_spill] sm:$0xff] }
 0x848   :  { %5749 = vmatpush1.bf16.msra.mxu0 %v9116_v45  ;;  %5813 = vmatpush1.bf16.msra.mxu1 %v9117_v57  ;;  %v9127_v45 = vld [vmem:[#allocation52_spill] sm:$0xff]  ;;  %v9128_v57 = vld [vmem:[#allocation53_spill] sm:$0xff] }
 0x849   :  { %5751 = vmatprep.subr.bf16.mxu0 %v9118_v1  ;;  %5815 = vmatprep.subr.bf16.mxu1 %v9119_v42  ;;  %v9129_v1 = vld [vmem:[#allocation54_spill] sm:$0xff]  ;;  %v9130_v42 = vld [vmem:[#allocation55_spill] sm:$0xff] }
 0x84c   :  { %5753 = vmatpush1.bf16.msra.mxu0 %v9120_v7  ;;  %5817 = vmatpush1.bf16.msra.mxu1 %v9121_v5  ;;  %v9131_v7 = vld [vmem:[#allocation56_spill] sm:$0xff]  ;;  %v9132_v5 = vld [vmem:[#allocation57_spill] sm:$0xff] }
 0x84d   :  { %5755 = vmatprep.subr.bf16.mxu0 %v9122_v15  ;;  %5819 = vmatprep.subr.bf16.mxu1 %v9123_v39  ;;  %v9133_v15 = vld [vmem:[#allocation58_spill] sm:$0xff]  ;;  %v9134_v39 = vld [vmem:[#allocation59_spill] sm:$0xff] }
 0x850   :  { %5757 = vmatpush1.bf16.msra.mxu0 %v9124_v59  ;;  %5821 = vmatpush1.bf16.msra.mxu1 %v9125_v11  ;;  %v9135_v59 = vld [vmem:[#allocation60_spill] sm:$0xff]  ;;  %v9136_v11 = vld [vmem:[#allocation61_spill] sm:$0xff] }
 0x851   :  { %5759 = vmatprep.subr.bf16.mxu0 %v9126_v38  ;;  %5823 = vmatprep.subr.bf16.mxu1 %v9127_v45  ;;  %v9137_v38 = vld [vmem:[#allocation62_spill] sm:$0xff]  ;;  %v9138_v45 = vld [vmem:[#allocation63_spill] sm:$0xff] }
 0x854   :  { %5761 = vmatpush1.bf16.msra.mxu0 %v9128_v57  ;;  %5825 = vmatpush1.bf16.msra.mxu1 %v9129_v1  ;;  %v9139_v57 = vld [vmem:[#allocation64_spill] sm:$0xff]  ;;  %v9140_v1 = vld [vmem:[#allocation65_spill] sm:$0xff] }
 0x855   :  { %5763 = vmatprep.subr.bf16.mxu0 %v9130_v42  ;;  %5827 = vmatprep.subr.bf16.mxu1 %v9131_v7  ;;  %v9141_v42 = vld [vmem:[#allocation66_spill] sm:$0xff]  ;;  %v9142_v7 = vld [vmem:[#allocation67_spill] sm:$0xff] }
 0x858   :  { %5765 = vmatpush1.bf16.msra.mxu0 %v9132_v5  ;;  %5829 = vmatpush1.bf16.msra.mxu1 %v9133_v15  ;;  %v9143_v5 = vld [vmem:[#allocation68_spill] sm:$0xff]  ;;  %v9144_v15 = vld [vmem:[#allocation69_spill] sm:$0xff] }
 0x859   :  { %5767 = vmatprep.subr.bf16.mxu0 %v9134_v39  ;;  %5831 = vmatprep.subr.bf16.mxu1 %v9135_v59  ;;  %v9145_v39 = vld [vmem:[#allocation70_spill] sm:$0xff]  ;;  %v9146_v59 = vld [vmem:[#allocation71_spill] sm:$0xff] }
 0x85c   :  { %5769 = vmatpush1.bf16.msra.mxu0 %v9136_v11  ;;  %5833 = vmatpush1.bf16.msra.mxu1 %v9137_v38  ;;  %v9147_v11 = vld [vmem:[#allocation72_spill] sm:$0xff]  ;;  %v9148_v38 = vld [vmem:[#allocation73_spill] sm:$0xff] }
 0x85d   :  { %5771 = vmatprep.subr.bf16.mxu0 %v9138_v45  ;;  %5835 = vmatprep.subr.bf16.mxu1 %v9139_v57  ;;  %v9149_v45 = vld [vmem:[#allocation74_spill] sm:$0xff]  ;;  %v9150_v57 = vld [vmem:[#allocation75_spill] sm:$0xff] }
 0x860   :  { %5773 = vmatpush1.bf16.msra.mxu0 %v9140_v1  ;;  %5837 = vmatpush1.bf16.msra.mxu1 %v9141_v42  ;;  %v9151_v1 = vld [vmem:[#allocation76_spill] sm:$0xff] }
 0x861   :  { %5775 = vmatprep.subr.bf16.mxu0 %v9142_v7  ;;  %5839 = vmatprep.subr.bf16.mxu1 %v9143_v5 }
 0x864   :  { %5777 = vmatpush1.bf16.msra.mxu0 %v9144_v15  ;;  %5841 = vmatpush1.bf16.msra.mxu1 %v9145_v39 }
 0x865   :  { %5779 = vmatprep.subr.bf16.mxu0 %v9146_v59  ;;  %5843 = vmatprep.subr.bf16.mxu1 %v9147_v11 }
 0x868   :  { %5781 = vmatpush1.bf16.msra.mxu0 %v9148_v38  ;;  %5845 = vmatpush1.bf16.msra.mxu1 %v9149_v45 }
 0x869   :  { %5847 = vmatprep.subr.bf16.mxu0 %v9150_v57  ;;  %5911 = vmatprep.subr.bf16.mxu1 %v9151_v1 }
 0x8be   :  { %v3141_v42 = vpop.f32.mrb[12].mxu0  ;;  %v3226_v7 = vpop.f32.mrb[12].mxu1 }
 0x8bf   :  { %v3143_v62 = vpop.f32.mrb[13].mxu0  ;;  %v3228_v5 = vpop.f32.mrb[13].mxu1  ;;  %v5986_v15 = vadd.f32 %v3141_v42, %v9152_v21  ;;  %v6002_v39 = vadd.f32 %v3226_v7, %v8690_v3 }
 0x8c0   :  { %v5987_v59 = vadd.f32 %v3143_v62, %v8691_v2  ;;  %v6003_v11 = vadd.f32 %v3228_v5, %v8692_v52 }
 0x8c1   :  { %v3873_v56 = vmul.f32 -1.442695, %v5986_v15  ;;  %v3875_v38 = vmul.f32 -1.442695, %v6002_v39  ;;  %v9153_v39 = vld [vmem:[#allocation144_spill] sm:$0xff] }
 0x8c2   :  { %v3874_v20 = vmul.f32 -1.442695, %v5987_v59  ;;  %v3876_v45 = vmul.f32 -1.442695, %v6003_v11  ;;  %v9154_v11 = vld [vmem:[#allocation145_spill] sm:$0xff] }
 0x8c3   :  { %6305 = vpow2.f32 %v3873_v56 }
 0x8c4   :  { %6307 = vpow2.f32 %v3875_v38 }
 0x8c5   :  { %6309 = vpow2.f32 %v3874_v20 }
 0x8c6   :  { %6311 = vpow2.f32 %v3876_v45 }
 0x8cd   :  { %v6306_v57 = vpop.eup %6305 }
 0x8ce   :  { %v6308_v1 = vpop.eup %6307  ;;  %v3154_v27 = vadd.f32 1.0, %v6306_v57 }
 0x8cf   :  { %v6310_v44 = vpop.eup %6309  ;;  %v3239_v42 = vadd.f32 1.0, %v6308_v1 }
 0x8d0   :  { %v6312_v53 = vpop.eup %6311  ;;  %v3155_v21 = vadd.f32 1.0, %v6310_v44  ;;  %6313 = vrcp.f32 %v3154_v27 }
 0x8d1   :  { %v3240_v7 = vadd.f32 1.0, %v6312_v53  ;;  %6315 = vrcp.f32 %v3239_v42 }
 0x8d2   :  { %6317 = vrcp.f32 %v3155_v21 }
 0x8d3   :  { %6319 = vrcp.f32 %v3240_v7 }
 0x8da   :  { %v6314_v27 = vpop.eup %6313 }
 0x8db   :  { %v6316_v44 = vpop.eup %6315 }
 0x8dc   :  { %v6318_v21 = vpop.eup %6317 }
 0x8dd   :  { %v6320_v1 = vpop.eup %6319 }
 0x8fe   :  { %v3311_v62 = vpop.f32.mrb[28].mxu0  ;;  %v3392_v5 = vpop.f32.mrb[28].mxu1 }
 0x8ff   :  { %v6018_v15 = vadd.f32 %v3311_v62, %v7143_v14  ;;  %v6034_v56 = vadd.f32 %v3392_v5, %v9153_v39  ;;  %v3313_v59 = vpop.f32.mrb[29].mxu0  ;;  %v3394_v20 = vpop.f32.mrb[29].mxu1  ;;  %v3320_v5 = vmul.f32 %v6316_v44, %v7905_v54 }
 0x900   :  { %v6019_v38 = vadd.f32 %v3313_v59, %v9154_v11  ;;  %v6035_v45 = vadd.f32 %v3394_v20, %v7149_v61  ;;  %v3321_v59 = vmul.f32 %v6320_v1, %v7907_v9 }
 0x901   :  { %6321 = vtanh.f32 %v6018_v15  ;;  %v3877_v57 = vmul.f32 -1.442695, %v6034_v56 }
 0x902   :  { %6323 = vtanh.f32 %v6019_v38  ;;  %v3878_v53 = vmul.f32 -1.442695, %v6035_v45 }
 0x903   :  { %6325 = vpow2.f32 %v3877_v57 }
 0x904   :  { %6327 = vpow2.f32 %v3878_v53 }
 0x90b   :  { %v6322_v42 = vpop.eup %6321 }
 0x90c   :  { %v6324_v62 = vpop.eup %6323  ;;  %v3322_v39 = vmul.f32 %v6322_v42, %v6314_v27 }
 0x90d   :  { %v6326_v7 = vpop.eup %6325  ;;  %v3323_v11 = vmul.f32 %v6324_v62, %v6318_v21  ;;  %v9179_v62 = vld [vmem:[#allocation144_spill] sm:$0xff] }
 0x90e   :  { %v6328_v20 = vpop.eup %6327  ;;  %v8055_v15 = vadd.f32 %v3322_v39, %v3320_v5  ;;  %v3405_v56 = vadd.f32 1.0, %v6326_v7 }
 0x90f   :  { %v8057_v38 = vadd.f32 %v3323_v11, %v3321_v59  ;;  %v3406_v45 = vadd.f32 1.0, %v6328_v20  ;;  %v9180_v20 = vld [vmem:[#allocation145_spill] sm:$0xff] }
 0x910   :  { %6329 = vtanh.f32 %v8055_v15 }
 0x911   :  { %6331 = vrcp.f32 %v3405_v56 }
 0x912   :  { %6333 = vtanh.f32 %v8057_v38 }
 0x913   :  { %6335 = vrcp.f32 %v3406_v45 }
 0x91a   :  { %v6330_v57 = vpop.eup %6329 }
 0x91b   :  { %v6332_v54 = vpop.eup %6331 }
 0x91c   :  { %v6334_v53 = vpop.eup %6333  ;;  %v8061_v9 = vmul.f32 %v6332_v54, %v6330_v57 }
 0x91d   :  { %v6336_v27 = vpop.eup %6335 }
 0x91e   :  { %v3414_v44 = vmul.f32 %v6336_v27, %v6334_v53 }
 0x920   :  { %3488 = vmatprep.mubr.f32.mxu0 %v3414_v44  ;;  %3573 = vmatprep.mubr.f32.mxu1 %v3414_v44 }
 0x921   :  { %3489 = vmatmul.mubr.f32.vlgmr.msra.gmra.mrb[14].mxu0 %v8061_v9  ;;  %3574 = vmatmul.mubr.f32.vlgmr.msra.gmra.mrb[14].mxu1 %v8061_v9 }
 0x922   :  { %5849 = vmatpush1.bf16.msra.mxu0 %v8604_v30  ;;  %5913 = vmatpush1.bf16.msra.mxu1 %v8605_v13  ;;  %v9155_v30 = vld [vmem:[#allocation116_spill] sm:$0xff]  ;;  %v9156_v13 = vld [vmem:[#allocation117_spill] sm:$0xff] }
 0x923   :  { %3658 = vmatprep.mubr.f32.mxu0 %v3414_v44  ;;  %3739 = vmatprep.mubr.f32.mxu1 %v3414_v44 }
 0x924   :  { %5851 = vmatprep.subr.bf16.mxu0 %v8606_v25  ;;  %5915 = vmatprep.subr.bf16.mxu1 %v8607_v60  ;;  %v9157_v25 = vld [vmem:[#allocation118_spill] sm:$0xff]  ;;  %v9158_v60 = vld [vmem:[#allocation119_spill] sm:$0xff] }
 0x926   :  { %5853 = vmatpush1.bf16.msra.mxu0 %v8608_v0  ;;  %5917 = vmatpush1.bf16.msra.mxu1 %v8695_v32  ;;  %v9159_v0 = vld [vmem:[#allocation120_spill] sm:$0xff]  ;;  %v9160_v32 = vld [vmem:[#allocation121_spill] sm:$0xff] }
 0x927   :  { %5855 = vmatprep.subr.bf16.mxu0 %v8696_v37  ;;  %5919 = vmatprep.subr.bf16.mxu1 %v8697_v29  ;;  %v9161_v37 = vld [vmem:[#allocation122_spill] sm:$0xff]  ;;  %v9162_v29 = vld [vmem:[#allocation123_spill] sm:$0xff] }
 0x92a   :  { %5857 = vmatpush1.bf16.msra.mxu0 %v8698_v31  ;;  %5921 = vmatpush1.bf16.msra.mxu1 %v8699_v17  ;;  %v9163_v31 = vld [vmem:[#allocation124_spill] sm:$0xff]  ;;  %v9164_v17 = vld [vmem:[#allocation125_spill] sm:$0xff] }
 0x92b   :  { %5859 = vmatprep.subr.bf16.mxu0 %v8700_v4  ;;  %5923 = vmatprep.subr.bf16.mxu1 %v8787_v12  ;;  %v9165_v4 = vld [vmem:[#allocation126_spill] sm:$0xff]  ;;  %v9176_v12 = vld [vmem:[#allocation137_spill] sm:$0xff] }
 0x92e   :  { %5861 = vmatpush1.bf16.msra.mxu0 %v8788_v24  ;;  %5925 = vmatpush1.bf16.msra.mxu1 %v8789_v55  ;;  %v9177_v24 = vld [vmem:[#allocation138_spill] sm:$0xff] }
 0x92f   :  { %5863 = vmatprep.subr.bf16.mxu0 %v8790_v63  ;;  %5927 = vmatprep.subr.bf16.mxu1 %v8791_v35 }
 0x932   :  { %5865 = vmatpush1.bf16.msra.mxu0 %v8792_v58  ;;  %5929 = vmatpush1.bf16.msra.mxu1 %v8793_v10  ;;  %v9178_v10 = vld [vmem:[#allocation140_spill] sm:$0xff] }
 0x933   :  { %5867 = vmatprep.subr.bf16.mxu0 %v8879_v6  ;;  %5931 = vmatprep.subr.bf16.mxu1 %v8795_v22 }
 0x936   :  { %5869 = vmatpush1.bf16.msra.mxu0 %v8796_v23  ;;  %5933 = vmatpush1.bf16.msra.mxu1 %v8797_v16 }
 0x937   :  { %5871 = vmatprep.subr.bf16.mxu0 %v8798_v43  ;;  %5935 = vmatprep.subr.bf16.mxu1 %v8799_v28 }
 0x93a   :  { %5873 = vmatpush1.bf16.msra.mxu0 %v8800_v26  ;;  %5937 = vmatpush1.bf16.msra.mxu1 %v8801_v34 }
 0x93b   :  { %5875 = vmatprep.subr.bf16.mxu0 %v8802_v41  ;;  %5939 = vmatprep.subr.bf16.mxu1 %v8803_v49 }
 0x93e   :  { %5877 = vmatpush1.bf16.msra.mxu0 %v8718_v8  ;;  %5941 = vmatpush1.bf16.msra.mxu1 %v8804_v51  ;;  %v9172_v8 = vld [vmem:[#allocation133_spill] sm:$0xff] }
 0x93f   :  { %5879 = vmatprep.subr.bf16.mxu0 %v8720_v40  ;;  %5943 = vmatprep.subr.bf16.mxu1 %v8721_v36  ;;  %v9173_v40 = vld [vmem:[#allocation134_spill] sm:$0xff]  ;;  %v9174_v36 = vld [vmem:[#allocation135_spill] sm:$0xff] }
 0x942   :  { %5881 = vmatpush1.bf16.msra.mxu0 %v8722_v46  ;;  %5945 = vmatpush1.bf16.msra.mxu1 %v8723_v19  ;;  %v9166_v19 = vld [vmem:[#allocation127_spill] sm:$0xff]  ;;  %v9175_v46 = vld [vmem:[#allocation136_spill] sm:$0xff] }
 0x943   :  { %5883 = vmatprep.subr.bf16.mxu0 %v8724_v18  ;;  %5947 = vmatprep.subr.bf16.mxu1 %v8725_v33  ;;  %v9167_v18 = vld [vmem:[#allocation128_spill] sm:$0xff]  ;;  %v9168_v33 = vld [vmem:[#allocation129_spill] sm:$0xff] }
 0x946   :  { %5885 = vmatpush1.bf16.msra.mxu0 %v8726_v47  ;;  %5949 = vmatpush1.bf16.msra.mxu1 %v8727_v48  ;;  %v9169_v47 = vld [vmem:[#allocation130_spill] sm:$0xff]  ;;  %v9170_v48 = vld [vmem:[#allocation131_spill] sm:$0xff] }
 0x947   :  { %5887 = vmatprep.subr.bf16.mxu0 %v8728_v50  ;;  %5951 = vmatprep.subr.bf16.mxu1 %v9155_v30  ;;  %v9171_v50 = vld [vmem:[#allocation132_spill] sm:$0xff] }
 0x94a   :  { %5889 = vmatpush1.bf16.msra.mxu0 %v9156_v13  ;;  %5953 = vmatpush1.bf16.msra.mxu1 %v9157_v25 }
 0x94b   :  { %5891 = vmatprep.subr.bf16.mxu0 %v9158_v60  ;;  %5955 = vmatprep.subr.bf16.mxu1 %v9159_v0 }
 0x94e   :  { %5893 = vmatpush1.bf16.msra.mxu0 %v9160_v32  ;;  %5957 = vmatpush1.bf16.msra.mxu1 %v9161_v37 }
 0x94f   :  { %5895 = vmatprep.subr.bf16.mxu0 %v9162_v29  ;;  %5959 = vmatprep.subr.bf16.mxu1 %v9163_v31 }
 0x952   :  { %5897 = vmatpush1.bf16.msra.mxu0 %v9164_v17  ;;  %5961 = vmatpush1.bf16.msra.mxu1 %v9165_v4  ;;  %v3764_v4 = vld [vmem:[%s8153_s4] sm:$0x3] }
 0x953   :  { %5899 = vmatprep.subr.bf16.mxu0 %v9166_v19  ;;  %5963 = vmatprep.subr.bf16.mxu1 %v9167_v18 }
 0x956   :  { %5901 = vmatpush1.bf16.msra.mxu0 %v9168_v33  ;;  %5965 = vmatpush1.bf16.msra.mxu1 %v9169_v47 }
 0x957   :  { %5903 = vmatprep.subr.bf16.mxu0 %v9170_v48  ;;  %5967 = vmatprep.subr.bf16.mxu1 %v9171_v50 }
 0x95a   :  { %5905 = vmatpush1.bf16.msra.mxu0 %v9172_v8  ;;  %5969 = vmatpush1.bf16.msra.mxu1 %v9173_v40 }
 0x95b   :  { %5907 = vmatprep.subr.bf16.mxu0 %v9174_v36  ;;  %5971 = vmatprep.subr.bf16.mxu1 %v9175_v46 }
 0x95e   :  { %5909 = vmatpush1.bf16.msra.mxu0 %v9176_v12  ;;  %5973 = vmatpush1.bf16.msra.mxu1 %v9177_v24 }
 0x961   :  { %3659 = vmatmul.mubr.f32.vlgmr.msra.gmra.mrb[30].mxu0 %v8061_v9  ;;  %3740 = vmatmul.mubr.f32.vlgmr.msra.gmra.mrb[30].mxu1 %v8061_v9 }
 0x9f4   :  { %v3490_v55 = vpop.f32.mrb[14].mxu0  ;;  %v3575_v63 = vpop.f32.mrb[14].mxu1 }
 0x9f5   :  { %v3492_v35 = vpop.f32.mrb[15].mxu0  ;;  %v3577_v58 = vpop.f32.mrb[15].mxu1  ;;  %v5988_v51 = vadd.f32 %v3490_v55, %v9178_v10  ;;  %v6004_v22 = vadd.f32 %v3575_v63, %v8690_v3  ;;  %v3885_v55 = vld [vmem:[#allocation3] ss:$0 sm:$0xff] }
 0x9f6   :  { %v5989_v23 = vadd.f32 %v3492_v35, %v8691_v2  ;;  %v6005_v16 = vadd.f32 %v3577_v58, %v8692_v52 }
 0x9f7   :  { %v3879_v43 = vmul.f32 -1.442695, %v5988_v51  ;;  %v3881_v28 = vmul.f32 -1.442695, %v6004_v22 }
 0x9f8   :  { %v3880_v26 = vmul.f32 -1.442695, %v5989_v23  ;;  %v3882_v34 = vmul.f32 -1.442695, %v6005_v16 }
 0x9f9   :  { %6337 = vpow2.f32 %v3879_v43 }
 0x9fa   :  { %6339 = vpow2.f32 %v3881_v28 }
 0x9fb   :  { %6341 = vpow2.f32 %v3880_v26 }
 0x9fc   :  { %6343 = vpow2.f32 %v3882_v34 }
 0xa03   :  { %v6338_v41 = vpop.eup %6337 }
 0xa04   :  { %v6340_v49 = vpop.eup %6339  ;;  %v3503_v11 = vadd.f32 1.0, %v6338_v41 }
 0xa05   :  { %v6342_v6 = vpop.eup %6341  ;;  %v3588_v21 = vadd.f32 1.0, %v6340_v49 }
 0xa06   :  { %v6344_v39 = vpop.eup %6343  ;;  %v3504_v1 = vadd.f32 1.0, %v6342_v6  ;;  %6345 = vrcp.f32 %v3503_v11 }
 0xa07   :  { %v3589_v3 = vadd.f32 1.0, %v6344_v39  ;;  %6347 = vrcp.f32 %v3588_v21 }
 0xa08   :  { %6349 = vrcp.f32 %v3504_v1 }
 0xa09   :  { %6351 = vrcp.f32 %v3589_v3 }
 0xa10   :  { %v6346_v53 = vpop.eup %6345 }
 0xa11   :  { %v6348_v27 = vpop.eup %6347 }
 0xa12   :  { %v6350_v44 = vpop.eup %6349  ;;  %v3669_v13 = vmul.f32 %v6348_v27, %v8055_v15  ;;  %v9181_v15 = vld [vmem:[#allocation139_spill] sm:$0xff] }
 0xa13   :  { %v6352_v9 = vpop.eup %6351  ;;  %v9182_v18 = vsub.s32 0, %v9181_v15  ;;  %v9183_v50 = vsub.s32 1, %v9181_v15 }
 0xa14   :  { %v3670_v0 = vmul.f32 %v6352_v9, %v8057_v38 }
 0xa15   :  { %v3769_v33 = vrot.slane %v3764_v4, %v9182_v18  ;;  %v3773_v8 = vrot.slane %v3764_v4, %v9183_v50 }
 0xa34   :  { %v3660_v2 = vpop.f32.mrb[30].mxu0  ;;  %v3741_v52 = vpop.f32.mrb[30].mxu1 }
 0xa35   :  { %v6020_v42 = vadd.f32 %v3660_v2, %v7143_v14  ;;  %v6036_v5 = vadd.f32 %v3741_v52, %v9179_v62  ;;  %v3662_v7 = vpop.f32.mrb[31].mxu0  ;;  %v3743_v59 = vpop.f32.mrb[31].mxu1 }
 0xa36   :  { %v6021_v56 = vadd.f32 %v3662_v7, %v9180_v20  ;;  %v6037_v45 = vadd.f32 %v3743_v59, %v7149_v61 }
 0xa37   :  { %6353 = vtanh.f32 %v6020_v42  ;;  %v3883_v57 = vmul.f32 -1.442695, %v6036_v5 }
 0xa38   :  { %6355 = vtanh.f32 %v6021_v56  ;;  %v3884_v54 = vmul.f32 -1.442695, %v6037_v45 }
 0xa39   :  { %6357 = vpow2.f32 %v3883_v57 }
 0xa3a   :  { %6359 = vpow2.f32 %v3884_v54 }
 0xa41   :  { %v6354_v14 = vpop.eup %6353 }
 0xa42   :  { %v6356_v30 = vpop.eup %6355  ;;  %v3671_v25 = vmul.f32 %v6354_v14, %v6346_v53 }
 0xa43   :  { %v6358_v60 = vpop.eup %6357  ;;  %v3672_v32 = vmul.f32 %v6356_v30, %v6350_v44 }
 0xa44   :  { %v6360_v61 = vpop.eup %6359  ;;  %v3673_v37 = vadd.f32 %v3671_v25, %v3669_v13  ;;  %v3754_v29 = vadd.f32 1.0, %v6358_v60 }
 0xa45   :  { %v3674_v31 = vadd.f32 %v3672_v32, %v3670_v0  ;;  %v3755_v17 = vadd.f32 1.0, %v6360_v61 }
 0xa46   :  { %6361 = vtanh.f32 %v3673_v37 }
 0xa47   :  { %6363 = vrcp.f32 %v3754_v29 }
 0xa48   :  { %6365 = vtanh.f32 %v3674_v31 }
 0xa49   :  { %6367 = vrcp.f32 %v3755_v17 }
 0xa50   :  { %v6362_v19 = vpop.eup %6361 }
 0xa51   :  { %v6364_v47 = vpop.eup %6363 }
 0xa52   :  { %v6366_v38 = vpop.eup %6365  ;;  %v3762_v48 = vmul.f32 %v6364_v47, %v6362_v19 }
 0xa53   :  { %v6368_v40 = vpop.eup %6367 }
 0xa54   :  { %v3763_v36 = vmul.f32 %v6368_v40, %v6366_v38  ;;  %v3776_v46 = vmul.f32 %v3769_v33, %v3762_v48 }
 0xa56   :  { %v3777_v12 = vmul.f32 %v3773_v8, %v3763_v36 }
 0xa58   :  { %v3778_v24 = vadd.f32 %v3777_v12, %v3776_v46 }
 0xa5a   :  { %3779 = vadd.xlane.f32.xlu0 %v3778_v24 }
 0xae7   :  { %v3780_v63 = vpop.xlane.xlu0 %3779 }
 0xae8   :  { %v3788_v35 = vadd.f32 %v3885_v55, %v3780_v63 }
 0xaea   :  { %3790 = vst.msk [vmem:[%s8155_s6] sm:$0xff] %vm3789_vm4, %v3788_v35 }
 0xaeb   :  { %3795 = vsyncpa [#allocation5], 1 }
 0xaec   :  { %3796 = vsyncpa [#allocation7], 1 }

</bundles_post_ra>
